<compile_context>
chip_gen: v5e
topology: v5e:2x2
jax: 0.10.0
libtpu: 0.0.40
codegen_flags: <defaults>
</compile_context>

<pallas_src>
import jax
import jax.numpy as jnp
from jax import lax
from jax.experimental import pallas as pl
from jax.experimental.pallas import tpu as pltpu


def _vmem():
    return pl.BlockSpec(memory_space=pltpu.MemorySpace.VMEM)


# ---------------------------------------------------------------------------
# Fused kernel: embedding + pos-scale + 2-layer bidirectional LSTM.
# ---------------------------------------------------------------------------
def _make_encoder_kernel(B, S, V, E, Hc):
    H = 2 * Hc

    def kernel(ids_ref, pos_ref, emb_ref,            # (S*B,1) i32, (S*B,1) f32, (V,E)
               h0_ref, c0_ref,                       # (4,B,Hc) each
               wih0f_ref, whh0f_ref, b0f_ref,        # layer0 fwd : (E,4Hc),(Hc,4Hc),(1,4Hc)
               wih0b_ref, whh0b_ref, b0b_ref,        # layer0 bwd
               wih1f_ref, whh1f_ref, b1f_ref,        # layer1 fwd : (H,4Hc),(Hc,4Hc),(1,4Hc)
               wih1b_ref, whh1b_ref, b1b_ref,        # layer1 bwd
               out_ref, hn_ref, cn_ref,              # (B,S,H), (4,B,Hc), (4,B,Hc)
               l0_ref):                              # VMEM scratch (S*B, H)
        f32 = jnp.float32

        # ---- embedding lookup as a one-hot matmul (MXU) + position scaling ----
        ids = ids_ref[...]                                           # time-major rows t*B+b
        vocab_iota = lax.broadcasted_iota(jnp.int32, (S * B, V), 1)
        onehot = (vocab_iota == ids).astype(f32)                     # (S*B, V)
        x = jnp.dot(onehot, emb_ref[...], preferred_element_type=f32)  # (S*B, E)
        x = x * pos_ref[...]                                         # broadcast over E

        def lstm_cell(xp_t, h, c, whh):
            # xp_t already holds x_t @ W_ih + b_ih + b_hh (hoisted); only the
            # recurrent dot is on the per-step critical path.
            gates = xp_t + jnp.dot(h, whh, preferred_element_type=f32)  # (B, 4Hc)
            sig = jax.nn.sigmoid(gates)        # one EUP pass over the full gate row
            th = jnp.tanh(gates)               # one EUP pass over the full gate row
            i_g = sig[:, 0:Hc]                 # PyTorch gate order: i, f, g, o
            f_g = sig[:, Hc:2 * Hc]
            g_g = th[:, 2 * Hc:3 * Hc]
            o_g = sig[:, 3 * Hc:4 * Hc]
            c_new = f_g * c + i_g * g_g
            h_new = o_g * jnp.tanh(c_new)      # third (last) EUP pass
            return h_new, c_new

        def run_direction(xp, whh, h, c, reverse):
            # Fully unrolled time loop (S static & small): static slice offsets
            # everywhere, cross-step scheduler visibility, no spill risk at
            # these sizes.
            hs = [None] * S
            ts = range(S - 1, -1, -1) if reverse else range(S)
            for t in ts:
                h, c = lstm_cell(xp[t * B:(t + 1) * B, :], h, c, whh)
                hs[t] = h
            return hs, h, c

        # ------------------------- layer 0 (bidirectional) -------------------------
        # Hoisted whole-sequence input projections: one MXU call per direction.
        xp0f = jnp.dot(x, wih0f_ref[...], preferred_element_type=f32) + b0f_ref[...]
        xp0b = jnp.dot(x, wih0b_ref[...], preferred_element_type=f32) + b0b_ref[...]

        hs0f, h_f, c_f = run_direction(xp0f, whh0f_ref[...], h0_ref[0], c0_ref[0], False)
        hs0b, h_b, c_b = run_direction(xp0b, whh0b_ref[...], h0_ref[1], c0_ref[1], True)
        hn_ref[0] = h_f
        cn_ref[0] = c_f
        hn_ref[1] = h_b
        cn_ref[1] = c_b

        # Bidirectional layer-0 output kept in VMEM scratch (time-major rows);
        # never round-trips through HBM.
        for t in range(S):
            l0_ref[t * B:(t + 1) * B, 0:Hc] = hs0f[t]
            l0_ref[t * B:(t + 1) * B, Hc:H] = hs0b[t]

        # ------------------------- layer 1 (bidirectional) -------------------------
        l0 = l0_ref[...]                                             # (S*B, H)
        xp1f = jnp.dot(l0, wih1f_ref[...], preferred_element_type=f32) + b1f_ref[...]
        xp1b = jnp.dot(l0, wih1b_ref[...], preferred_element_type=f32) + b1b_ref[...]

        hs1f, h_f, c_f = run_direction(xp1f, whh1f_ref[...], h0_ref[2], c0_ref[2], False)
        hs1b, h_b, c_b = run_direction(xp1b, whh1b_ref[...], h0_ref[3], c0_ref[3], True)
        hn_ref[2] = h_f
        cn_ref[2] = c_f
        hn_ref[3] = h_b
        cn_ref[3] = c_b

        # Batch-first output (B, S, H), written with static slices.
        for t in range(S):
            out_ref[:, t:t + 1, 0:Hc] = hs1f[t][:, None, :]
            out_ref[:, t:t + 1, Hc:H] = hs1b[t][:, None, :]

    return kernel


# ---------------------------------------------------------------------------
# Wrapper: parameter plumbing + single pallas_call.
# ---------------------------------------------------------------------------
def encoder_rnn_forward(params, input_ids, pos_tensor, hidden):
    h0, c0 = hidden
    B, S = input_ids.shape
    V, E = params["embedding"].shape
    Hc = h0.shape[-1]
    H = 2 * Hc

    # Only the tiny (B, S) id / position arrays are re-ordered to time-major
    # rows (row = t*B + b); all activations stay inside the fused kernel.
    ids_tm = jnp.transpose(input_ids.astype(jnp.int32)).reshape(S * B, 1)
    pos_tm = jnp.transpose(pos_tensor.astype(jnp.float32)).reshape(S * B, 1)

    kernel = _make_encoder_kernel(B, S, V, E, Hc)

    output, h_n, c_n = pl.pallas_call(
        kernel,
        out_shape=(
            jax.ShapeDtypeStruct((B, S, H), jnp.float32),
            jax.ShapeDtypeStruct((4, B, Hc), jnp.float32),
            jax.ShapeDtypeStruct((4, B, Hc), jnp.float32),
        ),
        in_specs=[_vmem()] * 17,
        out_specs=(_vmem(), _vmem(), _vmem()),
        scratch_shapes=[pltpu.VMEM((S * B, H), jnp.float32)],
    )(ids_tm, pos_tm, params["embedding"],
      h0, c0,
      params["wih_l0"], params["whh_l0"], params["b_l0"],
      params["wih_l0r"], params["whh_l0r"], params["b_l0r"],
      params["wih_l1"], params["whh_l1"], params["b_l1"],
      params["wih_l1r"], params["whh_l1r"], params["b_l1r"])

    return output, (h_n, c_n)


# ---------------------------------------------------------------------------
# Parameter init (PyTorch nn.LSTM / nn.Embedding conventions, pre-transposed).
# ---------------------------------------------------------------------------
def init_params(key, vocab, embedding_dim, hidden_dim):
    assert hidden_dim % 2 == 0
    Hc = hidden_dim // 2
    ks = jax.random.split(key, 17)
    bound = 1.0 / float(Hc) ** 0.5

    def u(k, shape):
        return jax.random.uniform(k, shape, jnp.float32, -bound, bound)

    params = {"embedding": jax.random.normal(ks[0], (vocab, embedding_dim), jnp.float32)}
    idx = 1
    for name, in_dim in (("l0", embedding_dim), ("l0r", embedding_dim),
                         ("l1", hidden_dim), ("l1r", hidden_dim)):
        wih = u(ks[idx + 0], (4 * Hc, in_dim))
        whh = u(ks[idx + 1], (4 * Hc, Hc))
        bih = u(ks[idx + 2], (4 * Hc,))
        bhh = u(ks[idx + 3], (4 * Hc,))
        idx += 4
        params[f"wih_{name}"] = jnp.transpose(wih)      # (in_dim, 4Hc)
        params[f"whh_{name}"] = jnp.transpose(whh)      # (Hc, 4Hc)
        params[f"b_{name}"] = (bih + bhh)[None, :]      # (1, 4Hc)
    return params


# ---------------------------------------------------------------------------
# Pure-JAX reference (same math) for a correctness cross-check.
# ---------------------------------------------------------------------------
def encoder_rnn_reference(params, input_ids, pos_tensor, hidden):
    h0, c0 = hidden
    x = params["embedding"][input_ids] * pos_tensor[..., None]       # (B, S, E)

    def run_layer(x_seq, wih_t, whh_t, b, h, c, reverse):
        Hc = h.shape[-1]

        def cell(carry, xt):
            h, c = carry
            g = xt @ wih_t + h @ whh_t + b
            i = jax.nn.sigmoid(g[:, 0:Hc])
            f = jax.nn.sigmoid(g[:, Hc:2 * Hc])
            gg = jnp.tanh(g[:, 2 * Hc:3 * Hc])
            o = jax.nn.sigmoid(g[:, 3 * Hc:4 * Hc])
            c = f * c + i * gg
            h = o * jnp.tanh(c)
            return (h, c), h

        xs = jnp.transpose(x_seq, (1, 0, 2))
        if reverse:
            xs = xs[::-1]
        (h, c), ys = lax.scan(cell, (h, c), xs)
        if reverse:
            ys = ys[::-1]
        return jnp.transpose(ys, (1, 0, 2)), h, c

    of0, hf0, cf0 = run_layer(x, params["wih_l0"], params["whh_l0"], params["b_l0"], h0[0], c0[0], False)
    ob0, hb0, cb0 = run_layer(x, params["wih_l0r"], params["whh_l0r"], params["b_l0r"], h0[1], c0[1], True)
    l0 = jnp.concatenate([of0, ob0], axis=-1)
    of1, hf1, cf1 = run_layer(l0, params["wih_l1"], params["whh_l1"], params["b_l1"], h0[2], c0[2], False)
    ob1, hb1, cb1 = run_layer(l0, params["wih_l1r"], params["whh_l1r"], params["b_l1r"], h0[3], c0[3], True)
    out = jnp.concatenate([of1, ob1], axis=-1)
    h_n = jnp.stack([hf0, hb0, hf1, hb1])
    c_n = jnp.stack([cf0, cb0, cf1, cb1])
    return out, (h_n, c_n)


if __name__ == "__main__":
    B, S = 2, 8
    embedding_dim = 16
    hidden_dim = 32
    vocab = 32                      # config.embedding_size + 1
    Hc = hidden_dim // 2

    key = jax.random.PRNGKey(0)
    kp, ki, kpos, kh, kc = jax.random.split(key, 5)

    params = init_params(kp, vocab, embedding_dim, hidden_dim)
    input_ids = jax.random.randint(ki, (B, S), 0, vocab, dtype=jnp.int32)
    pos_tensor = jax.random.uniform(kpos, (B, S), jnp.float32, 0.5, 1.5)
    h0 = jax.random.normal(kh, (4, B, Hc), jnp.float32)
    c0 = jax.random.normal(kc, (4, B, Hc), jnp.float32)

    fwd = jax.jit(encoder_rnn_forward)
    output, (h_n, c_n) = jax.block_until_ready(fwd(params, input_ids, pos_tensor, (h0, c0)))

    assert output.shape == (B, S, hidden_dim)
    assert h_n.shape == (4, B, Hc) and c_n.shape == (4, B, Hc)
    assert bool(jnp.all(jnp.isfinite(output)))
    assert bool(jnp.all(jnp.isfinite(h_n))) and bool(jnp.all(jnp.isfinite(c_n)))

    ref_out, (ref_h, ref_c) = encoder_rnn_reference(params, input_ids, pos_tensor, (h0, c0))
    assert bool(jnp.allclose(output, ref_out, atol=2e-2, rtol=2e-2))
    assert bool(jnp.allclose(h_n, ref_h, atol=2e-2, rtol=2e-2))
    assert bool(jnp.allclose(c_n, ref_c, atol=2e-2, rtol=2e-2))

    print("KERNEL_OK")
</pallas_src>

<mosaic_0001>
module attributes {stable_mosaic.version = 11 : i64} {
  func.func @kernel(%arg0: memref<16x1xi32, #tpu.memory_space<vmem>>, %arg1: memref<16x1xf32, #tpu.memory_space<vmem>>, %arg2: memref<32x16xf32, #tpu.memory_space<vmem>>, %arg3: memref<4x2x16xf32, #tpu.memory_space<vmem>>, %arg4: memref<4x2x16xf32, #tpu.memory_space<vmem>>, %arg5: memref<16x64xf32, #tpu.memory_space<vmem>>, %arg6: memref<16x64xf32, #tpu.memory_space<vmem>>, %arg7: memref<1x64xf32, #tpu.memory_space<vmem>>, %arg8: memref<16x64xf32, #tpu.memory_space<vmem>>, %arg9: memref<16x64xf32, #tpu.memory_space<vmem>>, %arg10: memref<1x64xf32, #tpu.memory_space<vmem>>, %arg11: memref<32x64xf32, #tpu.memory_space<vmem>>, %arg12: memref<16x64xf32, #tpu.memory_space<vmem>>, %arg13: memref<1x64xf32, #tpu.memory_space<vmem>>, %arg14: memref<32x64xf32, #tpu.memory_space<vmem>>, %arg15: memref<16x64xf32, #tpu.memory_space<vmem>>, %arg16: memref<1x64xf32, #tpu.memory_space<vmem>>, %arg17: memref<2x8x32xf32, #tpu.memory_space<vmem>>, %arg18: memref<4x2x16xf32, #tpu.memory_space<vmem>>, %arg19: memref<4x2x16xf32, #tpu.memory_space<vmem>>, %arg20: memref<16x32xf32, #tpu.memory_space<vmem>>) attributes {dimension_semantics = [], scalar_prefetch = 0 : i64, scratch_operands = 1 : i64, tpu.core_type = #tpu.core_type<tc>} {
    %c0 = arith.constant 0 : index
    %c0_0 = arith.constant 0 : index
    %0 = vector.load %arg0[%c0, %c0_0] : memref<16x1xi32, #tpu.memory_space<vmem>>, vector<16x1xi32>
    %1 = tpu.iota {dimensions = array<i32: 1>} : vector<16x32xi32>
    %2 = vector.broadcast %0 : vector<16x1xi32> to vector<16x32xi32>
    %3 = arith.cmpi eq, %1, %2 : vector<16x32xi32>
    %4 = arith.extui %3 : vector<16x32xi1> to vector<16x32xi32>
    %5 = arith.sitofp %4 : vector<16x32xi32> to vector<16x32xf32>
    %c0_1 = arith.constant 0 : index
    %c0_2 = arith.constant 0 : index
    %6 = vector.load %arg2[%c0_1, %c0_2] : memref<32x16xf32, #tpu.memory_space<vmem>>, vector<32x16xf32>
    %cst = arith.constant dense<0.000000e+00> : vector<16x16xf32>
    %7 = tpu.matmul %5, %6, %cst {dimension_numbers = #tpu.dot_dimension_numbers<[1], [0], [0], [1], [0, 0, 1, 1], [], []>} : vector<16x32xf32>, vector<32x16xf32>, vector<16x16xf32> -> vector<16x16xf32>
    %c0_3 = arith.constant 0 : index
    %c0_4 = arith.constant 0 : index
    %8 = vector.load %arg1[%c0_3, %c0_4] : memref<16x1xf32, #tpu.memory_space<vmem>>, vector<16x1xf32>
    %9 = vector.broadcast %8 : vector<16x1xf32> to vector<16x16xf32>
    %10 = arith.mulf %7, %9 : vector<16x16xf32>
    %c0_5 = arith.constant 0 : index
    %c0_6 = arith.constant 0 : index
    %11 = vector.load %arg5[%c0_5, %c0_6] : memref<16x64xf32, #tpu.memory_space<vmem>>, vector<16x64xf32>
    %cst_7 = arith.constant dense<0.000000e+00> : vector<16x64xf32>
    %12 = tpu.matmul %10, %11, %cst_7 {dimension_numbers = #tpu.dot_dimension_numbers<[1], [0], [0], [1], [0, 0, 1, 1], [], []>} : vector<16x16xf32>, vector<16x64xf32>, vector<16x64xf32> -> vector<16x64xf32>
    %c0_8 = arith.constant 0 : index
    %c0_9 = arith.constant 0 : index
    %13 = vector.load %arg7[%c0_8, %c0_9] : memref<1x64xf32, #tpu.memory_space<vmem>>, vector<1x64xf32>
    %14 = vector.broadcast %13 : vector<1x64xf32> to vector<16x64xf32>
    %15 = arith.addf %12, %14 : vector<16x64xf32>
    %c0_10 = arith.constant 0 : index
    %c0_11 = arith.constant 0 : index
    %16 = vector.load %arg8[%c0_10, %c0_11] : memref<16x64xf32, #tpu.memory_space<vmem>>, vector<16x64xf32>
    %cst_12 = arith.constant dense<0.000000e+00> : vector<16x64xf32>
    %17 = tpu.matmul %10, %16, %cst_12 {dimension_numbers = #tpu.dot_dimension_numbers<[1], [0], [0], [1], [0, 0, 1, 1], [], []>} : vector<16x16xf32>, vector<16x64xf32>, vector<16x64xf32> -> vector<16x64xf32>
    %c0_13 = arith.constant 0 : index
    %c0_14 = arith.constant 0 : index
    %18 = vector.load %arg10[%c0_13, %c0_14] : memref<1x64xf32, #tpu.memory_space<vmem>>, vector<1x64xf32>
    %19 = vector.broadcast %18 : vector<1x64xf32> to vector<16x64xf32>
    %20 = arith.addf %17, %19 : vector<16x64xf32>
    %c0_15 = arith.constant 0 : index
    %c0_16 = arith.constant 0 : index
    %21 = vector.load %arg6[%c0_15, %c0_16] : memref<16x64xf32, #tpu.memory_space<vmem>>, vector<16x64xf32>
    %c0_17 = arith.constant 0 : index
    %c0_18 = arith.constant 0 : index
    %c0_19 = arith.constant 0 : index
    %22 = vector.load %arg3[%c0_17, %c0_18, %c0_19] : memref<4x2x16xf32, #tpu.memory_space<vmem>>, vector<1x2x16xf32>
    %23 = vector.shape_cast %22 : vector<1x2x16xf32> to vector<2x16xf32>
    %c0_20 = arith.constant 0 : index
    %c0_21 = arith.constant 0 : index
    %c0_22 = arith.constant 0 : index
    %24 = vector.load %arg4[%c0_20, %c0_21, %c0_22] : memref<4x2x16xf32, #tpu.memory_space<vmem>>, vector<1x2x16xf32>
    %25 = vector.shape_cast %24 : vector<1x2x16xf32> to vector<2x16xf32>
    %26 = vector.extract_strided_slice %15 {offsets = [0, 0], sizes = [2, 64], strides = [1, 1]} : vector<16x64xf32> to vector<2x64xf32>
    %cst_23 = arith.constant dense<0.000000e+00> : vector<2x64xf32>
    %27 = tpu.matmul %23, %21, %cst_23 {dimension_numbers = #tpu.dot_dimension_numbers<[1], [0], [0], [1], [0, 0, 1, 1], [], []>} : vector<2x16xf32>, vector<16x64xf32>, vector<2x64xf32> -> vector<2x64xf32>
    %28 = arith.addf %26, %27 : vector<2x64xf32>
    %29 = arith.negf %28 : vector<2x64xf32>
    %30 = math.exp %29 : vector<2x64xf32>
    %cst_24 = arith.constant 1.000000e+00 : f32
    %31 = vector.broadcast %cst_24 : f32 to vector<2x64xf32>
    %32 = arith.addf %31, %30 : vector<2x64xf32>
    %33 = arith.divf %31, %32 : vector<2x64xf32>
    %34 = math.tanh %28 : vector<2x64xf32>
    %35 = vector.extract_strided_slice %33 {offsets = [0, 0], sizes = [2, 16], strides = [1, 1]} : vector<2x64xf32> to vector<2x16xf32>
    %36 = vector.extract_strided_slice %33 {offsets = [0, 16], sizes = [2, 16], strides = [1, 1]} : vector<2x64xf32> to vector<2x16xf32>
    %37 = vector.extract_strided_slice %34 {offsets = [0, 32], sizes = [2, 16], strides = [1, 1]} : vector<2x64xf32> to vector<2x16xf32>
    %38 = vector.extract_strided_slice %33 {offsets = [0, 48], sizes = [2, 16], strides = [1, 1]} : vector<2x64xf32> to vector<2x16xf32>
    %39 = arith.mulf %36, %25 : vector<2x16xf32>
    %40 = arith.mulf %35, %37 : vector<2x16xf32>
    %41 = arith.addf %39, %40 : vector<2x16xf32>
    %42 = math.tanh %41 : vector<2x16xf32>
    %43 = arith.mulf %38, %42 : vector<2x16xf32>
    %44 = vector.extract_strided_slice %15 {offsets = [2, 0], sizes = [2, 64], strides = [1, 1]} : vector<16x64xf32> to vector<2x64xf32>
    %cst_25 = arith.constant dense<0.000000e+00> : vector<2x64xf32>
    %45 = tpu.matmul %43, %21, %cst_25 {dimension_numbers = #tpu.dot_dimension_numbers<[1], [0], [0], [1], [0, 0, 1, 1], [], []>} : vector<2x16xf32>, vector<16x64xf32>, vector<2x64xf32> -> vector<2x64xf32>
    %46 = arith.addf %44, %45 : vector<2x64xf32>
    %47 = arith.negf %46 : vector<2x64xf32>
    %48 = math.exp %47 : vector<2x64xf32>
    %cst_26 = arith.constant 1.000000e+00 : f32
    %49 = vector.broadcast %cst_26 : f32 to vector<2x64xf32>
    %50 = arith.addf %49, %48 : vector<2x64xf32>
    %51 = arith.divf %49, %50 : vector<2x64xf32>
    %52 = math.tanh %46 : vector<2x64xf32>
    %53 = vector.extract_strided_slice %51 {offsets = [0, 0], sizes = [2, 16], strides = [1, 1]} : vector<2x64xf32> to vector<2x16xf32>
    %54 = vector.extract_strided_slice %51 {offsets = [0, 16], sizes = [2, 16], strides = [1, 1]} : vector<2x64xf32> to vector<2x16xf32>
    %55 = vector.extract_strided_slice %52 {offsets = [0, 32], sizes = [2, 16], strides = [1, 1]} : vector<2x64xf32> to vector<2x16xf32>
    %56 = vector.extract_strided_slice %51 {offsets = [0, 48], sizes = [2, 16], strides = [1, 1]} : vector<2x64xf32> to vector<2x16xf32>
    %57 = arith.mulf %54, %41 : vector<2x16xf32>
    %58 = arith.mulf %53, %55 : vector<2x16xf32>
    %59 = arith.addf %57, %58 : vector<2x16xf32>
    %60 = math.tanh %59 : vector<2x16xf32>
    %61 = arith.mulf %56, %60 : vector<2x16xf32>
    %62 = vector.extract_strided_slice %15 {offsets = [4, 0], sizes = [2, 64], strides = [1, 1]} : vector<16x64xf32> to vector<2x64xf32>
    %cst_27 = arith.constant dense<0.000000e+00> : vector<2x64xf32>
    %63 = tpu.matmul %61, %21, %cst_27 {dimension_numbers = #tpu.dot_dimension_numbers<[1], [0], [0], [1], [0, 0, 1, 1], [], []>} : vector<2x16xf32>, vector<16x64xf32>, vector<2x64xf32> -> vector<2x64xf32>
    %64 = arith.addf %62, %63 : vector<2x64xf32>
    %65 = arith.negf %64 : vector<2x64xf32>
    %66 = math.exp %65 : vector<2x64xf32>
    %cst_28 = arith.constant 1.000000e+00 : f32
    %67 = vector.broadcast %cst_28 : f32 to vector<2x64xf32>
    %68 = arith.addf %67, %66 : vector<2x64xf32>
    %69 = arith.divf %67, %68 : vector<2x64xf32>
    %70 = math.tanh %64 : vector<2x64xf32>
    %71 = vector.extract_strided_slice %69 {offsets = [0, 0], sizes = [2, 16], strides = [1, 1]} : vector<2x64xf32> to vector<2x16xf32>
    %72 = vector.extract_strided_slice %69 {offsets = [0, 16], sizes = [2, 16], strides = [1, 1]} : vector<2x64xf32> to vector<2x16xf32>
    %73 = vector.extract_strided_slice %70 {offsets = [0, 32], sizes = [2, 16], strides = [1, 1]} : vector<2x64xf32> to vector<2x16xf32>
    %74 = vector.extract_strided_slice %69 {offsets = [0, 48], sizes = [2, 16], strides = [1, 1]} : vector<2x64xf32> to vector<2x16xf32>
    %75 = arith.mulf %72, %59 : vector<2x16xf32>
    %76 = arith.mulf %71, %73 : vector<2x16xf32>
    %77 = arith.addf %75, %76 : vector<2x16xf32>
    %78 = math.tanh %77 : vector<2x16xf32>
    %79 = arith.mulf %74, %78 : vector<2x16xf32>
    %80 = vector.extract_strided_slice %15 {offsets = [6, 0], sizes = [2, 64], strides = [1, 1]} : vector<16x64xf32> to vector<2x64xf32>
    %cst_29 = arith.constant dense<0.000000e+00> : vector<2x64xf32>
    %81 = tpu.matmul %79, %21, %cst_29 {dimension_numbers = #tpu.dot_dimension_numbers<[1], [0], [0], [1], [0, 0, 1, 1], [], []>} : vector<2x16xf32>, vector<16x64xf32>, vector<2x64xf32> -> vector<2x64xf32>
    %82 = arith.addf %80, %81 : vector<2x64xf32>
    %83 = arith.negf %82 : vector<2x64xf32>
    %84 = math.exp %83 : vector<2x64xf32>
    %cst_30 = arith.constant 1.000000e+00 : f32
    %85 = vector.broadcast %cst_30 : f32 to vector<2x64xf32>
    %86 = arith.addf %85, %84 : vector<2x64xf32>
    %87 = arith.divf %85, %86 : vector<2x64xf32>
    %88 = math.tanh %82 : vector<2x64xf32>
    %89 = vector.extract_strided_slice %87 {offsets = [0, 0], sizes = [2, 16], strides = [1, 1]} : vector<2x64xf32> to vector<2x16xf32>
    %90 = vector.extract_strided_slice %87 {offsets = [0, 16], sizes = [2, 16], strides = [1, 1]} : vector<2x64xf32> to vector<2x16xf32>
    %91 = vector.extract_strided_slice %88 {offsets = [0, 32], sizes = [2, 16], strides = [1, 1]} : vector<2x64xf32> to vector<2x16xf32>
    %92 = vector.extract_strided_slice %87 {offsets = [0, 48], sizes = [2, 16], strides = [1, 1]} : vector<2x64xf32> to vector<2x16xf32>
    %93 = arith.mulf %90, %77 : vector<2x16xf32>
    %94 = arith.mulf %89, %91 : vector<2x16xf32>
    %95 = arith.addf %93, %94 : vector<2x16xf32>
    %96 = math.tanh %95 : vector<2x16xf32>
    %97 = arith.mulf %92, %96 : vector<2x16xf32>
    %98 = vector.extract_strided_slice %15 {offsets = [8, 0], sizes = [2, 64], strides = [1, 1]} : vector<16x64xf32> to vector<2x64xf32>
    %cst_31 = arith.constant dense<0.000000e+00> : vector<2x64xf32>
    %99 = tpu.matmul %97, %21, %cst_31 {dimension_numbers = #tpu.dot_dimension_numbers<[1], [0], [0], [1], [0, 0, 1, 1], [], []>} : vector<2x16xf32>, vector<16x64xf32>, vector<2x64xf32> -> vector<2x64xf32>
    %100 = arith.addf %98, %99 : vector<2x64xf32>
    %101 = arith.negf %100 : vector<2x64xf32>
    %102 = math.exp %101 : vector<2x64xf32>
    %cst_32 = arith.constant 1.000000e+00 : f32
    %103 = vector.broadcast %cst_32 : f32 to vector<2x64xf32>
    %104 = arith.addf %103, %102 : vector<2x64xf32>
    %105 = arith.divf %103, %104 : vector<2x64xf32>
    %106 = math.tanh %100 : vector<2x64xf32>
    %107 = vector.extract_strided_slice %105 {offsets = [0, 0], sizes = [2, 16], strides = [1, 1]} : vector<2x64xf32> to vector<2x16xf32>
    %108 = vector.extract_strided_slice %105 {offsets = [0, 16], sizes = [2, 16], strides = [1, 1]} : vector<2x64xf32> to vector<2x16xf32>
    %109 = vector.extract_strided_slice %106 {offsets = [0, 32], sizes = [2, 16], strides = [1, 1]} : vector<2x64xf32> to vector<2x16xf32>
    %110 = vector.extract_strided_slice %105 {offsets = [0, 48], sizes = [2, 16], strides = [1, 1]} : vector<2x64xf32> to vector<2x16xf32>
    %111 = arith.mulf %108, %95 : vector<2x16xf32>
    %112 = arith.mulf %107, %109 : vector<2x16xf32>
    %113 = arith.addf %111, %112 : vector<2x16xf32>
    %114 = math.tanh %113 : vector<2x16xf32>
    %115 = arith.mulf %110, %114 : vector<2x16xf32>
    %116 = vector.extract_strided_slice %15 {offsets = [10, 0], sizes = [2, 64], strides = [1, 1]} : vector<16x64xf32> to vector<2x64xf32>
    %cst_33 = arith.constant dense<0.000000e+00> : vector<2x64xf32>
    %117 = tpu.matmul %115, %21, %cst_33 {dimension_numbers = #tpu.dot_dimension_numbers<[1], [0], [0], [1], [0, 0, 1, 1], [], []>} : vector<2x16xf32>, vector<16x64xf32>, vector<2x64xf32> -> vector<2x64xf32>
    %118 = arith.addf %116, %117 : vector<2x64xf32>
    %119 = arith.negf %118 : vector<2x64xf32>
    %120 = math.exp %119 : vector<2x64xf32>
    %cst_34 = arith.constant 1.000000e+00 : f32
    %121 = vector.broadcast %cst_34 : f32 to vector<2x64xf32>
    %122 = arith.addf %121, %120 : vector<2x64xf32>
    %123 = arith.divf %121, %122 : vector<2x64xf32>
    %124 = math.tanh %118 : vector<2x64xf32>
    %125 = vector.extract_strided_slice %123 {offsets = [0, 0], sizes = [2, 16], strides = [1, 1]} : vector<2x64xf32> to vector<2x16xf32>
    %126 = vector.extract_strided_slice %123 {offsets = [0, 16], sizes = [2, 16], strides = [1, 1]} : vector<2x64xf32> to vector<2x16xf32>
    %127 = vector.extract_strided_slice %124 {offsets = [0, 32], sizes = [2, 16], strides = [1, 1]} : vector<2x64xf32> to vector<2x16xf32>
    %128 = vector.extract_strided_slice %123 {offsets = [0, 48], sizes = [2, 16], strides = [1, 1]} : vector<2x64xf32> to vector<2x16xf32>
    %129 = arith.mulf %126, %113 : vector<2x16xf32>
    %130 = arith.mulf %125, %127 : vector<2x16xf32>
    %131 = arith.addf %129, %130 : vector<2x16xf32>
    %132 = math.tanh %131 : vector<2x16xf32>
    %133 = arith.mulf %128, %132 : vector<2x16xf32>
    %134 = vector.extract_strided_slice %15 {offsets = [12, 0], sizes = [2, 64], strides = [1, 1]} : vector<16x64xf32> to vector<2x64xf32>
    %cst_35 = arith.constant dense<0.000000e+00> : vector<2x64xf32>
    %135 = tpu.matmul %133, %21, %cst_35 {dimension_numbers = #tpu.dot_dimension_numbers<[1], [0], [0], [1], [0, 0, 1, 1], [], []>} : vector<2x16xf32>, vector<16x64xf32>, vector<2x64xf32> -> vector<2x64xf32>
    %136 = arith.addf %134, %135 : vector<2x64xf32>
    %137 = arith.negf %136 : vector<2x64xf32>
    %138 = math.exp %137 : vector<2x64xf32>
    %cst_36 = arith.constant 1.000000e+00 : f32
    %139 = vector.broadcast %cst_36 : f32 to vector<2x64xf32>
    %140 = arith.addf %139, %138 : vector<2x64xf32>
    %141 = arith.divf %139, %140 : vector<2x64xf32>
    %142 = math.tanh %136 : vector<2x64xf32>
    %143 = vector.extract_strided_slice %141 {offsets = [0, 0], sizes = [2, 16], strides = [1, 1]} : vector<2x64xf32> to vector<2x16xf32>
    %144 = vector.extract_strided_slice %141 {offsets = [0, 16], sizes = [2, 16], strides = [1, 1]} : vector<2x64xf32> to vector<2x16xf32>
    %145 = vector.extract_strided_slice %142 {offsets = [0, 32], sizes = [2, 16], strides = [1, 1]} : vector<2x64xf32> to vector<2x16xf32>
    %146 = vector.extract_strided_slice %141 {offsets = [0, 48], sizes = [2, 16], strides = [1, 1]} : vector<2x64xf32> to vector<2x16xf32>
    %147 = arith.mulf %144, %131 : vector<2x16xf32>
    %148 = arith.mulf %143, %145 : vector<2x16xf32>
    %149 = arith.addf %147, %148 : vector<2x16xf32>
    %150 = math.tanh %149 : vector<2x16xf32>
    %151 = arith.mulf %146, %150 : vector<2x16xf32>
    %152 = vector.extract_strided_slice %15 {offsets = [14, 0], sizes = [2, 64], strides = [1, 1]} : vector<16x64xf32> to vector<2x64xf32>
    %cst_37 = arith.constant dense<0.000000e+00> : vector<2x64xf32>
    %153 = tpu.matmul %151, %21, %cst_37 {dimension_numbers = #tpu.dot_dimension_numbers<[1], [0], [0], [1], [0, 0, 1, 1], [], []>} : vector<2x16xf32>, vector<16x64xf32>, vector<2x64xf32> -> vector<2x64xf32>
    %154 = arith.addf %152, %153 : vector<2x64xf32>
    %155 = arith.negf %154 : vector<2x64xf32>
    %156 = math.exp %155 : vector<2x64xf32>
    %cst_38 = arith.constant 1.000000e+00 : f32
    %157 = vector.broadcast %cst_38 : f32 to vector<2x64xf32>
    %158 = arith.addf %157, %156 : vector<2x64xf32>
    %159 = arith.divf %157, %158 : vector<2x64xf32>
    %160 = math.tanh %154 : vector<2x64xf32>
    %161 = vector.extract_strided_slice %159 {offsets = [0, 0], sizes = [2, 16], strides = [1, 1]} : vector<2x64xf32> to vector<2x16xf32>
    %162 = vector.extract_strided_slice %159 {offsets = [0, 16], sizes = [2, 16], strides = [1, 1]} : vector<2x64xf32> to vector<2x16xf32>
    %163 = vector.extract_strided_slice %160 {offsets = [0, 32], sizes = [2, 16], strides = [1, 1]} : vector<2x64xf32> to vector<2x16xf32>
    %164 = vector.extract_strided_slice %159 {offsets = [0, 48], sizes = [2, 16], strides = [1, 1]} : vector<2x64xf32> to vector<2x16xf32>
    %165 = arith.mulf %162, %149 : vector<2x16xf32>
    %166 = arith.mulf %161, %163 : vector<2x16xf32>
    %167 = arith.addf %165, %166 : vector<2x16xf32>
    %168 = math.tanh %167 : vector<2x16xf32>
    %169 = arith.mulf %164, %168 : vector<2x16xf32>
    %c0_39 = arith.constant 0 : index
    %c0_40 = arith.constant 0 : index
    %170 = vector.load %arg9[%c0_39, %c0_40] : memref<16x64xf32, #tpu.memory_space<vmem>>, vector<16x64xf32>
    %c1 = arith.constant 1 : index
    %c0_41 = arith.constant 0 : index
    %c0_42 = arith.constant 0 : index
    %171 = vector.load %arg3[%c1, %c0_41, %c0_42] : memref<4x2x16xf32, #tpu.memory_space<vmem>>, vector<1x2x16xf32>
    %172 = vector.shape_cast %171 : vector<1x2x16xf32> to vector<2x16xf32>
    %c1_43 = arith.constant 1 : index
    %c0_44 = arith.constant 0 : index
    %c0_45 = arith.constant 0 : index
    %173 = vector.load %arg4[%c1_43, %c0_44, %c0_45] : memref<4x2x16xf32, #tpu.memory_space<vmem>>, vector<1x2x16xf32>
    %174 = vector.shape_cast %173 : vector<1x2x16xf32> to vector<2x16xf32>
    %175 = vector.extract_strided_slice %20 {offsets = [14, 0], sizes = [2, 64], strides = [1, 1]} : vector<16x64xf32> to vector<2x64xf32>
    %cst_46 = arith.constant dense<0.000000e+00> : vector<2x64xf32>
    %176 = tpu.matmul %172, %170, %cst_46 {dimension_numbers = #tpu.dot_dimension_numbers<[1], [0], [0], [1], [0, 0, 1, 1], [], []>} : vector<2x16xf32>, vector<16x64xf32>, vector<2x64xf32> -> vector<2x64xf32>
    %177 = arith.addf %175, %176 : vector<2x64xf32>
    %178 = arith.negf %177 : vector<2x64xf32>
    %179 = math.exp %178 : vector<2x64xf32>
    %cst_47 = arith.constant 1.000000e+00 : f32
    %180 = vector.broadcast %cst_47 : f32 to vector<2x64xf32>
    %181 = arith.addf %180, %179 : vector<2x64xf32>
    %182 = arith.divf %180, %181 : vector<2x64xf32>
    %183 = math.tanh %177 : vector<2x64xf32>
    %184 = vector.extract_strided_slice %182 {offsets = [0, 0], sizes = [2, 16], strides = [1, 1]} : vector<2x64xf32> to vector<2x16xf32>
    %185 = vector.extract_strided_slice %182 {offsets = [0, 16], sizes = [2, 16], strides = [1, 1]} : vector<2x64xf32> to vector<2x16xf32>
    %186 = vector.extract_strided_slice %183 {offsets = [0, 32], sizes = [2, 16], strides = [1, 1]} : vector<2x64xf32> to vector<2x16xf32>
    %187 = vector.extract_strided_slice %182 {offsets = [0, 48], sizes = [2, 16], strides = [1, 1]} : vector<2x64xf32> to vector<2x16xf32>
    %188 = arith.mulf %185, %174 : vector<2x16xf32>
    %189 = arith.mulf %184, %186 : vector<2x16xf32>
    %190 = arith.addf %188, %189 : vector<2x16xf32>
    %191 = math.tanh %190 : vector<2x16xf32>
    %192 = arith.mulf %187, %191 : vector<2x16xf32>
    %193 = vector.extract_strided_slice %20 {offsets = [12, 0], sizes = [2, 64], strides = [1, 1]} : vector<16x64xf32> to vector<2x64xf32>
    %cst_48 = arith.constant dense<0.000000e+00> : vector<2x64xf32>
    %194 = tpu.matmul %192, %170, %cst_48 {dimension_numbers = #tpu.dot_dimension_numbers<[1], [0], [0], [1], [0, 0, 1, 1], [], []>} : vector<2x16xf32>, vector<16x64xf32>, vector<2x64xf32> -> vector<2x64xf32>
    %195 = arith.addf %193, %194 : vector<2x64xf32>
    %196 = arith.negf %195 : vector<2x64xf32>
    %197 = math.exp %196 : vector<2x64xf32>
    %cst_49 = arith.constant 1.000000e+00 : f32
    %198 = vector.broadcast %cst_49 : f32 to vector<2x64xf32>
    %199 = arith.addf %198, %197 : vector<2x64xf32>
    %200 = arith.divf %198, %199 : vector<2x64xf32>
    %201 = math.tanh %195 : vector<2x64xf32>
    %202 = vector.extract_strided_slice %200 {offsets = [0, 0], sizes = [2, 16], strides = [1, 1]} : vector<2x64xf32> to vector<2x16xf32>
    %203 = vector.extract_strided_slice %200 {offsets = [0, 16], sizes = [2, 16], strides = [1, 1]} : vector<2x64xf32> to vector<2x16xf32>
    %204 = vector.extract_strided_slice %201 {offsets = [0, 32], sizes = [2, 16], strides = [1, 1]} : vector<2x64xf32> to vector<2x16xf32>
    %205 = vector.extract_strided_slice %200 {offsets = [0, 48], sizes = [2, 16], strides = [1, 1]} : vector<2x64xf32> to vector<2x16xf32>
    %206 = arith.mulf %203, %190 : vector<2x16xf32>
    %207 = arith.mulf %202, %204 : vector<2x16xf32>
    %208 = arith.addf %206, %207 : vector<2x16xf32>
    %209 = math.tanh %208 : vector<2x16xf32>
    %210 = arith.mulf %205, %209 : vector<2x16xf32>
    %211 = vector.extract_strided_slice %20 {offsets = [10, 0], sizes = [2, 64], strides = [1, 1]} : vector<16x64xf32> to vector<2x64xf32>
    %cst_50 = arith.constant dense<0.000000e+00> : vector<2x64xf32>
    %212 = tpu.matmul %210, %170, %cst_50 {dimension_numbers = #tpu.dot_dimension_numbers<[1], [0], [0], [1], [0, 0, 1, 1], [], []>} : vector<2x16xf32>, vector<16x64xf32>, vector<2x64xf32> -> vector<2x64xf32>
    %213 = arith.addf %211, %212 : vector<2x64xf32>
    %214 = arith.negf %213 : vector<2x64xf32>
    %215 = math.exp %214 : vector<2x64xf32>
    %cst_51 = arith.constant 1.000000e+00 : f32
    %216 = vector.broadcast %cst_51 : f32 to vector<2x64xf32>
    %217 = arith.addf %216, %215 : vector<2x64xf32>
    %218 = arith.divf %216, %217 : vector<2x64xf32>
    %219 = math.tanh %213 : vector<2x64xf32>
    %220 = vector.extract_strided_slice %218 {offsets = [0, 0], sizes = [2, 16], strides = [1, 1]} : vector<2x64xf32> to vector<2x16xf32>
    %221 = vector.extract_strided_slice %218 {offsets = [0, 16], sizes = [2, 16], strides = [1, 1]} : vector<2x64xf32> to vector<2x16xf32>
    %222 = vector.extract_strided_slice %219 {offsets = [0, 32], sizes = [2, 16], strides = [1, 1]} : vector<2x64xf32> to vector<2x16xf32>
    %223 = vector.extract_strided_slice %218 {offsets = [0, 48], sizes = [2, 16], strides = [1, 1]} : vector<2x64xf32> to vector<2x16xf32>
    %224 = arith.mulf %221, %208 : vector<2x16xf32>
    %225 = arith.mulf %220, %222 : vector<2x16xf32>
    %226 = arith.addf %224, %225 : vector<2x16xf32>
    %227 = math.tanh %226 : vector<2x16xf32>
    %228 = arith.mulf %223, %227 : vector<2x16xf32>
    %229 = vector.extract_strided_slice %20 {offsets = [8, 0], sizes = [2, 64], strides = [1, 1]} : vector<16x64xf32> to vector<2x64xf32>
    %cst_52 = arith.constant dense<0.000000e+00> : vector<2x64xf32>
    %230 = tpu.matmul %228, %170, %cst_52 {dimension_numbers = #tpu.dot_dimension_numbers<[1], [0], [0], [1], [0, 0, 1, 1], [], []>} : vector<2x16xf32>, vector<16x64xf32>, vector<2x64xf32> -> vector<2x64xf32>
    %231 = arith.addf %229, %230 : vector<2x64xf32>
    %232 = arith.negf %231 : vector<2x64xf32>
    %233 = math.exp %232 : vector<2x64xf32>
    %cst_53 = arith.constant 1.000000e+00 : f32
    %234 = vector.broadcast %cst_53 : f32 to vector<2x64xf32>
    %235 = arith.addf %234, %233 : vector<2x64xf32>
    %236 = arith.divf %234, %235 : vector<2x64xf32>
    %237 = math.tanh %231 : vector<2x64xf32>
    %238 = vector.extract_strided_slice %236 {offsets = [0, 0], sizes = [2, 16], strides = [1, 1]} : vector<2x64xf32> to vector<2x16xf32>
    %239 = vector.extract_strided_slice %236 {offsets = [0, 16], sizes = [2, 16], strides = [1, 1]} : vector<2x64xf32> to vector<2x16xf32>
    %240 = vector.extract_strided_slice %237 {offsets = [0, 32], sizes = [2, 16], strides = [1, 1]} : vector<2x64xf32> to vector<2x16xf32>
    %241 = vector.extract_strided_slice %236 {offsets = [0, 48], sizes = [2, 16], strides = [1, 1]} : vector<2x64xf32> to vector<2x16xf32>
    %242 = arith.mulf %239, %226 : vector<2x16xf32>
    %243 = arith.mulf %238, %240 : vector<2x16xf32>
    %244 = arith.addf %242, %243 : vector<2x16xf32>
    %245 = math.tanh %244 : vector<2x16xf32>
    %246 = arith.mulf %241, %245 : vector<2x16xf32>
    %247 = vector.extract_strided_slice %20 {offsets = [6, 0], sizes = [2, 64], strides = [1, 1]} : vector<16x64xf32> to vector<2x64xf32>
    %cst_54 = arith.constant dense<0.000000e+00> : vector<2x64xf32>
    %248 = tpu.matmul %246, %170, %cst_54 {dimension_numbers = #tpu.dot_dimension_numbers<[1], [0], [0], [1], [0, 0, 1, 1], [], []>} : vector<2x16xf32>, vector<16x64xf32>, vector<2x64xf32> -> vector<2x64xf32>
    %249 = arith.addf %247, %248 : vector<2x64xf32>
    %250 = arith.negf %249 : vector<2x64xf32>
    %251 = math.exp %250 : vector<2x64xf32>
    %cst_55 = arith.constant 1.000000e+00 : f32
    %252 = vector.broadcast %cst_55 : f32 to vector<2x64xf32>
    %253 = arith.addf %252, %251 : vector<2x64xf32>
    %254 = arith.divf %252, %253 : vector<2x64xf32>
    %255 = math.tanh %249 : vector<2x64xf32>
    %256 = vector.extract_strided_slice %254 {offsets = [0, 0], sizes = [2, 16], strides = [1, 1]} : vector<2x64xf32> to vector<2x16xf32>
    %257 = vector.extract_strided_slice %254 {offsets = [0, 16], sizes = [2, 16], strides = [1, 1]} : vector<2x64xf32> to vector<2x16xf32>
    %258 = vector.extract_strided_slice %255 {offsets = [0, 32], sizes = [2, 16], strides = [1, 1]} : vector<2x64xf32> to vector<2x16xf32>
    %259 = vector.extract_strided_slice %254 {offsets = [0, 48], sizes = [2, 16], strides = [1, 1]} : vector<2x64xf32> to vector<2x16xf32>
    %260 = arith.mulf %257, %244 : vector<2x16xf32>
    %261 = arith.mulf %256, %258 : vector<2x16xf32>
    %262 = arith.addf %260, %261 : vector<2x16xf32>
    %263 = math.tanh %262 : vector<2x16xf32>
    %264 = arith.mulf %259, %263 : vector<2x16xf32>
    %265 = vector.extract_strided_slice %20 {offsets = [4, 0], sizes = [2, 64], strides = [1, 1]} : vector<16x64xf32> to vector<2x64xf32>
    %cst_56 = arith.constant dense<0.000000e+00> : vector<2x64xf32>
    %266 = tpu.matmul %264, %170, %cst_56 {dimension_numbers = #tpu.dot_dimension_numbers<[1], [0], [0], [1], [0, 0, 1, 1], [], []>} : vector<2x16xf32>, vector<16x64xf32>, vector<2x64xf32> -> vector<2x64xf32>
    %267 = arith.addf %265, %266 : vector<2x64xf32>
    %268 = arith.negf %267 : vector<2x64xf32>
    %269 = math.exp %268 : vector<2x64xf32>
    %cst_57 = arith.constant 1.000000e+00 : f32
    %270 = vector.broadcast %cst_57 : f32 to vector<2x64xf32>
    %271 = arith.addf %270, %269 : vector<2x64xf32>
    %272 = arith.divf %270, %271 : vector<2x64xf32>
    %273 = math.tanh %267 : vector<2x64xf32>
    %274 = vector.extract_strided_slice %272 {offsets = [0, 0], sizes = [2, 16], strides = [1, 1]} : vector<2x64xf32> to vector<2x16xf32>
    %275 = vector.extract_strided_slice %272 {offsets = [0, 16], sizes = [2, 16], strides = [1, 1]} : vector<2x64xf32> to vector<2x16xf32>
    %276 = vector.extract_strided_slice %273 {offsets = [0, 32], sizes = [2, 16], strides = [1, 1]} : vector<2x64xf32> to vector<2x16xf32>
    %277 = vector.extract_strided_slice %272 {offsets = [0, 48], sizes = [2, 16], strides = [1, 1]} : vector<2x64xf32> to vector<2x16xf32>
    %278 = arith.mulf %275, %262 : vector<2x16xf32>
    %279 = arith.mulf %274, %276 : vector<2x16xf32>
    %280 = arith.addf %278, %279 : vector<2x16xf32>
    %281 = math.tanh %280 : vector<2x16xf32>
    %282 = arith.mulf %277, %281 : vector<2x16xf32>
    %283 = vector.extract_strided_slice %20 {offsets = [2, 0], sizes = [2, 64], strides = [1, 1]} : vector<16x64xf32> to vector<2x64xf32>
    %cst_58 = arith.constant dense<0.000000e+00> : vector<2x64xf32>
    %284 = tpu.matmul %282, %170, %cst_58 {dimension_numbers = #tpu.dot_dimension_numbers<[1], [0], [0], [1], [0, 0, 1, 1], [], []>} : vector<2x16xf32>, vector<16x64xf32>, vector<2x64xf32> -> vector<2x64xf32>
    %285 = arith.addf %283, %284 : vector<2x64xf32>
    %286 = arith.negf %285 : vector<2x64xf32>
    %287 = math.exp %286 : vector<2x64xf32>
    %cst_59 = arith.constant 1.000000e+00 : f32
    %288 = vector.broadcast %cst_59 : f32 to vector<2x64xf32>
    %289 = arith.addf %288, %287 : vector<2x64xf32>
    %290 = arith.divf %288, %289 : vector<2x64xf32>
    %291 = math.tanh %285 : vector<2x64xf32>
    %292 = vector.extract_strided_slice %290 {offsets = [0, 0], sizes = [2, 16], strides = [1, 1]} : vector<2x64xf32> to vector<2x16xf32>
    %293 = vector.extract_strided_slice %290 {offsets = [0, 16], sizes = [2, 16], strides = [1, 1]} : vector<2x64xf32> to vector<2x16xf32>
    %294 = vector.extract_strided_slice %291 {offsets = [0, 32], sizes = [2, 16], strides = [1, 1]} : vector<2x64xf32> to vector<2x16xf32>
    %295 = vector.extract_strided_slice %290 {offsets = [0, 48], sizes = [2, 16], strides = [1, 1]} : vector<2x64xf32> to vector<2x16xf32>
    %296 = arith.mulf %293, %280 : vector<2x16xf32>
    %297 = arith.mulf %292, %294 : vector<2x16xf32>
    %298 = arith.addf %296, %297 : vector<2x16xf32>
    %299 = math.tanh %298 : vector<2x16xf32>
    %300 = arith.mulf %295, %299 : vector<2x16xf32>
    %301 = vector.extract_strided_slice %20 {offsets = [0, 0], sizes = [2, 64], strides = [1, 1]} : vector<16x64xf32> to vector<2x64xf32>
    %cst_60 = arith.constant dense<0.000000e+00> : vector<2x64xf32>
    %302 = tpu.matmul %300, %170, %cst_60 {dimension_numbers = #tpu.dot_dimension_numbers<[1], [0], [0], [1], [0, 0, 1, 1], [], []>} : vector<2x16xf32>, vector<16x64xf32>, vector<2x64xf32> -> vector<2x64xf32>
    %303 = arith.addf %301, %302 : vector<2x64xf32>
    %304 = arith.negf %303 : vector<2x64xf32>
    %305 = math.exp %304 : vector<2x64xf32>
    %cst_61 = arith.constant 1.000000e+00 : f32
    %306 = vector.broadcast %cst_61 : f32 to vector<2x64xf32>
    %307 = arith.addf %306, %305 : vector<2x64xf32>
    %308 = arith.divf %306, %307 : vector<2x64xf32>
    %309 = math.tanh %303 : vector<2x64xf32>
    %310 = vector.extract_strided_slice %308 {offsets = [0, 0], sizes = [2, 16], strides = [1, 1]} : vector<2x64xf32> to vector<2x16xf32>
    %311 = vector.extract_strided_slice %308 {offsets = [0, 16], sizes = [2, 16], strides = [1, 1]} : vector<2x64xf32> to vector<2x16xf32>
    %312 = vector.extract_strided_slice %309 {offsets = [0, 32], sizes = [2, 16], strides = [1, 1]} : vector<2x64xf32> to vector<2x16xf32>
    %313 = vector.extract_strided_slice %308 {offsets = [0, 48], sizes = [2, 16], strides = [1, 1]} : vector<2x64xf32> to vector<2x16xf32>
    %314 = arith.mulf %311, %298 : vector<2x16xf32>
    %315 = arith.mulf %310, %312 : vector<2x16xf32>
    %316 = arith.addf %314, %315 : vector<2x16xf32>
    %317 = math.tanh %316 : vector<2x16xf32>
    %318 = arith.mulf %313, %317 : vector<2x16xf32>
    %c0_62 = arith.constant 0 : index
    %c0_63 = arith.constant 0 : index
    %c0_64 = arith.constant 0 : index
    %319 = vector.load %arg18[%c0_62, %c0_63, %c0_64] : memref<4x2x16xf32, #tpu.memory_space<vmem>>, vector<1x2x16xf32>
    %320 = vector.shape_cast %319 : vector<1x2x16xf32> to vector<2x16xf32>
    %321 = vector.shape_cast %169 : vector<2x16xf32> to vector<1x2x16xf32>
    tpu.vector_store %arg18[%c0_62, %c0_63, %c0_64], %321 {strides = array<i32>} : memref<4x2x16xf32, #tpu.memory_space<vmem>>, vector<1x2x16xf32>,
    %c0_65 = arith.constant 0 : index
    %c0_66 = arith.constant 0 : index
    %c0_67 = arith.constant 0 : index
    %322 = vector.load %arg19[%c0_65, %c0_66, %c0_67] : memref<4x2x16xf32, #tpu.memory_space<vmem>>, vector<1x2x16xf32>
    %323 = vector.shape_cast %322 : vector<1x2x16xf32> to vector<2x16xf32>
    %324 = vector.shape_cast %167 : vector<2x16xf32> to vector<1x2x16xf32>
    tpu.vector_store %arg19[%c0_65, %c0_66, %c0_67], %324 {strides = array<i32>} : memref<4x2x16xf32, #tpu.memory_space<vmem>>, vector<1x2x16xf32>,
    %c1_68 = arith.constant 1 : index
    %c0_69 = arith.constant 0 : index
    %c0_70 = arith.constant 0 : index
    %325 = vector.load %arg18[%c1_68, %c0_69, %c0_70] : memref<4x2x16xf32, #tpu.memory_space<vmem>>, vector<1x2x16xf32>
    %326 = vector.shape_cast %325 : vector<1x2x16xf32> to vector<2x16xf32>
    %327 = vector.shape_cast %318 : vector<2x16xf32> to vector<1x2x16xf32>
    tpu.vector_store %arg18[%c1_68, %c0_69, %c0_70], %327 {strides = array<i32>} : memref<4x2x16xf32, #tpu.memory_space<vmem>>, vector<1x2x16xf32>,
    %c1_71 = arith.constant 1 : index
    %c0_72 = arith.constant 0 : index
    %c0_73 = arith.constant 0 : index
    %328 = vector.load %arg19[%c1_71, %c0_72, %c0_73] : memref<4x2x16xf32, #tpu.memory_space<vmem>>, vector<1x2x16xf32>
    %329 = vector.shape_cast %328 : vector<1x2x16xf32> to vector<2x16xf32>
    %330 = vector.shape_cast %316 : vector<2x16xf32> to vector<1x2x16xf32>
    tpu.vector_store %arg19[%c1_71, %c0_72, %c0_73], %330 {strides = array<i32>} : memref<4x2x16xf32, #tpu.memory_space<vmem>>, vector<1x2x16xf32>,
    %c0_74 = arith.constant 0 : index
    %c0_75 = arith.constant 0 : index
    %331 = vector.load %arg20[%c0_74, %c0_75] : memref<16x32xf32, #tpu.memory_space<vmem>>, vector<2x16xf32>
    tpu.vector_store %arg20[%c0_74, %c0_75], %43 {strides = array<i32>} : memref<16x32xf32, #tpu.memory_space<vmem>>, vector<2x16xf32>,
    %c0_76 = arith.constant 0 : index
    %c16 = arith.constant 16 : index
    %332 = vector.load %arg20[%c0_76, %c16] : memref<16x32xf32, #tpu.memory_space<vmem>>, vector<2x16xf32>
    tpu.vector_store %arg20[%c0_76, %c16], %318 {strides = array<i32>} : memref<16x32xf32, #tpu.memory_space<vmem>>, vector<2x16xf32>,
    %c2 = arith.constant 2 : index
    %c0_77 = arith.constant 0 : index
    %333 = vector.load %arg20[%c2, %c0_77] : memref<16x32xf32, #tpu.memory_space<vmem>>, vector<2x16xf32>
    tpu.vector_store %arg20[%c2, %c0_77], %61 {strides = array<i32>} : memref<16x32xf32, #tpu.memory_space<vmem>>, vector<2x16xf32>,
    %c2_78 = arith.constant 2 : index
    %c16_79 = arith.constant 16 : index
    %334 = vector.load %arg20[%c2_78, %c16_79] : memref<16x32xf32, #tpu.memory_space<vmem>>, vector<2x16xf32>
    tpu.vector_store %arg20[%c2_78, %c16_79], %300 {strides = array<i32>} : memref<16x32xf32, #tpu.memory_space<vmem>>, vector<2x16xf32>,
    %c4 = arith.constant 4 : index
    %c0_80 = arith.constant 0 : index
    %335 = vector.load %arg20[%c4, %c0_80] : memref<16x32xf32, #tpu.memory_space<vmem>>, vector<2x16xf32>
    tpu.vector_store %arg20[%c4, %c0_80], %79 {strides = array<i32>} : memref<16x32xf32, #tpu.memory_space<vmem>>, vector<2x16xf32>,
    %c4_81 = arith.constant 4 : index
    %c16_82 = arith.constant 16 : index
    %336 = vector.load %arg20[%c4_81, %c16_82] : memref<16x32xf32, #tpu.memory_space<vmem>>, vector<2x16xf32>
    tpu.vector_store %arg20[%c4_81, %c16_82], %282 {strides = array<i32>} : memref<16x32xf32, #tpu.memory_space<vmem>>, vector<2x16xf32>,
    %c6 = arith.constant 6 : index
    %c0_83 = arith.constant 0 : index
    %337 = vector.load %arg20[%c6, %c0_83] : memref<16x32xf32, #tpu.memory_space<vmem>>, vector<2x16xf32>
    tpu.vector_store %arg20[%c6, %c0_83], %97 {strides = array<i32>} : memref<16x32xf32, #tpu.memory_space<vmem>>, vector<2x16xf32>,
    %c6_84 = arith.constant 6 : index
    %c16_85 = arith.constant 16 : index
    %338 = vector.load %arg20[%c6_84, %c16_85] : memref<16x32xf32, #tpu.memory_space<vmem>>, vector<2x16xf32>
    tpu.vector_store %arg20[%c6_84, %c16_85], %264 {strides = array<i32>} : memref<16x32xf32, #tpu.memory_space<vmem>>, vector<2x16xf32>,
    %c8 = arith.constant 8 : index
    %c0_86 = arith.constant 0 : index
    %339 = vector.load %arg20[%c8, %c0_86] : memref<16x32xf32, #tpu.memory_space<vmem>>, vector<2x16xf32>
    tpu.vector_store %arg20[%c8, %c0_86], %115 {strides = array<i32>} : memref<16x32xf32, #tpu.memory_space<vmem>>, vector<2x16xf32>,
    %c8_87 = arith.constant 8 : index
    %c16_88 = arith.constant 16 : index
    %340 = vector.load %arg20[%c8_87, %c16_88] : memref<16x32xf32, #tpu.memory_space<vmem>>, vector<2x16xf32>
    tpu.vector_store %arg20[%c8_87, %c16_88], %246 {strides = array<i32>} : memref<16x32xf32, #tpu.memory_space<vmem>>, vector<2x16xf32>,
    %c10 = arith.constant 10 : index
    %c0_89 = arith.constant 0 : index
    %341 = vector.load %arg20[%c10, %c0_89] : memref<16x32xf32, #tpu.memory_space<vmem>>, vector<2x16xf32>
    tpu.vector_store %arg20[%c10, %c0_89], %133 {strides = array<i32>} : memref<16x32xf32, #tpu.memory_space<vmem>>, vector<2x16xf32>,
    %c10_90 = arith.constant 10 : index
    %c16_91 = arith.constant 16 : index
    %342 = vector.load %arg20[%c10_90, %c16_91] : memref<16x32xf32, #tpu.memory_space<vmem>>, vector<2x16xf32>
    tpu.vector_store %arg20[%c10_90, %c16_91], %228 {strides = array<i32>} : memref<16x32xf32, #tpu.memory_space<vmem>>, vector<2x16xf32>,
    %c12 = arith.constant 12 : index
    %c0_92 = arith.constant 0 : index
    %343 = vector.load %arg20[%c12, %c0_92] : memref<16x32xf32, #tpu.memory_space<vmem>>, vector<2x16xf32>
    tpu.vector_store %arg20[%c12, %c0_92], %151 {strides = array<i32>} : memref<16x32xf32, #tpu.memory_space<vmem>>, vector<2x16xf32>,
    %c12_93 = arith.constant 12 : index
    %c16_94 = arith.constant 16 : index
    %344 = vector.load %arg20[%c12_93, %c16_94] : memref<16x32xf32, #tpu.memory_space<vmem>>, vector<2x16xf32>
    tpu.vector_store %arg20[%c12_93, %c16_94], %210 {strides = array<i32>} : memref<16x32xf32, #tpu.memory_space<vmem>>, vector<2x16xf32>,
    %c14 = arith.constant 14 : index
    %c0_95 = arith.constant 0 : index
    %345 = vector.load %arg20[%c14, %c0_95] : memref<16x32xf32, #tpu.memory_space<vmem>>, vector<2x16xf32>
    tpu.vector_store %arg20[%c14, %c0_95], %169 {strides = array<i32>} : memref<16x32xf32, #tpu.memory_space<vmem>>, vector<2x16xf32>,
    %c14_96 = arith.constant 14 : index
    %c16_97 = arith.constant 16 : index
    %346 = vector.load %arg20[%c14_96, %c16_97] : memref<16x32xf32, #tpu.memory_space<vmem>>, vector<2x16xf32>
    tpu.vector_store %arg20[%c14_96, %c16_97], %192 {strides = array<i32>} : memref<16x32xf32, #tpu.memory_space<vmem>>, vector<2x16xf32>,
    %c0_98 = arith.constant 0 : index
    %c0_99 = arith.constant 0 : index
    %347 = vector.load %arg20[%c0_98, %c0_99] : memref<16x32xf32, #tpu.memory_space<vmem>>, vector<16x32xf32>
    %c0_100 = arith.constant 0 : index
    %c0_101 = arith.constant 0 : index
    %348 = vector.load %arg11[%c0_100, %c0_101] : memref<32x64xf32, #tpu.memory_space<vmem>>, vector<32x64xf32>
    %cst_102 = arith.constant dense<0.000000e+00> : vector<16x64xf32>
    %349 = tpu.matmul %347, %348, %cst_102 {dimension_numbers = #tpu.dot_dimension_numbers<[1], [0], [0], [1], [0, 0, 1, 1], [], []>} : vector<16x32xf32>, vector<32x64xf32>, vector<16x64xf32> -> vector<16x64xf32>
    %c0_103 = arith.constant 0 : index
    %c0_104 = arith.constant 0 : index
    %350 = vector.load %arg13[%c0_103, %c0_104] : memref<1x64xf32, #tpu.memory_space<vmem>>, vector<1x64xf32>
    %351 = vector.broadcast %350 : vector<1x64xf32> to vector<16x64xf32>
    %352 = arith.addf %349, %351 : vector<16x64xf32>
    %c0_105 = arith.constant 0 : index
    %c0_106 = arith.constant 0 : index
    %353 = vector.load %arg14[%c0_105, %c0_106] : memref<32x64xf32, #tpu.memory_space<vmem>>, vector<32x64xf32>
    %cst_107 = arith.constant dense<0.000000e+00> : vector<16x64xf32>
    %354 = tpu.matmul %347, %353, %cst_107 {dimension_numbers = #tpu.dot_dimension_numbers<[1], [0], [0], [1], [0, 0, 1, 1], [], []>} : vector<16x32xf32>, vector<32x64xf32>, vector<16x64xf32> -> vector<16x64xf32>
    %c0_108 = arith.constant 0 : index
    %c0_109 = arith.constant 0 : index
    %355 = vector.load %arg16[%c0_108, %c0_109] : memref<1x64xf32, #tpu.memory_space<vmem>>, vector<1x64xf32>
    %356 = vector.broadcast %355 : vector<1x64xf32> to vector<16x64xf32>
    %357 = arith.addf %354, %356 : vector<16x64xf32>
    %c0_110 = arith.constant 0 : index
    %c0_111 = arith.constant 0 : index
    %358 = vector.load %arg12[%c0_110, %c0_111] : memref<16x64xf32, #tpu.memory_space<vmem>>, vector<16x64xf32>
    %c2_112 = arith.constant 2 : index
    %c0_113 = arith.constant 0 : index
    %c0_114 = arith.constant 0 : index
    %359 = vector.load %arg3[%c2_112, %c0_113, %c0_114] : memref<4x2x16xf32, #tpu.memory_space<vmem>>, vector<1x2x16xf32>
    %360 = vector.shape_cast %359 : vector<1x2x16xf32> to vector<2x16xf32>
    %c2_115 = arith.constant 2 : index
    %c0_116 = arith.constant 0 : index
    %c0_117 = arith.constant 0 : index
    %361 = vector.load %arg4[%c2_115, %c0_116, %c0_117] : memref<4x2x16xf32, #tpu.memory_space<vmem>>, vector<1x2x16xf32>
    %362 = vector.shape_cast %361 : vector<1x2x16xf32> to vector<2x16xf32>
    %363 = vector.extract_strided_slice %352 {offsets = [0, 0], sizes = [2, 64], strides = [1, 1]} : vector<16x64xf32> to vector<2x64xf32>
    %cst_118 = arith.constant dense<0.000000e+00> : vector<2x64xf32>
    %364 = tpu.matmul %360, %358, %cst_118 {dimension_numbers = #tpu.dot_dimension_numbers<[1], [0], [0], [1], [0, 0, 1, 1], [], []>} : vector<2x16xf32>, vector<16x64xf32>, vector<2x64xf32> -> vector<2x64xf32>
    %365 = arith.addf %363, %364 : vector<2x64xf32>
    %366 = arith.negf %365 : vector<2x64xf32>
    %367 = math.exp %366 : vector<2x64xf32>
    %cst_119 = arith.constant 1.000000e+00 : f32
    %368 = vector.broadcast %cst_119 : f32 to vector<2x64xf32>
    %369 = arith.addf %368, %367 : vector<2x64xf32>
    %370 = arith.divf %368, %369 : vector<2x64xf32>
    %371 = math.tanh %365 : vector<2x64xf32>
    %372 = vector.extract_strided_slice %370 {offsets = [0, 0], sizes = [2, 16], strides = [1, 1]} : vector<2x64xf32> to vector<2x16xf32>
    %373 = vector.extract_strided_slice %370 {offsets = [0, 16], sizes = [2, 16], strides = [1, 1]} : vector<2x64xf32> to vector<2x16xf32>
    %374 = vector.extract_strided_slice %371 {offsets = [0, 32], sizes = [2, 16], strides = [1, 1]} : vector<2x64xf32> to vector<2x16xf32>
    %375 = vector.extract_strided_slice %370 {offsets = [0, 48], sizes = [2, 16], strides = [1, 1]} : vector<2x64xf32> to vector<2x16xf32>
    %376 = arith.mulf %373, %362 : vector<2x16xf32>
    %377 = arith.mulf %372, %374 : vector<2x16xf32>
    %378 = arith.addf %376, %377 : vector<2x16xf32>
    %379 = math.tanh %378 : vector<2x16xf32>
    %380 = arith.mulf %375, %379 : vector<2x16xf32>
    %381 = vector.extract_strided_slice %352 {offsets = [2, 0], sizes = [2, 64], strides = [1, 1]} : vector<16x64xf32> to vector<2x64xf32>
    %cst_120 = arith.constant dense<0.000000e+00> : vector<2x64xf32>
    %382 = tpu.matmul %380, %358, %cst_120 {dimension_numbers = #tpu.dot_dimension_numbers<[1], [0], [0], [1], [0, 0, 1, 1], [], []>} : vector<2x16xf32>, vector<16x64xf32>, vector<2x64xf32> -> vector<2x64xf32>
    %383 = arith.addf %381, %382 : vector<2x64xf32>
    %384 = arith.negf %383 : vector<2x64xf32>
    %385 = math.exp %384 : vector<2x64xf32>
    %cst_121 = arith.constant 1.000000e+00 : f32
    %386 = vector.broadcast %cst_121 : f32 to vector<2x64xf32>
    %387 = arith.addf %386, %385 : vector<2x64xf32>
    %388 = arith.divf %386, %387 : vector<2x64xf32>
    %389 = math.tanh %383 : vector<2x64xf32>
    %390 = vector.extract_strided_slice %388 {offsets = [0, 0], sizes = [2, 16], strides = [1, 1]} : vector<2x64xf32> to vector<2x16xf32>
    %391 = vector.extract_strided_slice %388 {offsets = [0, 16], sizes = [2, 16], strides = [1, 1]} : vector<2x64xf32> to vector<2x16xf32>
    %392 = vector.extract_strided_slice %389 {offsets = [0, 32], sizes = [2, 16], strides = [1, 1]} : vector<2x64xf32> to vector<2x16xf32>
    %393 = vector.extract_strided_slice %388 {offsets = [0, 48], sizes = [2, 16], strides = [1, 1]} : vector<2x64xf32> to vector<2x16xf32>
    %394 = arith.mulf %391, %378 : vector<2x16xf32>
    %395 = arith.mulf %390, %392 : vector<2x16xf32>
    %396 = arith.addf %394, %395 : vector<2x16xf32>
    %397 = math.tanh %396 : vector<2x16xf32>
    %398 = arith.mulf %393, %397 : vector<2x16xf32>
    %399 = vector.extract_strided_slice %352 {offsets = [4, 0], sizes = [2, 64], strides = [1, 1]} : vector<16x64xf32> to vector<2x64xf32>
    %cst_122 = arith.constant dense<0.000000e+00> : vector<2x64xf32>
    %400 = tpu.matmul %398, %358, %cst_122 {dimension_numbers = #tpu.dot_dimension_numbers<[1], [0], [0], [1], [0, 0, 1, 1], [], []>} : vector<2x16xf32>, vector<16x64xf32>, vector<2x64xf32> -> vector<2x64xf32>
    %401 = arith.addf %399, %400 : vector<2x64xf32>
    %402 = arith.negf %401 : vector<2x64xf32>
    %403 = math.exp %402 : vector<2x64xf32>
    %cst_123 = arith.constant 1.000000e+00 : f32
    %404 = vector.broadcast %cst_123 : f32 to vector<2x64xf32>
    %405 = arith.addf %404, %403 : vector<2x64xf32>
    %406 = arith.divf %404, %405 : vector<2x64xf32>
    %407 = math.tanh %401 : vector<2x64xf32>
    %408 = vector.extract_strided_slice %406 {offsets = [0, 0], sizes = [2, 16], strides = [1, 1]} : vector<2x64xf32> to vector<2x16xf32>
    %409 = vector.extract_strided_slice %406 {offsets = [0, 16], sizes = [2, 16], strides = [1, 1]} : vector<2x64xf32> to vector<2x16xf32>
    %410 = vector.extract_strided_slice %407 {offsets = [0, 32], sizes = [2, 16], strides = [1, 1]} : vector<2x64xf32> to vector<2x16xf32>
    %411 = vector.extract_strided_slice %406 {offsets = [0, 48], sizes = [2, 16], strides = [1, 1]} : vector<2x64xf32> to vector<2x16xf32>
    %412 = arith.mulf %409, %396 : vector<2x16xf32>
    %413 = arith.mulf %408, %410 : vector<2x16xf32>
    %414 = arith.addf %412, %413 : vector<2x16xf32>
    %415 = math.tanh %414 : vector<2x16xf32>
    %416 = arith.mulf %411, %415 : vector<2x16xf32>
    %417 = vector.extract_strided_slice %352 {offsets = [6, 0], sizes = [2, 64], strides = [1, 1]} : vector<16x64xf32> to vector<2x64xf32>
    %cst_124 = arith.constant dense<0.000000e+00> : vector<2x64xf32>
    %418 = tpu.matmul %416, %358, %cst_124 {dimension_numbers = #tpu.dot_dimension_numbers<[1], [0], [0], [1], [0, 0, 1, 1], [], []>} : vector<2x16xf32>, vector<16x64xf32>, vector<2x64xf32> -> vector<2x64xf32>
    %419 = arith.addf %417, %418 : vector<2x64xf32>
    %420 = arith.negf %419 : vector<2x64xf32>
    %421 = math.exp %420 : vector<2x64xf32>
    %cst_125 = arith.constant 1.000000e+00 : f32
    %422 = vector.broadcast %cst_125 : f32 to vector<2x64xf32>
    %423 = arith.addf %422, %421 : vector<2x64xf32>
    %424 = arith.divf %422, %423 : vector<2x64xf32>
    %425 = math.tanh %419 : vector<2x64xf32>
    %426 = vector.extract_strided_slice %424 {offsets = [0, 0], sizes = [2, 16], strides = [1, 1]} : vector<2x64xf32> to vector<2x16xf32>
    %427 = vector.extract_strided_slice %424 {offsets = [0, 16], sizes = [2, 16], strides = [1, 1]} : vector<2x64xf32> to vector<2x16xf32>
    %428 = vector.extract_strided_slice %425 {offsets = [0, 32], sizes = [2, 16], strides = [1, 1]} : vector<2x64xf32> to vector<2x16xf32>
    %429 = vector.extract_strided_slice %424 {offsets = [0, 48], sizes = [2, 16], strides = [1, 1]} : vector<2x64xf32> to vector<2x16xf32>
    %430 = arith.mulf %427, %414 : vector<2x16xf32>
    %431 = arith.mulf %426, %428 : vector<2x16xf32>
    %432 = arith.addf %430, %431 : vector<2x16xf32>
    %433 = math.tanh %432 : vector<2x16xf32>
    %434 = arith.mulf %429, %433 : vector<2x16xf32>
    %435 = vector.extract_strided_slice %352 {offsets = [8, 0], sizes = [2, 64], strides = [1, 1]} : vector<16x64xf32> to vector<2x64xf32>
    %cst_126 = arith.constant dense<0.000000e+00> : vector<2x64xf32>
    %436 = tpu.matmul %434, %358, %cst_126 {dimension_numbers = #tpu.dot_dimension_numbers<[1], [0], [0], [1], [0, 0, 1, 1], [], []>} : vector<2x16xf32>, vector<16x64xf32>, vector<2x64xf32> -> vector<2x64xf32>
    %437 = arith.addf %435, %436 : vector<2x64xf32>
    %438 = arith.negf %437 : vector<2x64xf32>
    %439 = math.exp %438 : vector<2x64xf32>
    %cst_127 = arith.constant 1.000000e+00 : f32
    %440 = vector.broadcast %cst_127 : f32 to vector<2x64xf32>
    %441 = arith.addf %440, %439 : vector<2x64xf32>
    %442 = arith.divf %440, %441 : vector<2x64xf32>
    %443 = math.tanh %437 : vector<2x64xf32>
    %444 = vector.extract_strided_slice %442 {offsets = [0, 0], sizes = [2, 16], strides = [1, 1]} : vector<2x64xf32> to vector<2x16xf32>
    %445 = vector.extract_strided_slice %442 {offsets = [0, 16], sizes = [2, 16], strides = [1, 1]} : vector<2x64xf32> to vector<2x16xf32>
    %446 = vector.extract_strided_slice %443 {offsets = [0, 32], sizes = [2, 16], strides = [1, 1]} : vector<2x64xf32> to vector<2x16xf32>
    %447 = vector.extract_strided_slice %442 {offsets = [0, 48], sizes = [2, 16], strides = [1, 1]} : vector<2x64xf32> to vector<2x16xf32>
    %448 = arith.mulf %445, %432 : vector<2x16xf32>
    %449 = arith.mulf %444, %446 : vector<2x16xf32>
    %450 = arith.addf %448, %449 : vector<2x16xf32>
    %451 = math.tanh %450 : vector<2x16xf32>
    %452 = arith.mulf %447, %451 : vector<2x16xf32>
    %453 = vector.extract_strided_slice %352 {offsets = [10, 0], sizes = [2, 64], strides = [1, 1]} : vector<16x64xf32> to vector<2x64xf32>
    %cst_128 = arith.constant dense<0.000000e+00> : vector<2x64xf32>
    %454 = tpu.matmul %452, %358, %cst_128 {dimension_numbers = #tpu.dot_dimension_numbers<[1], [0], [0], [1], [0, 0, 1, 1], [], []>} : vector<2x16xf32>, vector<16x64xf32>, vector<2x64xf32> -> vector<2x64xf32>
    %455 = arith.addf %453, %454 : vector<2x64xf32>
    %456 = arith.negf %455 : vector<2x64xf32>
    %457 = math.exp %456 : vector<2x64xf32>
    %cst_129 = arith.constant 1.000000e+00 : f32
    %458 = vector.broadcast %cst_129 : f32 to vector<2x64xf32>
    %459 = arith.addf %458, %457 : vector<2x64xf32>
    %460 = arith.divf %458, %459 : vector<2x64xf32>
    %461 = math.tanh %455 : vector<2x64xf32>
    %462 = vector.extract_strided_slice %460 {offsets = [0, 0], sizes = [2, 16], strides = [1, 1]} : vector<2x64xf32> to vector<2x16xf32>
    %463 = vector.extract_strided_slice %460 {offsets = [0, 16], sizes = [2, 16], strides = [1, 1]} : vector<2x64xf32> to vector<2x16xf32>
    %464 = vector.extract_strided_slice %461 {offsets = [0, 32], sizes = [2, 16], strides = [1, 1]} : vector<2x64xf32> to vector<2x16xf32>
    %465 = vector.extract_strided_slice %460 {offsets = [0, 48], sizes = [2, 16], strides = [1, 1]} : vector<2x64xf32> to vector<2x16xf32>
    %466 = arith.mulf %463, %450 : vector<2x16xf32>
    %467 = arith.mulf %462, %464 : vector<2x16xf32>
    %468 = arith.addf %466, %467 : vector<2x16xf32>
    %469 = math.tanh %468 : vector<2x16xf32>
    %470 = arith.mulf %465, %469 : vector<2x16xf32>
    %471 = vector.extract_strided_slice %352 {offsets = [12, 0], sizes = [2, 64], strides = [1, 1]} : vector<16x64xf32> to vector<2x64xf32>
    %cst_130 = arith.constant dense<0.000000e+00> : vector<2x64xf32>
    %472 = tpu.matmul %470, %358, %cst_130 {dimension_numbers = #tpu.dot_dimension_numbers<[1], [0], [0], [1], [0, 0, 1, 1], [], []>} : vector<2x16xf32>, vector<16x64xf32>, vector<2x64xf32> -> vector<2x64xf32>
    %473 = arith.addf %471, %472 : vector<2x64xf32>
    %474 = arith.negf %473 : vector<2x64xf32>
    %475 = math.exp %474 : vector<2x64xf32>
    %cst_131 = arith.constant 1.000000e+00 : f32
    %476 = vector.broadcast %cst_131 : f32 to vector<2x64xf32>
    %477 = arith.addf %476, %475 : vector<2x64xf32>
    %478 = arith.divf %476, %477 : vector<2x64xf32>
    %479 = math.tanh %473 : vector<2x64xf32>
    %480 = vector.extract_strided_slice %478 {offsets = [0, 0], sizes = [2, 16], strides = [1, 1]} : vector<2x64xf32> to vector<2x16xf32>
    %481 = vector.extract_strided_slice %478 {offsets = [0, 16], sizes = [2, 16], strides = [1, 1]} : vector<2x64xf32> to vector<2x16xf32>
    %482 = vector.extract_strided_slice %479 {offsets = [0, 32], sizes = [2, 16], strides = [1, 1]} : vector<2x64xf32> to vector<2x16xf32>
    %483 = vector.extract_strided_slice %478 {offsets = [0, 48], sizes = [2, 16], strides = [1, 1]} : vector<2x64xf32> to vector<2x16xf32>
    %484 = arith.mulf %481, %468 : vector<2x16xf32>
    %485 = arith.mulf %480, %482 : vector<2x16xf32>
    %486 = arith.addf %484, %485 : vector<2x16xf32>
    %487 = math.tanh %486 : vector<2x16xf32>
    %488 = arith.mulf %483, %487 : vector<2x16xf32>
    %489 = vector.extract_strided_slice %352 {offsets = [14, 0], sizes = [2, 64], strides = [1, 1]} : vector<16x64xf32> to vector<2x64xf32>
    %cst_132 = arith.constant dense<0.000000e+00> : vector<2x64xf32>
    %490 = tpu.matmul %488, %358, %cst_132 {dimension_numbers = #tpu.dot_dimension_numbers<[1], [0], [0], [1], [0, 0, 1, 1], [], []>} : vector<2x16xf32>, vector<16x64xf32>, vector<2x64xf32> -> vector<2x64xf32>
    %491 = arith.addf %489, %490 : vector<2x64xf32>
    %492 = arith.negf %491 : vector<2x64xf32>
    %493 = math.exp %492 : vector<2x64xf32>
    %cst_133 = arith.constant 1.000000e+00 : f32
    %494 = vector.broadcast %cst_133 : f32 to vector<2x64xf32>
    %495 = arith.addf %494, %493 : vector<2x64xf32>
    %496 = arith.divf %494, %495 : vector<2x64xf32>
    %497 = math.tanh %491 : vector<2x64xf32>
    %498 = vector.extract_strided_slice %496 {offsets = [0, 0], sizes = [2, 16], strides = [1, 1]} : vector<2x64xf32> to vector<2x16xf32>
    %499 = vector.extract_strided_slice %496 {offsets = [0, 16], sizes = [2, 16], strides = [1, 1]} : vector<2x64xf32> to vector<2x16xf32>
    %500 = vector.extract_strided_slice %497 {offsets = [0, 32], sizes = [2, 16], strides = [1, 1]} : vector<2x64xf32> to vector<2x16xf32>
    %501 = vector.extract_strided_slice %496 {offsets = [0, 48], sizes = [2, 16], strides = [1, 1]} : vector<2x64xf32> to vector<2x16xf32>
    %502 = arith.mulf %499, %486 : vector<2x16xf32>
    %503 = arith.mulf %498, %500 : vector<2x16xf32>
    %504 = arith.addf %502, %503 : vector<2x16xf32>
    %505 = math.tanh %504 : vector<2x16xf32>
    %506 = arith.mulf %501, %505 : vector<2x16xf32>
    %c0_134 = arith.constant 0 : index
    %c0_135 = arith.constant 0 : index
    %507 = vector.load %arg15[%c0_134, %c0_135] : memref<16x64xf32, #tpu.memory_space<vmem>>, vector<16x64xf32>
    %c3 = arith.constant 3 : index
    %c0_136 = arith.constant 0 : index
    %c0_137 = arith.constant 0 : index
    %508 = vector.load %arg3[%c3, %c0_136, %c0_137] : memref<4x2x16xf32, #tpu.memory_space<vmem>>, vector<1x2x16xf32>
    %509 = vector.shape_cast %508 : vector<1x2x16xf32> to vector<2x16xf32>
    %c3_138 = arith.constant 3 : index
    %c0_139 = arith.constant 0 : index
    %c0_140 = arith.constant 0 : index
    %510 = vector.load %arg4[%c3_138, %c0_139, %c0_140] : memref<4x2x16xf32, #tpu.memory_space<vmem>>, vector<1x2x16xf32>
    %511 = vector.shape_cast %510 : vector<1x2x16xf32> to vector<2x16xf32>
    %512 = vector.extract_strided_slice %357 {offsets = [14, 0], sizes = [2, 64], strides = [1, 1]} : vector<16x64xf32> to vector<2x64xf32>
    %cst_141 = arith.constant dense<0.000000e+00> : vector<2x64xf32>
    %513 = tpu.matmul %509, %507, %cst_141 {dimension_numbers = #tpu.dot_dimension_numbers<[1], [0], [0], [1], [0, 0, 1, 1], [], []>} : vector<2x16xf32>, vector<16x64xf32>, vector<2x64xf32> -> vector<2x64xf32>
    %514 = arith.addf %512, %513 : vector<2x64xf32>
    %515 = arith.negf %514 : vector<2x64xf32>
    %516 = math.exp %515 : vector<2x64xf32>
    %cst_142 = arith.constant 1.000000e+00 : f32
    %517 = vector.broadcast %cst_142 : f32 to vector<2x64xf32>
    %518 = arith.addf %517, %516 : vector<2x64xf32>
    %519 = arith.divf %517, %518 : vector<2x64xf32>
    %520 = math.tanh %514 : vector<2x64xf32>
    %521 = vector.extract_strided_slice %519 {offsets = [0, 0], sizes = [2, 16], strides = [1, 1]} : vector<2x64xf32> to vector<2x16xf32>
    %522 = vector.extract_strided_slice %519 {offsets = [0, 16], sizes = [2, 16], strides = [1, 1]} : vector<2x64xf32> to vector<2x16xf32>
    %523 = vector.extract_strided_slice %520 {offsets = [0, 32], sizes = [2, 16], strides = [1, 1]} : vector<2x64xf32> to vector<2x16xf32>
    %524 = vector.extract_strided_slice %519 {offsets = [0, 48], sizes = [2, 16], strides = [1, 1]} : vector<2x64xf32> to vector<2x16xf32>
    %525 = arith.mulf %522, %511 : vector<2x16xf32>
    %526 = arith.mulf %521, %523 : vector<2x16xf32>
    %527 = arith.addf %525, %526 : vector<2x16xf32>
    %528 = math.tanh %527 : vector<2x16xf32>
    %529 = arith.mulf %524, %528 : vector<2x16xf32>
    %530 = vector.extract_strided_slice %357 {offsets = [12, 0], sizes = [2, 64], strides = [1, 1]} : vector<16x64xf32> to vector<2x64xf32>
    %cst_143 = arith.constant dense<0.000000e+00> : vector<2x64xf32>
    %531 = tpu.matmul %529, %507, %cst_143 {dimension_numbers = #tpu.dot_dimension_numbers<[1], [0], [0], [1], [0, 0, 1, 1], [], []>} : vector<2x16xf32>, vector<16x64xf32>, vector<2x64xf32> -> vector<2x64xf32>
    %532 = arith.addf %530, %531 : vector<2x64xf32>
    %533 = arith.negf %532 : vector<2x64xf32>
    %534 = math.exp %533 : vector<2x64xf32>
    %cst_144 = arith.constant 1.000000e+00 : f32
    %535 = vector.broadcast %cst_144 : f32 to vector<2x64xf32>
    %536 = arith.addf %535, %534 : vector<2x64xf32>
    %537 = arith.divf %535, %536 : vector<2x64xf32>
    %538 = math.tanh %532 : vector<2x64xf32>
    %539 = vector.extract_strided_slice %537 {offsets = [0, 0], sizes = [2, 16], strides = [1, 1]} : vector<2x64xf32> to vector<2x16xf32>
    %540 = vector.extract_strided_slice %537 {offsets = [0, 16], sizes = [2, 16], strides = [1, 1]} : vector<2x64xf32> to vector<2x16xf32>
    %541 = vector.extract_strided_slice %538 {offsets = [0, 32], sizes = [2, 16], strides = [1, 1]} : vector<2x64xf32> to vector<2x16xf32>
    %542 = vector.extract_strided_slice %537 {offsets = [0, 48], sizes = [2, 16], strides = [1, 1]} : vector<2x64xf32> to vector<2x16xf32>
    %543 = arith.mulf %540, %527 : vector<2x16xf32>
    %544 = arith.mulf %539, %541 : vector<2x16xf32>
    %545 = arith.addf %543, %544 : vector<2x16xf32>
    %546 = math.tanh %545 : vector<2x16xf32>
    %547 = arith.mulf %542, %546 : vector<2x16xf32>
    %548 = vector.extract_strided_slice %357 {offsets = [10, 0], sizes = [2, 64], strides = [1, 1]} : vector<16x64xf32> to vector<2x64xf32>
    %cst_145 = arith.constant dense<0.000000e+00> : vector<2x64xf32>
    %549 = tpu.matmul %547, %507, %cst_145 {dimension_numbers = #tpu.dot_dimension_numbers<[1], [0], [0], [1], [0, 0, 1, 1], [], []>} : vector<2x16xf32>, vector<16x64xf32>, vector<2x64xf32> -> vector<2x64xf32>
    %550 = arith.addf %548, %549 : vector<2x64xf32>
    %551 = arith.negf %550 : vector<2x64xf32>
    %552 = math.exp %551 : vector<2x64xf32>
    %cst_146 = arith.constant 1.000000e+00 : f32
    %553 = vector.broadcast %cst_146 : f32 to vector<2x64xf32>
    %554 = arith.addf %553, %552 : vector<2x64xf32>
    %555 = arith.divf %553, %554 : vector<2x64xf32>
    %556 = math.tanh %550 : vector<2x64xf32>
    %557 = vector.extract_strided_slice %555 {offsets = [0, 0], sizes = [2, 16], strides = [1, 1]} : vector<2x64xf32> to vector<2x16xf32>
    %558 = vector.extract_strided_slice %555 {offsets = [0, 16], sizes = [2, 16], strides = [1, 1]} : vector<2x64xf32> to vector<2x16xf32>
    %559 = vector.extract_strided_slice %556 {offsets = [0, 32], sizes = [2, 16], strides = [1, 1]} : vector<2x64xf32> to vector<2x16xf32>
    %560 = vector.extract_strided_slice %555 {offsets = [0, 48], sizes = [2, 16], strides = [1, 1]} : vector<2x64xf32> to vector<2x16xf32>
    %561 = arith.mulf %558, %545 : vector<2x16xf32>
    %562 = arith.mulf %557, %559 : vector<2x16xf32>
    %563 = arith.addf %561, %562 : vector<2x16xf32>
    %564 = math.tanh %563 : vector<2x16xf32>
    %565 = arith.mulf %560, %564 : vector<2x16xf32>
    %566 = vector.extract_strided_slice %357 {offsets = [8, 0], sizes = [2, 64], strides = [1, 1]} : vector<16x64xf32> to vector<2x64xf32>
    %cst_147 = arith.constant dense<0.000000e+00> : vector<2x64xf32>
    %567 = tpu.matmul %565, %507, %cst_147 {dimension_numbers = #tpu.dot_dimension_numbers<[1], [0], [0], [1], [0, 0, 1, 1], [], []>} : vector<2x16xf32>, vector<16x64xf32>, vector<2x64xf32> -> vector<2x64xf32>
    %568 = arith.addf %566, %567 : vector<2x64xf32>
    %569 = arith.negf %568 : vector<2x64xf32>
    %570 = math.exp %569 : vector<2x64xf32>
    %cst_148 = arith.constant 1.000000e+00 : f32
    %571 = vector.broadcast %cst_148 : f32 to vector<2x64xf32>
    %572 = arith.addf %571, %570 : vector<2x64xf32>
    %573 = arith.divf %571, %572 : vector<2x64xf32>
    %574 = math.tanh %568 : vector<2x64xf32>
    %575 = vector.extract_strided_slice %573 {offsets = [0, 0], sizes = [2, 16], strides = [1, 1]} : vector<2x64xf32> to vector<2x16xf32>
    %576 = vector.extract_strided_slice %573 {offsets = [0, 16], sizes = [2, 16], strides = [1, 1]} : vector<2x64xf32> to vector<2x16xf32>
    %577 = vector.extract_strided_slice %574 {offsets = [0, 32], sizes = [2, 16], strides = [1, 1]} : vector<2x64xf32> to vector<2x16xf32>
    %578 = vector.extract_strided_slice %573 {offsets = [0, 48], sizes = [2, 16], strides = [1, 1]} : vector<2x64xf32> to vector<2x16xf32>
    %579 = arith.mulf %576, %563 : vector<2x16xf32>
    %580 = arith.mulf %575, %577 : vector<2x16xf32>
    %581 = arith.addf %579, %580 : vector<2x16xf32>
    %582 = math.tanh %581 : vector<2x16xf32>
    %583 = arith.mulf %578, %582 : vector<2x16xf32>
    %584 = vector.extract_strided_slice %357 {offsets = [6, 0], sizes = [2, 64], strides = [1, 1]} : vector<16x64xf32> to vector<2x64xf32>
    %cst_149 = arith.constant dense<0.000000e+00> : vector<2x64xf32>
    %585 = tpu.matmul %583, %507, %cst_149 {dimension_numbers = #tpu.dot_dimension_numbers<[1], [0], [0], [1], [0, 0, 1, 1], [], []>} : vector<2x16xf32>, vector<16x64xf32>, vector<2x64xf32> -> vector<2x64xf32>
    %586 = arith.addf %584, %585 : vector<2x64xf32>
    %587 = arith.negf %586 : vector<2x64xf32>
    %588 = math.exp %587 : vector<2x64xf32>
    %cst_150 = arith.constant 1.000000e+00 : f32
    %589 = vector.broadcast %cst_150 : f32 to vector<2x64xf32>
    %590 = arith.addf %589, %588 : vector<2x64xf32>
    %591 = arith.divf %589, %590 : vector<2x64xf32>
    %592 = math.tanh %586 : vector<2x64xf32>
    %593 = vector.extract_strided_slice %591 {offsets = [0, 0], sizes = [2, 16], strides = [1, 1]} : vector<2x64xf32> to vector<2x16xf32>
    %594 = vector.extract_strided_slice %591 {offsets = [0, 16], sizes = [2, 16], strides = [1, 1]} : vector<2x64xf32> to vector<2x16xf32>
    %595 = vector.extract_strided_slice %592 {offsets = [0, 32], sizes = [2, 16], strides = [1, 1]} : vector<2x64xf32> to vector<2x16xf32>
    %596 = vector.extract_strided_slice %591 {offsets = [0, 48], sizes = [2, 16], strides = [1, 1]} : vector<2x64xf32> to vector<2x16xf32>
    %597 = arith.mulf %594, %581 : vector<2x16xf32>
    %598 = arith.mulf %593, %595 : vector<2x16xf32>
    %599 = arith.addf %597, %598 : vector<2x16xf32>
    %600 = math.tanh %599 : vector<2x16xf32>
    %601 = arith.mulf %596, %600 : vector<2x16xf32>
    %602 = vector.extract_strided_slice %357 {offsets = [4, 0], sizes = [2, 64], strides = [1, 1]} : vector<16x64xf32> to vector<2x64xf32>
    %cst_151 = arith.constant dense<0.000000e+00> : vector<2x64xf32>
    %603 = tpu.matmul %601, %507, %cst_151 {dimension_numbers = #tpu.dot_dimension_numbers<[1], [0], [0], [1], [0, 0, 1, 1], [], []>} : vector<2x16xf32>, vector<16x64xf32>, vector<2x64xf32> -> vector<2x64xf32>
    %604 = arith.addf %602, %603 : vector<2x64xf32>
    %605 = arith.negf %604 : vector<2x64xf32>
    %606 = math.exp %605 : vector<2x64xf32>
    %cst_152 = arith.constant 1.000000e+00 : f32
    %607 = vector.broadcast %cst_152 : f32 to vector<2x64xf32>
    %608 = arith.addf %607, %606 : vector<2x64xf32>
    %609 = arith.divf %607, %608 : vector<2x64xf32>
    %610 = math.tanh %604 : vector<2x64xf32>
    %611 = vector.extract_strided_slice %609 {offsets = [0, 0], sizes = [2, 16], strides = [1, 1]} : vector<2x64xf32> to vector<2x16xf32>
    %612 = vector.extract_strided_slice %609 {offsets = [0, 16], sizes = [2, 16], strides = [1, 1]} : vector<2x64xf32> to vector<2x16xf32>
    %613 = vector.extract_strided_slice %610 {offsets = [0, 32], sizes = [2, 16], strides = [1, 1]} : vector<2x64xf32> to vector<2x16xf32>
    %614 = vector.extract_strided_slice %609 {offsets = [0, 48], sizes = [2, 16], strides = [1, 1]} : vector<2x64xf32> to vector<2x16xf32>
    %615 = arith.mulf %612, %599 : vector<2x16xf32>
    %616 = arith.mulf %611, %613 : vector<2x16xf32>
    %617 = arith.addf %615, %616 : vector<2x16xf32>
    %618 = math.tanh %617 : vector<2x16xf32>
    %619 = arith.mulf %614, %618 : vector<2x16xf32>
    %620 = vector.extract_strided_slice %357 {offsets = [2, 0], sizes = [2, 64], strides = [1, 1]} : vector<16x64xf32> to vector<2x64xf32>
    %cst_153 = arith.constant dense<0.000000e+00> : vector<2x64xf32>
    %621 = tpu.matmul %619, %507, %cst_153 {dimension_numbers = #tpu.dot_dimension_numbers<[1], [0], [0], [1], [0, 0, 1, 1], [], []>} : vector<2x16xf32>, vector<16x64xf32>, vector<2x64xf32> -> vector<2x64xf32>
    %622 = arith.addf %620, %621 : vector<2x64xf32>
    %623 = arith.negf %622 : vector<2x64xf32>
    %624 = math.exp %623 : vector<2x64xf32>
    %cst_154 = arith.constant 1.000000e+00 : f32
    %625 = vector.broadcast %cst_154 : f32 to vector<2x64xf32>
    %626 = arith.addf %625, %624 : vector<2x64xf32>
    %627 = arith.divf %625, %626 : vector<2x64xf32>
    %628 = math.tanh %622 : vector<2x64xf32>
    %629 = vector.extract_strided_slice %627 {offsets = [0, 0], sizes = [2, 16], strides = [1, 1]} : vector<2x64xf32> to vector<2x16xf32>
    %630 = vector.extract_strided_slice %627 {offsets = [0, 16], sizes = [2, 16], strides = [1, 1]} : vector<2x64xf32> to vector<2x16xf32>
    %631 = vector.extract_strided_slice %628 {offsets = [0, 32], sizes = [2, 16], strides = [1, 1]} : vector<2x64xf32> to vector<2x16xf32>
    %632 = vector.extract_strided_slice %627 {offsets = [0, 48], sizes = [2, 16], strides = [1, 1]} : vector<2x64xf32> to vector<2x16xf32>
    %633 = arith.mulf %630, %617 : vector<2x16xf32>
    %634 = arith.mulf %629, %631 : vector<2x16xf32>
    %635 = arith.addf %633, %634 : vector<2x16xf32>
    %636 = math.tanh %635 : vector<2x16xf32>
    %637 = arith.mulf %632, %636 : vector<2x16xf32>
    %638 = vector.extract_strided_slice %357 {offsets = [0, 0], sizes = [2, 64], strides = [1, 1]} : vector<16x64xf32> to vector<2x64xf32>
    %cst_155 = arith.constant dense<0.000000e+00> : vector<2x64xf32>
    %639 = tpu.matmul %637, %507, %cst_155 {dimension_numbers = #tpu.dot_dimension_numbers<[1], [0], [0], [1], [0, 0, 1, 1], [], []>} : vector<2x16xf32>, vector<16x64xf32>, vector<2x64xf32> -> vector<2x64xf32>
    %640 = arith.addf %638, %639 : vector<2x64xf32>
    %641 = arith.negf %640 : vector<2x64xf32>
    %642 = math.exp %641 : vector<2x64xf32>
    %cst_156 = arith.constant 1.000000e+00 : f32
    %643 = vector.broadcast %cst_156 : f32 to vector<2x64xf32>
    %644 = arith.addf %643, %642 : vector<2x64xf32>
    %645 = arith.divf %643, %644 : vector<2x64xf32>
    %646 = math.tanh %640 : vector<2x64xf32>
    %647 = vector.extract_strided_slice %645 {offsets = [0, 0], sizes = [2, 16], strides = [1, 1]} : vector<2x64xf32> to vector<2x16xf32>
    %648 = vector.extract_strided_slice %645 {offsets = [0, 16], sizes = [2, 16], strides = [1, 1]} : vector<2x64xf32> to vector<2x16xf32>
    %649 = vector.extract_strided_slice %646 {offsets = [0, 32], sizes = [2, 16], strides = [1, 1]} : vector<2x64xf32> to vector<2x16xf32>
    %650 = vector.extract_strided_slice %645 {offsets = [0, 48], sizes = [2, 16], strides = [1, 1]} : vector<2x64xf32> to vector<2x16xf32>
    %651 = arith.mulf %648, %635 : vector<2x16xf32>
    %652 = arith.mulf %647, %649 : vector<2x16xf32>
    %653 = arith.addf %651, %652 : vector<2x16xf32>
    %654 = math.tanh %653 : vector<2x16xf32>
    %655 = arith.mulf %650, %654 : vector<2x16xf32>
    %c2_157 = arith.constant 2 : index
    %c0_158 = arith.constant 0 : index
    %c0_159 = arith.constant 0 : index
    %656 = vector.load %arg18[%c2_157, %c0_158, %c0_159] : memref<4x2x16xf32, #tpu.memory_space<vmem>>, vector<1x2x16xf32>
    %657 = vector.shape_cast %656 : vector<1x2x16xf32> to vector<2x16xf32>
    %658 = vector.shape_cast %506 : vector<2x16xf32> to vector<1x2x16xf32>
    tpu.vector_store %arg18[%c2_157, %c0_158, %c0_159], %658 {strides = array<i32>} : memref<4x2x16xf32, #tpu.memory_space<vmem>>, vector<1x2x16xf32>,
    %c2_160 = arith.constant 2 : index
    %c0_161 = arith.constant 0 : index
    %c0_162 = arith.constant 0 : index
    %659 = vector.load %arg19[%c2_160, %c0_161, %c0_162] : memref<4x2x16xf32, #tpu.memory_space<vmem>>, vector<1x2x16xf32>
    %660 = vector.shape_cast %659 : vector<1x2x16xf32> to vector<2x16xf32>
    %661 = vector.shape_cast %504 : vector<2x16xf32> to vector<1x2x16xf32>
    tpu.vector_store %arg19[%c2_160, %c0_161, %c0_162], %661 {strides = array<i32>} : memref<4x2x16xf32, #tpu.memory_space<vmem>>, vector<1x2x16xf32>,
    %c3_163 = arith.constant 3 : index
    %c0_164 = arith.constant 0 : index
    %c0_165 = arith.constant 0 : index
    %662 = vector.load %arg18[%c3_163, %c0_164, %c0_165] : memref<4x2x16xf32, #tpu.memory_space<vmem>>, vector<1x2x16xf32>
    %663 = vector.shape_cast %662 : vector<1x2x16xf32> to vector<2x16xf32>
    %664 = vector.shape_cast %655 : vector<2x16xf32> to vector<1x2x16xf32>
    tpu.vector_store %arg18[%c3_163, %c0_164, %c0_165], %664 {strides = array<i32>} : memref<4x2x16xf32, #tpu.memory_space<vmem>>, vector<1x2x16xf32>,
    %c3_166 = arith.constant 3 : index
    %c0_167 = arith.constant 0 : index
    %c0_168 = arith.constant 0 : index
    %665 = vector.load %arg19[%c3_166, %c0_167, %c0_168] : memref<4x2x16xf32, #tpu.memory_space<vmem>>, vector<1x2x16xf32>
    %666 = vector.shape_cast %665 : vector<1x2x16xf32> to vector<2x16xf32>
    %667 = vector.shape_cast %653 : vector<2x16xf32> to vector<1x2x16xf32>
    tpu.vector_store %arg19[%c3_166, %c0_167, %c0_168], %667 {strides = array<i32>} : memref<4x2x16xf32, #tpu.memory_space<vmem>>, vector<1x2x16xf32>,
    %668 = vector.shape_cast %380 : vector<2x16xf32> to vector<2x1x16xf32>
    %c0_169 = arith.constant 0 : index
    %c0_170 = arith.constant 0 : index
    %c0_171 = arith.constant 0 : index
    %669 = vector.load %arg17[%c0_169, %c0_170, %c0_171] : memref<2x8x32xf32, #tpu.memory_space<vmem>>, vector<2x1x16xf32>
    tpu.vector_store %arg17[%c0_169, %c0_170, %c0_171], %668 {strides = array<i32>} : memref<2x8x32xf32, #tpu.memory_space<vmem>>, vector<2x1x16xf32>,
    %670 = vector.shape_cast %655 : vector<2x16xf32> to vector<2x1x16xf32>
    %c0_172 = arith.constant 0 : index
    %c0_173 = arith.constant 0 : index
    %c16_174 = arith.constant 16 : index
    %671 = vector.load %arg17[%c0_172, %c0_173, %c16_174] : memref<2x8x32xf32, #tpu.memory_space<vmem>>, vector<2x1x16xf32>
    tpu.vector_store %arg17[%c0_172, %c0_173, %c16_174], %670 {strides = array<i32>} : memref<2x8x32xf32, #tpu.memory_space<vmem>>, vector<2x1x16xf32>,
    %672 = vector.shape_cast %398 : vector<2x16xf32> to vector<2x1x16xf32>
    %c0_175 = arith.constant 0 : index
    %c1_176 = arith.constant 1 : index
    %c0_177 = arith.constant 0 : index
    %673 = vector.load %arg17[%c0_175, %c1_176, %c0_177] : memref<2x8x32xf32, #tpu.memory_space<vmem>>, vector<2x1x16xf32>
    tpu.vector_store %arg17[%c0_175, %c1_176, %c0_177], %672 {strides = array<i32>} : memref<2x8x32xf32, #tpu.memory_space<vmem>>, vector<2x1x16xf32>,
    %674 = vector.shape_cast %637 : vector<2x16xf32> to vector<2x1x16xf32>
    %c0_178 = arith.constant 0 : index
    %c1_179 = arith.constant 1 : index
    %c16_180 = arith.constant 16 : index
    %675 = vector.load %arg17[%c0_178, %c1_179, %c16_180] : memref<2x8x32xf32, #tpu.memory_space<vmem>>, vector<2x1x16xf32>
    tpu.vector_store %arg17[%c0_178, %c1_179, %c16_180], %674 {strides = array<i32>} : memref<2x8x32xf32, #tpu.memory_space<vmem>>, vector<2x1x16xf32>,
    %676 = vector.shape_cast %416 : vector<2x16xf32> to vector<2x1x16xf32>
    %c0_181 = arith.constant 0 : index
    %c2_182 = arith.constant 2 : index
    %c0_183 = arith.constant 0 : index
    %677 = vector.load %arg17[%c0_181, %c2_182, %c0_183] : memref<2x8x32xf32, #tpu.memory_space<vmem>>, vector<2x1x16xf32>
    tpu.vector_store %arg17[%c0_181, %c2_182, %c0_183], %676 {strides = array<i32>} : memref<2x8x32xf32, #tpu.memory_space<vmem>>, vector<2x1x16xf32>,
    %678 = vector.shape_cast %619 : vector<2x16xf32> to vector<2x1x16xf32>
    %c0_184 = arith.constant 0 : index
    %c2_185 = arith.constant 2 : index
    %c16_186 = arith.constant 16 : index
    %679 = vector.load %arg17[%c0_184, %c2_185, %c16_186] : memref<2x8x32xf32, #tpu.memory_space<vmem>>, vector<2x1x16xf32>
    tpu.vector_store %arg17[%c0_184, %c2_185, %c16_186], %678 {strides = array<i32>} : memref<2x8x32xf32, #tpu.memory_space<vmem>>, vector<2x1x16xf32>,
    %680 = vector.shape_cast %434 : vector<2x16xf32> to vector<2x1x16xf32>
    %c0_187 = arith.constant 0 : index
    %c3_188 = arith.constant 3 : index
    %c0_189 = arith.constant 0 : index
    %681 = vector.load %arg17[%c0_187, %c3_188, %c0_189] : memref<2x8x32xf32, #tpu.memory_space<vmem>>, vector<2x1x16xf32>
    tpu.vector_store %arg17[%c0_187, %c3_188, %c0_189], %680 {strides = array<i32>} : memref<2x8x32xf32, #tpu.memory_space<vmem>>, vector<2x1x16xf32>,
    %682 = vector.shape_cast %601 : vector<2x16xf32> to vector<2x1x16xf32>
    %c0_190 = arith.constant 0 : index
    %c3_191 = arith.constant 3 : index
    %c16_192 = arith.constant 16 : index
    %683 = vector.load %arg17[%c0_190, %c3_191, %c16_192] : memref<2x8x32xf32, #tpu.memory_space<vmem>>, vector<2x1x16xf32>
    tpu.vector_store %arg17[%c0_190, %c3_191, %c16_192], %682 {strides = array<i32>} : memref<2x8x32xf32, #tpu.memory_space<vmem>>, vector<2x1x16xf32>,
    %684 = vector.shape_cast %452 : vector<2x16xf32> to vector<2x1x16xf32>
    %c0_193 = arith.constant 0 : index
    %c4_194 = arith.constant 4 : index
    %c0_195 = arith.constant 0 : index
    %685 = vector.load %arg17[%c0_193, %c4_194, %c0_195] : memref<2x8x32xf32, #tpu.memory_space<vmem>>, vector<2x1x16xf32>
    tpu.vector_store %arg17[%c0_193, %c4_194, %c0_195], %684 {strides = array<i32>} : memref<2x8x32xf32, #tpu.memory_space<vmem>>, vector<2x1x16xf32>,
    %686 = vector.shape_cast %583 : vector<2x16xf32> to vector<2x1x16xf32>
    %c0_196 = arith.constant 0 : index
    %c4_197 = arith.constant 4 : index
    %c16_198 = arith.constant 16 : index
    %687 = vector.load %arg17[%c0_196, %c4_197, %c16_198] : memref<2x8x32xf32, #tpu.memory_space<vmem>>, vector<2x1x16xf32>
    tpu.vector_store %arg17[%c0_196, %c4_197, %c16_198], %686 {strides = array<i32>} : memref<2x8x32xf32, #tpu.memory_space<vmem>>, vector<2x1x16xf32>,
    %688 = vector.shape_cast %470 : vector<2x16xf32> to vector<2x1x16xf32>
    %c0_199 = arith.constant 0 : index
    %c5 = arith.constant 5 : index
    %c0_200 = arith.constant 0 : index
    %689 = vector.load %arg17[%c0_199, %c5, %c0_200] : memref<2x8x32xf32, #tpu.memory_space<vmem>>, vector<2x1x16xf32>
    tpu.vector_store %arg17[%c0_199, %c5, %c0_200], %688 {strides = array<i32>} : memref<2x8x32xf32, #tpu.memory_space<vmem>>, vector<2x1x16xf32>,
    %690 = vector.shape_cast %565 : vector<2x16xf32> to vector<2x1x16xf32>
    %c0_201 = arith.constant 0 : index
    %c5_202 = arith.constant 5 : index
    %c16_203 = arith.constant 16 : index
    %691 = vector.load %arg17[%c0_201, %c5_202, %c16_203] : memref<2x8x32xf32, #tpu.memory_space<vmem>>, vector<2x1x16xf32>
    tpu.vector_store %arg17[%c0_201, %c5_202, %c16_203], %690 {strides = array<i32>} : memref<2x8x32xf32, #tpu.memory_space<vmem>>, vector<2x1x16xf32>,
    %692 = vector.shape_cast %488 : vector<2x16xf32> to vector<2x1x16xf32>
    %c0_204 = arith.constant 0 : index
    %c6_205 = arith.constant 6 : index
    %c0_206 = arith.constant 0 : index
    %693 = vector.load %arg17[%c0_204, %c6_205, %c0_206] : memref<2x8x32xf32, #tpu.memory_space<vmem>>, vector<2x1x16xf32>
    tpu.vector_store %arg17[%c0_204, %c6_205, %c0_206], %692 {strides = array<i32>} : memref<2x8x32xf32, #tpu.memory_space<vmem>>, vector<2x1x16xf32>,
    %694 = vector.shape_cast %547 : vector<2x16xf32> to vector<2x1x16xf32>
    %c0_207 = arith.constant 0 : index
    %c6_208 = arith.constant 6 : index
    %c16_209 = arith.constant 16 : index
    %695 = vector.load %arg17[%c0_207, %c6_208, %c16_209] : memref<2x8x32xf32, #tpu.memory_space<vmem>>, vector<2x1x16xf32>
    tpu.vector_store %arg17[%c0_207, %c6_208, %c16_209], %694 {strides = array<i32>} : memref<2x8x32xf32, #tpu.memory_space<vmem>>, vector<2x1x16xf32>,
    %696 = vector.shape_cast %506 : vector<2x16xf32> to vector<2x1x16xf32>
    %c0_210 = arith.constant 0 : index
    %c7 = arith.constant 7 : index
    %c0_211 = arith.constant 0 : index
    %697 = vector.load %arg17[%c0_210, %c7, %c0_211] : memref<2x8x32xf32, #tpu.memory_space<vmem>>, vector<2x1x16xf32>
    tpu.vector_store %arg17[%c0_210, %c7, %c0_211], %696 {strides = array<i32>} : memref<2x8x32xf32, #tpu.memory_space<vmem>>, vector<2x1x16xf32>,
    %698 = vector.shape_cast %529 : vector<2x16xf32> to vector<2x1x16xf32>
    %c0_212 = arith.constant 0 : index
    %c7_213 = arith.constant 7 : index
    %c16_214 = arith.constant 16 : index
    %699 = vector.load %arg17[%c0_212, %c7_213, %c16_214] : memref<2x8x32xf32, #tpu.memory_space<vmem>>, vector<2x1x16xf32>
    tpu.vector_store %arg17[%c0_212, %c7_213, %c16_214], %698 {strides = array<i32>} : memref<2x8x32xf32, #tpu.memory_space<vmem>>, vector<2x1x16xf32>,
    return
  }
}

</mosaic_0001>

<bundles_post_ra>
// kernel: encoder_rnn_forward.1
= control target key start
LH: loop header
LB: loop body
LE: loop exit
PB: predicated region body
PF: predicated region fallthrough
CT: control target
= control target key end

     0   :  { %s4457_s0 = inlined_call_operand.vmem [shape: s32[16,1], index: 0, kind: input, shape index: {}]   ;;  %s4458_s1 = inlined_call_operand.vmem [shape: f32[16,1], index: 1, kind: input, shape index: {}]   ;;  %s4459_s2 = inlined_call_operand.vmem [shape: f32[32,16], index: 2, kind: input, shape index: {}]   ;;  %s4460_s3 = inlined_call_operand.vmem [shape: f32[4,2,16], index: 3, kind: input, shape index: {}]   ;;  %s4461_s4 = inlined_call_operand.hbm [shape: f32[4,2,16], index: 4, kind: input, shape index: {}]   ;;  %s4462_s5 = inlined_call_operand.vmem [shape: f32[16,64], index: 5, kind: input, shape index: {}]   ;;  %s4463_s6 = inlined_call_operand.vmem [shape: f32[16,64], index: 6, kind: input, shape index: {}]   ;;  %s4464_s7 = inlined_call_operand.vmem [shape: f32[1,64], index: 7, kind: input, shape index: {}]   ;;  %s4465_s8 = inlined_call_operand.hbm [shape: f32[16,64], index: 8, kind: input, shape index: {}]   ;;  %s4466_s9 = inlined_call_operand.hbm [shape: f32[16,64], index: 9, kind: input, shape index: {}]   ;;  %s4467_s10 = inlined_call_operand.vmem [shape: f32[1,64], index: 10, kind: input, shape index: {}]   ;;  %s4468_s11 = inlined_call_operand.vmem [shape: f32[32,64], index: 11, kind: input, shape index: {}]   ;;  %s4469_s12 = inlined_call_operand.hbm [shape: f32[16,64], index: 12, kind: input, shape index: {}]   ;;  %s4470_s13 = inlined_call_operand.vmem [shape: f32[1,64], index: 13, kind: input, shape index: {}]   ;;  %s4471_s14 = inlined_call_operand.vmem [shape: f32[32,64], index: 14, kind: input, shape index: {}]   ;;  %s4472_s15 = inlined_call_operand.hbm [shape: f32[16,64], index: 15, kind: input, shape index: {}]   ;;  %s4473_s16 = inlined_call_operand.hbm [shape: f32[1,64], index: 16, kind: input, shape index: {}]   ;;  %s4474_s17 = inlined_call_operand.hbm [shape: f32[2,8,32], index: 17, kind: output, shape index: {0}]   ;;  %s4475_s18 = inlined_call_operand.hbm [shape: f32[4,2,16], index: 18, kind: output, shape index: {1}]   ;;  %s4476_s19 = inlined_call_operand.hbm [shape: f32[4,2,16], index: 19, kind: output, shape index: {2}]  }
   0x1   :  { %4481 = sst [smem:[#allocation24_spill]] %s4457_s0 }
   0x2   :  { %4482 = sst [smem:[#allocation25_spill]] %s4458_s1 }
   0x3   :  { %4483 = sst [smem:[#allocation26_spill]] %s4459_s2 }
   0x4   :  { %4484 = sst [smem:[#allocation27_spill]] %s4460_s3 }
   0x5   :  { %25 = vsyncpa [#allocation4], 0 }
   0x6   :  { %26 = vsyncpa [#allocation7], 0 }
   0x7   :  { %27 = vsyncpa [#allocation10], 0 }
   0x8   :  { %28 = vsyncpa [#allocation13], 0 }
   0x9   :  { %29 = vsyncpa [#allocation5], 0  ;;  %s62_s20 = sshll.u32 %s4465_s8, 4  ;;  %s63_s20 = int_to_ptr.hbm [resolvable:$true] %s62_s20 }
   0xa   :  { %30 = vsyncpa [#allocation16], 0  ;;  %s3561_s21 = smov [#allocation6]   ;;  %s92_s23 = sshll.u32 %s4469_s12, 4  ;;  %s93_s23 = int_to_ptr.hbm [resolvable:$true] %s92_s23 }
   0xb   :  { %s64_s1 = sshll.u32 %s3561_s21, 4  ;;  %s3562_s24 = smov 128   ;;  %s65_s1 = int_to_ptr.vmem [resolvable:$true] %s64_s1 }
   0xc   :  { %s3563_s25 = smov 8   ;;  %s3564_s3 = smov [#allocation9]  }
   0xd   :  { %70 = dma.hbm_to_vmem [thread:$0]  %s63_s20, 256, %s65_s1, [#allocation7], %s3562_s24, %s3562_s24, %s3563_s25  }
   0xe   :  { %s94_s26 = sshll.u32 %s3564_s3, 4  ;;  %s43_s28 = sshll.u32 %s4461_s4, 4  ;;  %s95_s26 = int_to_ptr.vmem [resolvable:$true] %s94_s26  ;;  %s44_s28 = int_to_ptr.hbm [resolvable:$true] %s43_s28 }
   0xf   :  { %100 = dma.hbm_to_vmem [thread:$0]  %s93_s23, 256, %s95_s26, [#allocation10], %s3562_s24, %s3562_s24, %s3563_s25  }
  0x10   :  { %s3565_s12 = smov [#allocation3]   ;;  %s75_s20 = sshll.u32 %s4466_s9, 4  ;;  %s76_s20 = int_to_ptr.hbm [resolvable:$true] %s75_s20 }
  0x11   :  { %s45_s29 = sshll.u32 %s3565_s12, 4  ;;  %s3566_s21 = smov 32   ;;  %s46_s29 = int_to_ptr.vmem [resolvable:$true] %s45_s29 }
  0x12   :  { %s3567_s1 = smov 2   ;;  %s3568_s4 = smov [#allocation8]  }
  0x13   :  { %51 = dma.hbm_to_vmem [thread:$0]  %s44_s28, 128, %s46_s29, [#allocation4], %s3566_s21, %s3566_s21, %s3567_s1  }
  0x14   :  { %s77_s22 = sshll.u32 %s3568_s4, 4  ;;  %s109_s23 = sshll.u32 %s4472_s15, 4  ;;  %s78_s22 = int_to_ptr.vmem [resolvable:$true] %s77_s22  ;;  %s110_s23 = int_to_ptr.hbm [resolvable:$true] %s109_s23 }
  0x15   :  { %83 = dma.hbm_to_vmem [thread:$0]  %s76_s20, 256, %s78_s22, [#allocation7], %s3562_s24, %s3562_s24, %s3563_s25  }
  0x16   :  { %s123_s27 = sshll.u32 %s4473_s16, 4  ;;  %s3569_s8 = smov [#allocation11]   ;;  %s124_s27 = int_to_ptr.hbm [resolvable:$true] %s123_s27 }
  0x17   :  { %s111_s12 = sshll.u32 %s3569_s8, 4  ;;  %s3570_s28 = smov [#allocation12]   ;;  %s112_s12 = int_to_ptr.vmem [resolvable:$true] %s111_s12 }
  0x18   :  { %117 = dma.hbm_to_vmem [thread:$0]  %s110_s23, 256, %s112_s12, [#allocation10], %s3562_s24, %s3562_s24, %s3563_s25  }
  0x19   :  { %s125_s15 = sshll.u32 %s3570_s28, 4  ;;  %s126_s15 = int_to_ptr.vmem [resolvable:$true] %s125_s15 }
  0x1a   :  { %128 = dma.hbm_to_vmem [thread:$0]  %s124_s27, 16, %s126_s15, [#allocation13]  }
  0x1b   :  { %3549 = dma.done.wait [#allocation4], 128  }
  0x1c   :  { %3550 = vsyncadd [#allocation4], 4294967168 }
  0x1d   :  { %3551 = dma.done.wait [#allocation7], 512  }
  0x1e   :  { %3552 = vsyncadd [#allocation7], 4294966784 }
  0x1f   :  { %3553 = dma.done.wait [#allocation10], 512  }
  0x20   :  { %3554 = vsyncadd [#allocation10], 4294966784 }
  0x21   :  { %3555 = dma.done.wait [#allocation13], 16  }
  0x22   :  { %3556 = vsyncadd [#allocation13], 4294967280  ;;  %v3571_v0 = vmov 0   ;;  %s4485_s0 = sld [smem:[#allocation24_spill]]  ;;  %v283_v7 = vld [vmem:[%s4463_s6 + $0x8] sm:$0xff]  ;;  %v282_v8 = vld [vmem:[%s4463_s6] sm:$0xff]  ;;  %v155_v10 = vlaneseq }
  0x23   :  { %3070 = vset.pattern.permute.xlu0 %v3571_v0  ;;  %3071 = vset.pattern.permute.xlu1 %v3571_v0  ;;  %s4486_s4 = sld [smem:[#allocation26_spill]]  ;;  %vm223_vm0 = vcmask 130048   ;;  %vm173_vm1 = vcmask 261120   ;;  %v3572_v13 = vmov 0.0   ;;  %v218_v15 = vld [vmem:[%s4462_s5 + $0x8] sm:$0xff]  ;;  %v217_v17 = vld [vmem:[%s4462_s5] sm:$0xff] }
  0x24   :  { %3072 = vset.pattern.permute.xlu2 %v3571_v0  ;;  %s4487_s27 = sld [smem:[#allocation25_spill]]  ;;  %303 = vmatpush.msra.mxu3 %v283_v7  ;;  %v3741_v11 = vand.u32 127, %v155_v10  ;;  %v254_v16 = vld [vmem:[#allocation6 + $0x8] sm:$0xff]  ;;  %v253_v18 = vld [vmem:[#allocation6] sm:$0xff]  ;;  %s3573_s9 = smov 96   ;;  %vm1410_vm7 = vcmask 123904  }
  0x25   :  { %s4488_s22 = sld [smem:[#allocation27_spill]]  ;;  %244 = vmatpush.msra.mxu1 %v218_v15  ;;  %273 = vmatpush.msra.mxu2 %v254_v16  ;;  %v3757_v22 = vld [vmem:[%s4464_s7] ss:$0 sm:$0xff]  ;;  %v285_v28 = vld [vmem:[#allocation3] sm:$0x3]  ;;  %s3574_s26 = smov 16  }
  0x26   :  { %304 = vmatpush.msra.mxu3 %v282_v8  ;;  %s3575_s7 = smov 80   ;;  %s2947_s5 = sshll.u32 %s4476_s19, 4  ;;  %s2948_s5 = int_to_ptr.hbm [resolvable:$true] %s2947_s5 }
  0x27   :  { %245 = vmatpush.msra.mxu1 %v217_v17  ;;  %274 = vmatpush.msra.mxu2 %v253_v18 }
  0x28   :  { %v153_v1 = vld [vmem:[%s4485_s0] sm:$0xff]  ;;  %370 = vmatpush.msrb.mxu3 %v283_v7  ;;  %v154_v59 = vld [vmem:[%s4485_s0 + $0x8] sm:$0xff]  ;;  %s2921_s0 = sshll.u32 %s4474_s17, 4  ;;  %s2922_s0 = int_to_ptr.hbm [resolvable:$true] %s2921_s0 }
  0x29   :  { %v172_v2 = vld [vmem:[%s4486_s4 + $0x18] sm:$0xff]  ;;  %158 = vperm.xlu0 %3070, %v153_v1   ;;  %v171_v3 = vld [vmem:[%s4486_s4 + $0x10] sm:$0xff]  ;;  %v170_v4 = vld [vmem:[%s4486_s4 + $0x8] sm:$0xff]  ;;  %440 = vmatpush.msrb.mxu1 %v283_v7 }
  0x2a   :  { %192 = vmatpush.msra.mxu0 %v172_v2  ;;  %v203_v5 = vld [vmem:[%s4487_s27] sm:$0xff]  ;;  %371 = vmatpush.msrb.mxu3 %v282_v8  ;;  %v204_v17 = vld [vmem:[%s4487_s27 + $0x8] sm:$0xff] }
  0x2b   :  { %v169_v6 = vld [vmem:[%s4486_s4] sm:$0xff]  ;;  %510 = vmatpush.msrb.mxu2 %v283_v7  ;;  %441 = vmatpush.msrb.mxu1 %v282_v8  ;;  %s3578_s4 = smov [#allocation17]  }
  0x2c   :  { %193 = vmatpush.msra.mxu0 %v171_v3  ;;  %v284_v9 = vld [vmem:[%s4488_s22] sm:$0x3]  ;;  %s2945_s2 = sshll.u32 %s3578_s4, 4  ;;  %s2946_s2 = int_to_ptr.vmem [resolvable:$true] %s2945_s2 }
  0x2d   :  { %2980 = vmatmul.msk.f32.vlgmr.msra.gmra.mxu3 %vm223_vm0, %v284_v9  ;;  %511 = vmatpush.msrb.mxu2 %v282_v8 }
  0x2e   :  { %194 = vmatpush.msra.mxu0 %v170_v4  ;;  %580 = vmatpush.msra.mxu3 %v283_v7 }
  0x30   :  { %195 = vmatpush.msra.mxu0 %v169_v6  ;;  %581 = vmatpush.msra.mxu3 %v282_v8 }
  0x31   :  { %207 = vperm.xlu0 %3070, %v203_v5  }
  0x32   :  { %646 = vmatpush.msrb.mxu0 %v283_v7 }
  0x34   :  { %647 = vmatpush.msrb.mxu0 %v282_v8 }
  0x9b   :  { %v159_v12 = vpop.permute.xlu0 %158 }
  0x9c   :  { %vm163_vm2 = vcmp.eq.s32.totalorder %v3741_v11, %v159_v12 }
  0x9d   :  { %v2972_v14 = vsel %vm163_vm2, 1.0, %v3572_v13 }
  0x9e   :  { %2974 = vmatmul.msk.f32.vlgmr.msra.gmra.mxu0 %vm173_vm1, %v2972_v14 }
  0xa3   :  { %v208_v19 = vpop.permute.xlu0 %207 }
  0xb0   :  { %v306_v24 = vpop.f32.mrf.mxu3 }
 0x11b   :  { %v197_v20 = vpop.f32.mrf.mxu0 }
 0x11c   :  { %v215_v21 = vmul.f32 %v208_v19, %v197_v20 }
 0x11e   :  { %2976 = vmatmul.msk.f32.vlgmr.msra.gmra.mxu1 %vm223_vm0, %v215_v21  ;;  %2978 = vmatmul.msk.f32.vlgmr.msra.gmra.mxu2 %vm223_vm0, %v215_v21 }
 0x11f   :  { %716 = vmatpush.msra.mxu1 %v283_v7  ;;  %786 = vmatpush.msra.mxu2 %v283_v7 }
 0x121   :  { %717 = vmatpush.msra.mxu1 %v282_v8  ;;  %787 = vmatpush.msra.mxu2 %v282_v8 }
 0x19b   :  { %v247_v23 = vpop.f32.mrf.mxu1 }
 0x19c   :  { %v3760_v25 = vadd.f32 %v3757_v22, %v247_v23 }
 0x19e   :  { %v309_v26 = vadd.f32 %v306_v24, %v3760_v25 }
 0x1a0   :  { %3077 = vtanh.f32 %v309_v26  ;;  %v2981_v29 = vmul.f32 -1.442695, %v309_v26 }
 0x1a2   :  { %3079 = vpow2.f32 %v2981_v29 }
 0x1a6   :  { %v3078_v27 = vpop.eup %3077 }
 0x1a7   :  { %336 = vrot.lane.b32.xlu1 %v3078_v27, %s3573_s9 }
 0x1a8   :  { %v3080_v30 = vpop.eup %3079 }
 0x1a9   :  { %v313_v31 = vadd.f32 1.0, %v3080_v30 }
 0x1ab   :  { %3081 = vrcp.f32 %v313_v31  ;;  %v325_v37 = vand.u32 2147483648, %v313_v31  ;;  %vm319_vm4 = vweird.f32 %v313_v31  ;;  %v323_v38 = vand.u32 2147483647, %v313_v31 }
 0x1ad   :  { %v326_v40 = vor.u32 1.1754944e-38, %v325_v37  ;;  %vm324_vm6 = vcmp.eq.f32.partialorder %v323_v38, 8.507059e+37 }
 0x1af   :  { %331 = vrot.lane.b32.xlu1 %v285_v28, %s3574_s26 }
 0x1b1   :  { %v3082_v32 = vpop.eup %3081 }
 0x1b2   :  { %v315_v33 = vmul.f32 %v3082_v32, %v313_v31  ;;  %vm320_vm3 = vweird.f32 %v3082_v32 }
 0x1b3   :  { %vm321_vm5 = vmor %vm319_vm4, %vm320_vm3 }
 0x1b4   :  { %v316_v34 = vsub.f32 1.0, %v315_v33 }
 0x1b6   :  { %v317_v35 = vmul.f32 %v3082_v32, %v316_v34 }
 0x1b7   :  { %161 = vperm.xlu1 %3071, %v154_v59  }
 0x1b8   :  { %v318_v36 = vadd.f32 %v3082_v32, %v317_v35 }
 0x1ba   :  { %v322_v39 = vsel %vm321_vm5, %v3082_v32, %v318_v36 }
 0x1bb   :  { %v327_v42 = vsel %vm324_vm6, %v326_v40, %v322_v39 }
 0x219   :  { %v337_v41 = vpop.permute.xlu1 %336 }
 0x21a   :  { %v339_v43 = vmul.f32 %v337_v41, %v327_v42 }
 0x21c   :  { %341 = vrot.lane.b32.xlu2 %v339_v43, %s3574_s26 }
 0x221   :  { %v332_v44 = vpop.permute.xlu1 %331 }
 0x222   :  { %v334_v45 = vmul.f32 %v332_v44, %v327_v42 }
 0x229   :  { %v162_v8 = vpop.permute.xlu1 %161 }
 0x22a   :  { %vm164_vm12 = vcmp.eq.s32.totalorder %v3741_v11, %v162_v8 }
 0x22b   :  { %v2973_v9 = vsel %vm164_vm12, 1.0, %v3572_v13 }
 0x22c   :  { %2975 = vmatmul.msk.f32.gmra.mxu0 %vm173_vm1, %v2973_v9 }
 0x276   :  { %v342_v46 = vpop.permute.xlu2 %341 }
 0x277   :  { %v344_v47 = vadd.f32 %v342_v46, %v334_v45 }
 0x279   :  { %3083 = vtanh.f32 %v344_v47  ;;  %v401_v10 = vrot.slane %v344_v47, 6 }
 0x27f   :  { %v3084_v48 = vpop.eup %3083 }
 0x280   :  { %347 = vrot.lane.b32.xlu2 %v3084_v48, %s3566_s21 }
 0x2a9   :  { %v200_v13 = vpop.f32.mrf.mxu0 }
 0x2da   :  { %v348_v49 = vpop.permute.xlu2 %347 }
 0x2db   :  { %v350_v50 = vmul.f32 %v348_v49, %v327_v42 }
 0x2dd   :  { %352 = vrot.lane.b32.xlu0 %v350_v50, %s3575_s7 }
 0x34f   :  { %v353_v51 = vpop.permute.xlu0 %352 }
 0x350   :  { %1419 = vst.msk [vmem:[#allocation2] sm:$0x3] %vm1410_vm7, %v353_v51  ;;  %2982 = vmatmul.msk.f32.vlgmr.msrb.gmra.mxu3 %vm223_vm0, %v353_v51 }
 0x3d3   :  { %v373_v52 = vpop.f32.mrf.mxu3 }
 0x3d4   :  { %v377_v53 = vrot.slane %v373_v52, 6 }
 0x3d6   :  { %v379_v54 = vadd.f32 %v377_v53, %v3760_v25 }
 0x3d8   :  { %3085 = vtanh.f32 %v379_v54  ;;  %v2983_v56 = vmul.f32 -1.442695, %v379_v54  ;;  %v3801_v54 = vpop.f32.mrf.mxu2 }
 0x3da   :  { %3087 = vpow2.f32 %v2983_v56 }
 0x3de   :  { %v3086_v55 = vpop.eup %3085 }
 0x3df   :  { %405 = vrot.lane.b32.xlu2 %v3086_v55, %s3573_s9 }
 0x3e0   :  { %v3088_v57 = vpop.eup %3087 }
 0x3e1   :  { %v383_v58 = vadd.f32 1.0, %v3088_v57 }
 0x3e3   :  { %3089 = vrcp.f32 %v383_v58  ;;  %v395_v1 = vand.u32 2147483648, %v383_v58  ;;  %vm389_vm9 = vweird.f32 %v383_v58  ;;  %v393_v2 = vand.u32 2147483647, %v383_v58 }
 0x3e5   :  { %v396_v4 = vor.u32 1.1754944e-38, %v395_v1  ;;  %vm394_vm11 = vcmp.eq.f32.partialorder %v393_v2, 8.507059e+37 }
 0x3e7   :  { %212 = vperm.xlu2 %3072, %v204_v17  }
 0x3e9   :  { %v3090_v60 = vpop.eup %3089 }
 0x3ea   :  { %v385_v61 = vmul.f32 %v3090_v60, %v383_v58  ;;  %vm390_vm8 = vweird.f32 %v3090_v60 }
 0x3eb   :  { %vm391_vm10 = vmor %vm389_vm9, %vm390_vm8 }
 0x3ec   :  { %v386_v62 = vsub.f32 1.0, %v385_v61 }
 0x3ee   :  { %v387_v63 = vmul.f32 %v3090_v60, %v386_v62 }
 0x3f0   :  { %v388_v0 = vadd.f32 %v3090_v60, %v387_v63 }
 0x3f2   :  { %v392_v3 = vsel %vm391_vm10, %v3090_v60, %v388_v0 }
 0x3f3   :  { %v397_v6 = vsel %vm394_vm11, %v396_v4, %v392_v3 }
 0x3f4   :  { %v403_v12 = vmul.f32 %v401_v10, %v397_v6 }
 0x439   :  { %v406_v5 = vpop.permute.xlu2 %405 }
 0x43a   :  { %v408_v7 = vmul.f32 %v406_v5, %v397_v6 }
 0x43c   :  { %410 = vrot.lane.b32.xlu0 %v408_v7, %s3574_s26 }
 0x441   :  { %v213_v20 = vpop.permute.xlu2 %212 }
 0x442   :  { %v216_v21 = vmul.f32 %v213_v20, %v200_v13  ;;  %v3816_v13 = vld [vmem:[#allocation8 + $0x8] sm:$0xff]  ;;  %v3818_v20 = vld [vmem:[#allocation8] sm:$0xff] }
 0x443   :  { %859 = vmatpush.msrb.mxu3 %v3816_v13  ;;  %931 = vmatpush.msra.mxu0 %v3816_v13 }
 0x444   :  { %2977 = vmatmul.msk.f32.gmra.mxu1 %vm223_vm0, %v216_v21  ;;  %2979 = vmatmul.msk.f32.gmra.mxu2 %vm223_vm0, %v216_v21 }
 0x445   :  { %860 = vmatpush.msrb.mxu3 %v3818_v20  ;;  %932 = vmatpush.msra.mxu0 %v3818_v20 }
 0x4ae   :  { %v411_v14 = vpop.permute.xlu0 %410 }
 0x4af   :  { %v413_v15 = vadd.f32 %v411_v14, %v403_v12 }
 0x4b1   :  { %3091 = vtanh.f32 %v413_v15  ;;  %v471_v45 = vrot.slane %v413_v15, 6 }
 0x4b7   :  { %v3092_v16 = vpop.eup %3091 }
 0x4b8   :  { %416 = vrot.lane.b32.xlu1 %v3092_v16, %s3566_s21 }
 0x4c1   :  { %v3790_v24 = vpop.f32.mrf.mxu1 }
 0x4c7   :  { %v3803_v55 = vpop.f32.mrf.mxu2 }
 0x52a   :  { %v417_v18 = vpop.permute.xlu1 %416 }
 0x52b   :  { %v3783_v19 = vmul.f32 %v417_v18, %v397_v6 }
 0x52d   :  { %v421_v11 = vrot.slane %v3783_v19, 2 }
 0x52f   :  { %422 = vrot.lane.b32.xlu0 %v421_v11, %s3575_s7 }
 0x5a1   :  { %v423_v23 = vpop.permute.xlu0 %422 }
 0x5a2   :  { %2984 = vmatmul.msk.f32.vlgmr.msrb.gmra.mxu1 %vm223_vm0, %v423_v23  ;;  %v2996_v23 = vld [vmem:[%s4488_s22 + $0x2] sm:$0x3] }
 0x5a3   :  { %1001 = vmatpush.msrb.mxu1 %v3816_v13 }
 0x5a5   :  { %1002 = vmatpush.msrb.mxu1 %v3818_v20 }
 0x61f   :  { %v443_v26 = vpop.f32.mrf.mxu1 }
 0x620   :  { %v447_v27 = vrot.slane %v443_v26, 4  ;;  %v3837_v26 = vadd.f32 %v3757_v22, %v3790_v24  ;;  %v841_v24 = vld [vmem:[#allocation3 + $0x2] sm:$0x3] }
 0x622   :  { %v449_v28 = vadd.f32 %v447_v27, %v3760_v25 }
 0x624   :  { %3093 = vtanh.f32 %v449_v28  ;;  %v2985_v30 = vmul.f32 -1.442695, %v449_v28 }
 0x626   :  { %3095 = vpow2.f32 %v2985_v30 }
 0x62a   :  { %v3094_v29 = vpop.eup %3093 }
 0x62b   :  { %475 = vrot.lane.b32.xlu1 %v3094_v29, %s3573_s9  ;;  %v3843_v29 = vld [vmem:[%s4467_s10] ss:$0 sm:$0xff] }
 0x62c   :  { %v3096_v31 = vpop.eup %3095 }
 0x62d   :  { %v453_v32 = vadd.f32 1.0, %v3096_v31 }
 0x62f   :  { %3097 = vrcp.f32 %v453_v32  ;;  %v465_v38 = vand.u32 2147483648, %v453_v32  ;;  %vm459_vm14 = vweird.f32 %v453_v32  ;;  %v463_v39 = vand.u32 2147483647, %v453_v32 }
 0x631   :  { %v466_v41 = vor.u32 1.1754944e-38, %v465_v38  ;;  %vm464_vm2 = vcmp.eq.f32.partialorder %v463_v39, 8.507059e+37 }
 0x635   :  { %v3098_v33 = vpop.eup %3097 }
 0x636   :  { %v455_v34 = vmul.f32 %v3098_v33, %v453_v32  ;;  %vm460_vm13 = vweird.f32 %v3098_v33  ;;  %v3847_v32 = vadd.f32 %v3843_v29, %v3803_v55 }
 0x637   :  { %vm461_vm15 = vmor %vm459_vm14, %vm460_vm13 }
 0x638   :  { %v456_v35 = vsub.f32 1.0, %v455_v34  ;;  %v890_v34 = vrot.slane %v841_v24, 2 }
 0x63a   :  { %v457_v36 = vmul.f32 %v3098_v33, %v456_v35 }
 0x63c   :  { %v458_v37 = vadd.f32 %v3098_v33, %v457_v36 }
 0x63e   :  { %v462_v40 = vsel %vm461_vm15, %v3098_v33, %v458_v37 }
 0x63f   :  { %v467_v43 = vsel %vm464_vm2, %v466_v41, %v462_v40 }
 0x640   :  { %v473_v46 = vmul.f32 %v471_v45, %v467_v43 }
 0x69d   :  { %v476_v42 = vpop.permute.xlu1 %475 }
 0x69e   :  { %v478_v44 = vmul.f32 %v476_v42, %v467_v43 }
 0x6a0   :  { %480 = vrot.lane.b32.xlu2 %v478_v44, %s3574_s26 }
 0x6fa   :  { %v481_v47 = vpop.permute.xlu2 %480 }
 0x6fb   :  { %v483_v48 = vadd.f32 %v481_v47, %v473_v46 }
 0x6fd   :  { %3099 = vtanh.f32 %v483_v48  ;;  %v541_v10 = vrot.slane %v483_v48, 6 }
 0x703   :  { %v3100_v49 = vpop.eup %3099 }
 0x704   :  { %486 = vrot.lane.b32.xlu0 %v3100_v49, %s3566_s21 }
 0x776   :  { %v487_v50 = vpop.permute.xlu0 %486 }
 0x777   :  { %v3796_v51 = vmul.f32 %v487_v50, %v467_v43 }
 0x779   :  { %v491_v52 = vrot.slane %v3796_v51, 4 }
 0x77b   :  { %492 = vrot.lane.b32.xlu1 %v491_v52, %s3575_s7 }
 0x7ed   :  { %v493_v53 = vpop.permute.xlu1 %492 }
 0x7ee   :  { %2986 = vmatmul.msk.f32.vlgmr.msrb.gmra.mxu2 %vm223_vm0, %v493_v53 }
 0x7ef   :  { %1071 = vmatpush.msrb.mxu2 %v3816_v13 }
 0x7f1   :  { %1072 = vmatpush.msrb.mxu2 %v3818_v20 }
 0x871   :  { %v513_v56 = vpop.f32.mrf.mxu2 }
 0x872   :  { %v517_v57 = vrot.slane %v513_v56, 2 }
 0x874   :  { %v519_v58 = vadd.f32 %v517_v57, %v3760_v25 }
 0x876   :  { %3101 = vtanh.f32 %v519_v58  ;;  %v2987_v60 = vmul.f32 -1.442695, %v519_v58 }
 0x878   :  { %3103 = vpow2.f32 %v2987_v60 }
 0x87c   :  { %v3102_v59 = vpop.eup %3101 }
 0x87d   :  { %545 = vrot.lane.b32.xlu2 %v3102_v59, %s3573_s9 }
 0x87e   :  { %v3104_v61 = vpop.eup %3103 }
 0x87f   :  { %v523_v62 = vadd.f32 1.0, %v3104_v61 }
 0x881   :  { %3105 = vrcp.f32 %v523_v62  ;;  %v535_v4 = vand.u32 2147483648, %v523_v62  ;;  %vm529_vm4 = vweird.f32 %v523_v62  ;;  %v533_v5 = vand.u32 2147483647, %v523_v62 }
 0x883   :  { %v536_v6 = vor.u32 1.1754944e-38, %v535_v4  ;;  %vm534_vm6 = vcmp.eq.f32.partialorder %v533_v5, 8.507059e+37 }
 0x887   :  { %v3106_v63 = vpop.eup %3105 }
 0x888   :  { %v525_v0 = vmul.f32 %v3106_v63, %v523_v62  ;;  %vm530_vm3 = vweird.f32 %v3106_v63 }
 0x889   :  { %vm531_vm5 = vmor %vm529_vm4, %vm530_vm3 }
 0x88a   :  { %v526_v1 = vsub.f32 1.0, %v525_v0 }
 0x88c   :  { %v527_v2 = vmul.f32 %v3106_v63, %v526_v1 }
 0x88e   :  { %v528_v3 = vadd.f32 %v3106_v63, %v527_v2 }
 0x890   :  { %v532_v25 = vsel %vm531_vm5, %v3106_v63, %v528_v3 }
 0x891   :  { %v537_v8 = vsel %vm534_vm6, %v536_v6, %v532_v25 }
 0x892   :  { %v543_v12 = vmul.f32 %v541_v10, %v537_v8 }
 0x8d7   :  { %v546_v7 = vpop.permute.xlu2 %545 }
 0x8d8   :  { %v548_v9 = vmul.f32 %v546_v7, %v537_v8 }
 0x8da   :  { %550 = vrot.lane.b32.xlu0 %v548_v9, %s3574_s26 }
 0x94c   :  { %v551_v14 = vpop.permute.xlu0 %550 }
 0x94d   :  { %v3808_v15 = vadd.f32 %v551_v14, %v543_v12 }
 0x94f   :  { %3107 = vtanh.f32 %v3808_v15  ;;  %v608_v4 = vrot.slane %v3808_v15, 6 }
 0x955   :  { %v3108_v16 = vpop.eup %3107 }
 0x956   :  { %556 = vrot.lane.b32.xlu1 %v3108_v16, %s3566_s21 }
 0x9c8   :  { %v557_v17 = vpop.permute.xlu1 %556 }
 0x9c9   :  { %v3812_v18 = vmul.f32 %v557_v17, %v537_v8 }
 0x9cb   :  { %v561_v11 = vrot.slane %v3812_v18, 6 }
 0x9cd   :  { %562 = vrot.lane.b32.xlu2 %v561_v11, %s3575_s7 }
 0xa27   :  { %v563_v21 = vpop.permute.xlu2 %562 }
 0xa28   :  { %2988 = vmatmul.msk.f32.vlgmr.msra.gmra.mxu3 %vm223_vm0, %v563_v21 }
 0xa29   :  { %1137 = vmatpush.msra.mxu3 %v3816_v13 }
 0xa2b   :  { %1138 = vmatpush.msra.mxu3 %v3818_v20 }
 0xa30   :  { %2997 = vmatmul.msk.f32.vlgmr.msrb.gmra.mxu3 %vm223_vm0, %v2996_v23 }
 0xaab   :  { %v583_v27 = vpop.f32.mrf.mxu3 }
 0xaac   :  { %v586_v28 = vadd.f32 %v583_v27, %v3837_v26 }
 0xaae   :  { %3109 = vtanh.f32 %v586_v28  ;;  %v2989_v36 = vmul.f32 -1.442695, %v586_v28 }
 0xab3   :  { %v862_v30 = vpop.f32.mrf.mxu3 }
 0xab4   :  { %v3110_v31 = vpop.eup %3109  ;;  %v866_v33 = vrot.slane %v862_v30, 2 }
 0xab5   :  { %612 = vrot.lane.b32.xlu0 %v3110_v31, %s3573_s9 }
 0xab6   :  { %v868_v22 = vadd.f32 %v866_v33, %v3847_v32 }
 0xab8   :  { %3111 = vtanh.f32 %v868_v22  ;;  %v2998_v38 = vmul.f32 -1.442695, %v868_v22 }
 0xab9   :  { %3113 = vpow2.f32 %v2989_v36 }
 0xaba   :  { %3115 = vpow2.f32 %v2998_v38 }
 0xabd   :  { %891 = vrot.lane.b32.xlu0 %v890_v34, %s3574_s26 }
 0xabe   :  { %v3112_v35 = vpop.eup %3111 }
 0xabf   :  { %896 = vrot.lane.b32.xlu1 %v3112_v35, %s3573_s9  ;;  %v3114_v37 = vpop.eup %3113 }
 0xac0   :  { %v590_v39 = vadd.f32 1.0, %v3114_v37  ;;  %v3116_v40 = vpop.eup %3115 }
 0xac1   :  { %v872_v42 = vadd.f32 1.0, %v3116_v40 }
 0xac2   :  { %3117 = vrcp.f32 %v590_v39  ;;  %v602_v49 = vand.u32 2147483648, %v590_v39  ;;  %vm596_vm9 = vweird.f32 %v590_v39  ;;  %v600_v50 = vand.u32 2147483647, %v590_v39 }
 0xac3   :  { %3119 = vrcp.f32 %v872_v42  ;;  %v884_v61 = vand.u32 2147483648, %v872_v42  ;;  %vm878_vm13 = vweird.f32 %v872_v42  ;;  %v882_v62 = vand.u32 2147483647, %v872_v42 }
 0xac4   :  { %v603_v55 = vor.u32 1.1754944e-38, %v602_v49  ;;  %vm601_vm11 = vcmp.eq.f32.partialorder %v600_v50, 8.507059e+37 }
 0xac5   :  { %v885_v0 = vor.u32 1.1754944e-38, %v884_v61  ;;  %vm883_vm15 = vcmp.eq.f32.partialorder %v882_v62, 8.507059e+37 }
 0xac8   :  { %v3118_v41 = vpop.eup %3117 }
 0xac9   :  { %v592_v43 = vmul.f32 %v3118_v41, %v590_v39  ;;  %v3120_v45 = vpop.eup %3119  ;;  %vm597_vm8 = vweird.f32 %v3118_v41 }
 0xaca   :  { %v874_v47 = vmul.f32 %v3120_v45, %v872_v42  ;;  %vm598_vm10 = vmor %vm596_vm9, %vm597_vm8  ;;  %vm879_vm12 = vweird.f32 %v3120_v45 }
 0xacb   :  { %v593_v44 = vsub.f32 1.0, %v592_v43  ;;  %vm880_vm14 = vmor %vm878_vm13, %vm879_vm12 }
 0xacc   :  { %v875_v52 = vsub.f32 1.0, %v874_v47 }
 0xacd   :  { %v594_v46 = vmul.f32 %v3118_v41, %v593_v44 }
 0xace   :  { %v876_v56 = vmul.f32 %v3120_v45, %v875_v52 }
 0xacf   :  { %v595_v48 = vadd.f32 %v3118_v41, %v594_v46 }
 0xad0   :  { %v877_v60 = vadd.f32 %v3120_v45, %v876_v56 }
 0xad1   :  { %v599_v53 = vsel %vm598_vm10, %v3118_v41, %v595_v48 }
 0xad2   :  { %v604_v58 = vsel %vm601_vm11, %v603_v55, %v599_v53  ;;  %v881_v63 = vsel %vm880_vm14, %v3120_v45, %v877_v60 }
 0xad3   :  { %v886_v1 = vsel %vm883_vm15, %v885_v0, %v881_v63  ;;  %v610_v5 = vmul.f32 %v608_v4, %v604_v58 }
 0xb27   :  { %v613_v57 = vpop.permute.xlu0 %612 }
 0xb28   :  { %v615_v59 = vmul.f32 %v613_v57, %v604_v58 }
 0xb2a   :  { %617 = vrot.lane.b32.xlu2 %v615_v59, %s3574_s26 }
 0xb2f   :  { %v892_v8 = vpop.permute.xlu0 %891 }
 0xb30   :  { %v894_v9 = vmul.f32 %v892_v8, %v886_v1 }
 0xb31   :  { %v897_v2 = vpop.permute.xlu1 %896 }
 0xb32   :  { %v899_v3 = vmul.f32 %v897_v2, %v886_v1 }
 0xb34   :  { %901 = vrot.lane.b32.xlu1 %v899_v3, %s3574_s26 }
 0xb84   :  { %v618_v25 = vpop.permute.xlu2 %617 }
 0xb85   :  { %v3856_v6 = vadd.f32 %v618_v25, %v610_v5 }
 0xb87   :  { %3121 = vtanh.f32 %v3856_v6  ;;  %v677_v4 = vrot.slane %v3856_v6, 6 }
 0xb8d   :  { %v3122_v7 = vpop.eup %3121 }
 0xb8e   :  { %623 = vrot.lane.b32.xlu2 %v3122_v7, %s3566_s21 }
 0xba6   :  { %v902_v10 = vpop.permute.xlu1 %901 }
 0xba7   :  { %v3860_v12 = vadd.f32 %v902_v10, %v894_v9 }
 0xba9   :  { %3123 = vtanh.f32 %v3860_v12  ;;  %v962_v9 = vrot.slane %v3860_v12, 2 }
 0xbaf   :  { %v3124_v14 = vpop.eup %3123 }
 0xbb0   :  { %907 = vrot.lane.b32.xlu0 %v3124_v14, %s3566_s21 }
 0xbe8   :  { %v624_v15 = vpop.permute.xlu2 %623 }
 0xbe9   :  { %v626_v16 = vmul.f32 %v624_v15, %v604_v58 }
 0xbeb   :  { %628 = vrot.lane.b32.xlu1 %v626_v16, %s3575_s7 }
 0xc22   :  { %v908_v17 = vpop.permute.xlu0 %907 }
 0xc23   :  { %v3865_v11 = vmul.f32 %v908_v17, %v886_v1 }
 0xc25   :  { %v912_v21 = vrot.slane %v3865_v11, 6 }
 0xc27   :  { %913 = vrot.lane.b32.xlu2 %v912_v21, %s3575_s7 }
 0xc5d   :  { %v629_v23 = vpop.permute.xlu1 %628 }
 0xc5e   :  { %1455 = vst.msk [vmem:[#allocation2 + $0x8] sm:$0x3] %vm1410_vm7, %v629_v23  ;;  %2990 = vmatmul.msk.f32.vlgmr.msrb.gmra.mxu0 %vm223_vm0, %v629_v23 }
 0xc5f   :  { %1207 = vmatpush.msrb.mxu0 %v3816_v13 }
 0xc61   :  { %1208 = vmatpush.msrb.mxu0 %v3818_v20 }
 0xc81   :  { %v914_v27 = vpop.permute.xlu2 %913 }
 0xc82   :  { %2999 = vmatmul.msk.f32.vlgmr.msra.gmra.mxu0 %vm223_vm0, %v914_v27 }
 0xcdb   :  { %v649_v28 = vpop.f32.mrf.mxu0 }
 0xcdc   :  { %v653_v30 = vrot.slane %v649_v28, 6 }
 0xcde   :  { %v655_v31 = vadd.f32 %v653_v30, %v3837_v26 }
 0xce0   :  { %3125 = vtanh.f32 %v655_v31  ;;  %v2991_v36 = vmul.f32 -1.442695, %v655_v31 }
 0xce6   :  { %v3126_v33 = vpop.eup %3125 }
 0xce7   :  { %681 = vrot.lane.b32.xlu0 %v3126_v33, %s3573_s9 }
 0xcff   :  { %v934_v22 = vpop.f32.mrf.mxu0 }
 0xd00   :  { %v938_v24 = vrot.slane %v934_v22, 4 }
 0xd02   :  { %v940_v34 = vadd.f32 %v938_v24, %v3847_v32 }
 0xd04   :  { %3127 = vtanh.f32 %v940_v34  ;;  %v3000_v43 = vmul.f32 -1.442695, %v940_v34 }
 0xd05   :  { %3129 = vpow2.f32 %v2991_v36 }
 0xd0a   :  { %v3128_v35 = vpop.eup %3127 }
 0xd0b   :  { %966 = vrot.lane.b32.xlu1 %v3128_v35, %s3573_s9  ;;  %v3130_v37 = vpop.eup %3129 }
 0xd0c   :  { %v659_v38 = vadd.f32 1.0, %v3130_v37 }
 0xd0e   :  { %3131 = vrcp.f32 %v659_v38  ;;  %v671_v45 = vand.u32 2147483648, %v659_v38  ;;  %vm665_vm3 = vweird.f32 %v659_v38  ;;  %v669_v46 = vand.u32 2147483647, %v659_v38 }
 0xd0f   :  { %3133 = vpow2.f32 %v3000_v43 }
 0xd10   :  { %v672_v48 = vor.u32 1.1754944e-38, %v671_v45  ;;  %vm670_vm5 = vcmp.eq.f32.partialorder %v669_v46, 8.507059e+37 }
 0xd14   :  { %v3132_v39 = vpop.eup %3131 }
 0xd15   :  { %v661_v40 = vmul.f32 %v3132_v39, %v659_v38  ;;  %vm666_vm2 = vweird.f32 %v3132_v39  ;;  %v3134_v52 = vpop.eup %3133 }
 0xd16   :  { %vm667_vm4 = vmor %vm665_vm3, %vm666_vm2  ;;  %v944_v55 = vadd.f32 1.0, %v3134_v52 }
 0xd17   :  { %v662_v41 = vsub.f32 1.0, %v661_v40 }
 0xd18   :  { %3135 = vrcp.f32 %v944_v55  ;;  %v956_v61 = vand.u32 2147483648, %v944_v55  ;;  %vm950_vm8 = vweird.f32 %v944_v55  ;;  %v954_v62 = vand.u32 2147483647, %v944_v55 }
 0xd19   :  { %v663_v42 = vmul.f32 %v3132_v39, %v662_v41 }
 0xd1a   :  { %v957_v0 = vor.u32 1.1754944e-38, %v956_v61  ;;  %vm955_vm10 = vcmp.eq.f32.partialorder %v954_v62, 8.507059e+37 }
 0xd1b   :  { %v664_v44 = vadd.f32 %v3132_v39, %v663_v42 }
 0xd1d   :  { %v668_v47 = vsel %vm667_vm4, %v3132_v39, %v664_v44 }
 0xd1e   :  { %v673_v50 = vsel %vm670_vm5, %v672_v48, %v668_v47  ;;  %v3136_v56 = vpop.eup %3135 }
 0xd1f   :  { %v946_v57 = vmul.f32 %v3136_v56, %v944_v55  ;;  %vm951_vm6 = vweird.f32 %v3136_v56  ;;  %v679_v5 = vmul.f32 %v677_v4, %v673_v50 }
 0xd20   :  { %vm952_vm9 = vmor %vm950_vm8, %vm951_vm6 }
 0xd21   :  { %v947_v58 = vsub.f32 1.0, %v946_v57 }
 0xd23   :  { %v948_v59 = vmul.f32 %v3136_v56, %v947_v58 }
 0xd25   :  { %v949_v60 = vadd.f32 %v3136_v56, %v948_v59 }
 0xd27   :  { %v953_v63 = vsel %vm952_vm9, %v3136_v56, %v949_v60 }
 0xd28   :  { %v958_v2 = vsel %vm955_vm10, %v957_v0, %v953_v63 }
 0xd29   :  { %v964_v10 = vmul.f32 %v962_v9, %v958_v2 }
 0xd59   :  { %v682_v49 = vpop.permute.xlu0 %681 }
 0xd5a   :  { %v684_v53 = vmul.f32 %v682_v49, %v673_v50 }
 0xd5c   :  { %686 = vrot.lane.b32.xlu2 %v684_v53, %s3574_s26 }
 0xd7d   :  { %v967_v1 = vpop.permute.xlu1 %966 }
 0xd7e   :  { %v969_v3 = vmul.f32 %v967_v1, %v958_v2 }
 0xd80   :  { %971 = vrot.lane.b32.xlu0 %v969_v3, %s3574_s26 }
 0xdb6   :  { %v687_v25 = vpop.permute.xlu2 %686 }
 0xdb7   :  { %v3881_v7 = vadd.f32 %v687_v25, %v679_v5 }
 0xdb9   :  { %3137 = vtanh.f32 %v3881_v7  ;;  %v747_v25 = vrot.slane %v3881_v7, 6 }
 0xdbf   :  { %v3138_v8 = vpop.eup %3137 }
 0xdc0   :  { %692 = vrot.lane.b32.xlu1 %v3138_v8, %s3566_s21 }
 0xdf2   :  { %v972_v14 = vpop.permute.xlu0 %971 }
 0xdf3   :  { %v3886_v15 = vadd.f32 %v972_v14, %v964_v10 }
 0xdf5   :  { %3139 = vtanh.f32 %v3886_v15 }
 0xdfb   :  { %v3140_v16 = vpop.eup %3139 }
 0xdfc   :  { %977 = vrot.lane.b32.xlu2 %v3140_v16, %s3566_s21  ;;  %v1032_v16 = vrot.slane %v3886_v15, 2 }
 0xe32   :  { %v693_v6 = vpop.permute.xlu1 %692 }
 0xe33   :  { %v3890_v17 = vmul.f32 %v693_v6, %v673_v50 }
 0xe35   :  { %v697_v21 = vrot.slane %v3890_v17, 2 }
 0xe37   :  { %698 = vrot.lane.b32.xlu0 %v697_v21, %s3575_s7 }
 0xe56   :  { %v978_v23 = vpop.permute.xlu2 %977 }
 0xe57   :  { %v3894_v27 = vmul.f32 %v978_v23, %v958_v2 }
 0xe59   :  { %v982_v12 = vrot.slane %v3894_v27, 4 }
 0xe5b   :  { %983 = vrot.lane.b32.xlu1 %v982_v12, %s3575_s7 }
 0xea9   :  { %v699_v28 = vpop.permute.xlu0 %698 }
 0xeaa   :  { %2992 = vmatmul.msk.f32.vlgmr.msra.gmra.mxu1 %vm223_vm0, %v699_v28 }
 0xeab   :  { %1277 = vmatpush.msra.mxu1 %v3816_v13 }
 0xead   :  { %1278 = vmatpush.msra.mxu1 %v3818_v20 }
 0xecd   :  { %v984_v30 = vpop.permute.xlu1 %983 }
 0xece   :  { %3001 = vmatmul.msk.f32.vlgmr.msrb.gmra.mxu1 %vm223_vm0, %v984_v30 }
 0xf27   :  { %v719_v31 = vpop.f32.mrf.mxu1 }
 0xf28   :  { %v723_v33 = vrot.slane %v719_v31, 4 }
 0xf2a   :  { %v725_v22 = vadd.f32 %v723_v33, %v3837_v26 }
 0xf2c   :  { %3141 = vtanh.f32 %v725_v22  ;;  %v2993_v38 = vmul.f32 -1.442695, %v725_v22 }
 0xf32   :  { %v3142_v24 = vpop.eup %3141 }
 0xf33   :  { %751 = vrot.lane.b32.xlu2 %v3142_v24, %s3573_s9 }
 0xf4b   :  { %v1004_v34 = vpop.f32.mrf.mxu1 }
 0xf4c   :  { %v1008_v35 = vrot.slane %v1004_v34, 6 }
 0xf4e   :  { %v1010_v36 = vadd.f32 %v1008_v35, %v3847_v32 }
 0xf50   :  { %3143 = vtanh.f32 %v1010_v36  ;;  %v3002_v55 = vmul.f32 -1.442695, %v1010_v36 }
 0xf51   :  { %3145 = vpow2.f32 %v2993_v38 }
 0xf56   :  { %v3144_v37 = vpop.eup %3143 }
 0xf57   :  { %1036 = vrot.lane.b32.xlu0 %v3144_v37, %s3573_s9  ;;  %v3146_v39 = vpop.eup %3145 }
 0xf58   :  { %v729_v40 = vadd.f32 1.0, %v3146_v39 }
 0xf5a   :  { %3147 = vrcp.f32 %v729_v40  ;;  %v741_v46 = vand.u32 2147483648, %v729_v40  ;;  %vm735_vm12 = vweird.f32 %v729_v40  ;;  %v739_v47 = vand.u32 2147483647, %v729_v40 }
 0xf5b   :  { %3149 = vpow2.f32 %v3002_v55 }
 0xf5c   :  { %v742_v49 = vor.u32 1.1754944e-38, %v741_v46  ;;  %vm740_vm14 = vcmp.eq.f32.partialorder %v739_v47, 8.507059e+37 }
 0xf60   :  { %v3148_v41 = vpop.eup %3147 }
 0xf61   :  { %v731_v42 = vmul.f32 %v3148_v41, %v729_v40  ;;  %vm736_vm11 = vweird.f32 %v3148_v41  ;;  %v3150_v56 = vpop.eup %3149 }
 0xf62   :  { %vm737_vm13 = vmor %vm735_vm12, %vm736_vm11  ;;  %v1014_v57 = vadd.f32 1.0, %v3150_v56 }
 0xf63   :  { %v732_v43 = vsub.f32 1.0, %v731_v42 }
 0xf64   :  { %3151 = vrcp.f32 %v1014_v57  ;;  %v1026_v63 = vand.u32 2147483648, %v1014_v57  ;;  %vm1020_vm2 = vweird.f32 %v1014_v57  ;;  %v1024_v0 = vand.u32 2147483647, %v1014_v57 }
 0xf65   :  { %v733_v44 = vmul.f32 %v3148_v41, %v732_v43 }
 0xf66   :  { %v1027_v2 = vor.u32 1.1754944e-38, %v1026_v63  ;;  %vm1025_vm4 = vcmp.eq.f32.partialorder %v1024_v0, 8.507059e+37 }
 0xf67   :  { %v734_v45 = vadd.f32 %v3148_v41, %v733_v44 }
 0xf69   :  { %v738_v48 = vsel %vm737_vm13, %v3148_v41, %v734_v45 }
 0xf6a   :  { %v743_v50 = vsel %vm740_vm14, %v742_v49, %v738_v48  ;;  %v3152_v58 = vpop.eup %3151 }
 0xf6b   :  { %v1016_v59 = vmul.f32 %v3152_v58, %v1014_v57  ;;  %vm1021_vm15 = vweird.f32 %v3152_v58  ;;  %v749_v8 = vmul.f32 %v747_v25, %v743_v50 }
 0xf6c   :  { %vm1022_vm3 = vmor %vm1020_vm2, %vm1021_vm15 }
 0xf6d   :  { %v1017_v60 = vsub.f32 1.0, %v1016_v59 }
 0xf6f   :  { %v1018_v61 = vmul.f32 %v3152_v58, %v1017_v60 }
 0xf71   :  { %v1019_v62 = vadd.f32 %v3152_v58, %v1018_v61  ;;  %v3940_v61 = vadd.f32 %v3843_v29, %v3801_v54 }
 0xf73   :  { %v1023_v1 = vsel %vm1022_vm3, %v3152_v58, %v1019_v62 }
 0xf74   :  { %v1028_v4 = vsel %vm1025_vm4, %v1027_v2, %v1023_v1 }
 0xf75   :  { %v1034_v6 = vmul.f32 %v1032_v16, %v1028_v4 }
 0xf8d   :  { %v752_v52 = vpop.permute.xlu2 %751 }
 0xf8e   :  { %v754_v53 = vmul.f32 %v752_v52, %v743_v50 }
 0xf90   :  { %756 = vrot.lane.b32.xlu1 %v754_v53, %s3574_s26 }
 0xfc9   :  { %v1037_v3 = vpop.permute.xlu0 %1036 }
 0xfca   :  { %v1039_v5 = vmul.f32 %v1037_v3, %v1028_v4 }
 0xfcc   :  { %1041 = vrot.lane.b32.xlu2 %v1039_v5, %s3574_s26 }
0x1002   :  { %v757_v9 = vpop.permute.xlu1 %756 }
0x1003   :  { %v3909_v10 = vadd.f32 %v757_v9, %v749_v8 }
0x1005   :  { %3153 = vtanh.f32 %v3909_v10 }
0x100b   :  { %v3154_v14 = vpop.eup %3153 }
0x100c   :  { %762 = vrot.lane.b32.xlu0 %v3154_v14, %s3566_s21 }
0x1026   :  { %v1042_v21 = vpop.permute.xlu2 %1041 }
0x1027   :  { %v1044_v23 = vadd.f32 %v1042_v21, %v1034_v6 }
0x1029   :  { %3155 = vtanh.f32 %v1044_v23 }
0x102f   :  { %v3156_v12 = vpop.eup %3155 }
0x1030   :  { %1047 = vrot.lane.b32.xlu1 %v3156_v12, %s3566_s21 }
0x107e   :  { %v763_v28 = vpop.permute.xlu0 %762 }
0x107f   :  { %v3915_v7 = vmul.f32 %v763_v28, %v743_v50  ;;  %v1099_v50 = vrot.slane %v1044_v23, 2 }
0x1081   :  { %v767_v30 = vrot.slane %v3915_v7, 4 }
0x1083   :  { %768 = vrot.lane.b32.xlu2 %v767_v30, %s3575_s7 }
0x10a2   :  { %v1048_v31 = vpop.permute.xlu1 %1047 }
0x10a3   :  { %v3919_v33 = vmul.f32 %v1048_v31, %v1028_v4 }
0x10a5   :  { %v1052_v22 = vrot.slane %v3919_v33, 2 }
0x10a7   :  { %1053 = vrot.lane.b32.xlu0 %v1052_v22, %s3575_s7 }
0x10dd   :  { %v769_v15 = vpop.permute.xlu2 %768 }
0x10de   :  { %2994 = vmatmul.msk.f32.vlgmr.msra.gmra.mxu2 %vm223_vm0, %v769_v15 }
0x10df   :  { %1347 = vmatpush.msra.mxu2 %v3816_v13 }
0x10e1   :  { %1348 = vmatpush.msra.mxu2 %v3818_v20 }
0x1119   :  { %v1054_v24 = vpop.permute.xlu0 %1053 }
0x111a   :  { %3003 = vmatmul.msk.f32.vlgmr.msrb.gmra.mxu2 %vm223_vm0, %v1054_v24 }
0x1161   :  { %v3927_v34 = vpop.f32.mrf.mxu2 }
0x119d   :  { %v1074_v35 = vpop.f32.mrf.mxu2 }
0x119e   :  { %v1077_v36 = vadd.f32 %v1074_v35, %v3847_v32 }
0x11a0   :  { %3157 = vtanh.f32 %v1077_v36  ;;  %v3004_v38 = vmul.f32 -1.442695, %v1077_v36 }
0x11a2   :  { %3159 = vpow2.f32 %v3004_v38 }
0x11a6   :  { %v3158_v37 = vpop.eup %3157 }
0x11a7   :  { %1103 = vrot.lane.b32.xlu1 %v3158_v37, %s3573_s9 }
0x11a8   :  { %v3160_v39 = vpop.eup %3159 }
0x11a9   :  { %v1081_v40 = vadd.f32 1.0, %v3160_v39 }
0x11ab   :  { %3161 = vrcp.f32 %v1081_v40  ;;  %v1093_v44 = vand.u32 2147483648, %v1081_v40  ;;  %vm1087_vm6 = vweird.f32 %v1081_v40  ;;  %v1091_v45 = vand.u32 2147483647, %v1081_v40 }
0x11ad   :  { %v1094_v46 = vor.u32 1.1754944e-38, %v1093_v44  ;;  %vm1092_vm9 = vcmp.eq.f32.partialorder %v1091_v45, 8.507059e+37 }
0x11b1   :  { %v3162_v13 = vpop.eup %3161 }
0x11b2   :  { %v1083_v41 = vmul.f32 %v3162_v13, %v1081_v40  ;;  %vm1088_vm5 = vweird.f32 %v3162_v13 }
0x11b3   :  { %vm1089_vm8 = vmor %vm1087_vm6, %vm1088_vm5 }
0x11b4   :  { %v1084_v20 = vsub.f32 1.0, %v1083_v41 }
0x11b6   :  { %v1085_v42 = vmul.f32 %v3162_v13, %v1084_v20 }
0x11b8   :  { %v1086_v43 = vadd.f32 %v3162_v13, %v1085_v42 }
0x11ba   :  { %v1090_v32 = vsel %vm1089_vm8, %v3162_v13, %v1086_v43 }
0x11bb   :  { %v1095_v48 = vsel %vm1092_vm9, %v1094_v46, %v1090_v32 }
0x11bc   :  { %v1101_v52 = vmul.f32 %v1099_v50, %v1095_v48 }
0x1219   :  { %v1104_v47 = vpop.permute.xlu1 %1103 }
0x121a   :  { %v1106_v49 = vmul.f32 %v1104_v47, %v1095_v48 }
0x121c   :  { %1108 = vrot.lane.b32.xlu2 %v1106_v49, %s3574_s26 }
0x1276   :  { %v1109_v53 = vpop.permute.xlu2 %1108 }
0x1277   :  { %v1111_v55 = vadd.f32 %v1109_v53, %v1101_v52 }
0x1279   :  { %3163 = vtanh.f32 %v1111_v55  ;;  %v1168_v12 = vrot.slane %v1111_v55, 2 }
0x127f   :  { %v3164_v56 = vpop.eup %3163 }
0x1280   :  { %1114 = vrot.lane.b32.xlu0 %v3164_v56, %s3566_s21 }
0x12f2   :  { %v1115_v57 = vpop.permute.xlu0 %1114 }
0x12f3   :  { %v3933_v58 = vmul.f32 %v1115_v57, %v1095_v48 }
0x12f5   :  { %1119 = vrot.lane.b32.xlu1 %v3933_v58, %s3575_s7 }
0x1367   :  { %v1120_v59 = vpop.permute.xlu1 %1119 }
0x1368   :  { %3005 = vmatmul.msk.f32.vlgmr.msra.gmra.mxu3 %vm223_vm0, %v1120_v59 }
0x13eb   :  { %v1140_v60 = vpop.f32.mrf.mxu3 }
0x13ec   :  { %v1144_v62 = vrot.slane %v1140_v60, 2 }
0x13ee   :  { %v1146_v63 = vadd.f32 %v1144_v62, %v3940_v61 }
0x13f0   :  { %3165 = vtanh.f32 %v1146_v63  ;;  %v3006_v1 = vmul.f32 -1.442695, %v1146_v63 }
0x13f2   :  { %3167 = vpow2.f32 %v3006_v1 }
0x13f6   :  { %v3166_v0 = vpop.eup %3165 }
0x13f7   :  { %1172 = vrot.lane.b32.xlu2 %v3166_v0, %s3573_s9 }
0x13f8   :  { %v3168_v2 = vpop.eup %3167 }
0x13f9   :  { %v1150_v3 = vadd.f32 1.0, %v3168_v2 }
0x13fb   :  { %3169 = vrcp.f32 %v1150_v3  ;;  %v1162_v54 = vand.u32 2147483648, %v1150_v3  ;;  %vm1156_vm11 = vweird.f32 %v1150_v3  ;;  %v1160_v29 = vand.u32 2147483647, %v1150_v3 }
0x13fd   :  { %v1163_v16 = vor.u32 1.1754944e-38, %v1162_v54  ;;  %vm1161_vm13 = vcmp.eq.f32.partialorder %v1160_v29, 8.507059e+37 }
0x1401   :  { %v3170_v4 = vpop.eup %3169 }
0x1402   :  { %v1152_v5 = vmul.f32 %v3170_v4, %v1150_v3  ;;  %vm1157_vm10 = vweird.f32 %v3170_v4 }
0x1403   :  { %vm1158_vm12 = vmor %vm1156_vm11, %vm1157_vm10 }
0x1404   :  { %v1153_v25 = vsub.f32 1.0, %v1152_v5 }
0x1406   :  { %v1154_v8 = vmul.f32 %v3170_v4, %v1153_v25 }
0x1408   :  { %v1155_v9 = vadd.f32 %v3170_v4, %v1154_v8 }
0x140a   :  { %v1159_v14 = vsel %vm1158_vm12, %v3170_v4, %v1155_v9 }
0x140b   :  { %v1164_v21 = vsel %vm1161_vm13, %v1163_v16, %v1159_v14  ;;  %vm1428_vm13 = vcmask 125954  }
0x140c   :  { %v1170_v28 = vmul.f32 %v1168_v12, %v1164_v21 }
0x1451   :  { %v1173_v6 = vpop.permute.xlu2 %1172 }
0x1452   :  { %v1175_v23 = vmul.f32 %v1173_v6, %v1164_v21 }
0x1454   :  { %1177 = vrot.lane.b32.xlu0 %v1175_v23, %s3574_s26 }
0x14c6   :  { %v1178_v30 = vpop.permute.xlu0 %1177 }
0x14c7   :  { %v1180_v31 = vadd.f32 %v1178_v30, %v1170_v28 }
0x14c9   :  { %3171 = vtanh.f32 %v1180_v31  ;;  %v1238_v55 = vrot.slane %v1180_v31, 2 }
0x14cf   :  { %v3172_v22 = vpop.eup %3171 }
0x14d0   :  { %1183 = vrot.lane.b32.xlu1 %v3172_v22, %s3566_s21 }
0x1542   :  { %v1184_v15 = vpop.permute.xlu1 %1183 }
0x1543   :  { %v3946_v24 = vmul.f32 %v1184_v15, %v1164_v21 }
0x1545   :  { %v1188_v35 = vrot.slane %v3946_v24, 6 }
0x1547   :  { %1189 = vrot.lane.b32.xlu2 %v1188_v35, %s3575_s7 }
0x15a1   :  { %v1190_v36 = vpop.permute.xlu2 %1189 }
0x15a2   :  { %3007 = vmatmul.msk.f32.vlgmr.msrb.gmra.mxu0 %vm223_vm0, %v1190_v36 }
0x161f   :  { %v1210_v37 = vpop.f32.mrf.mxu0 }
0x1620   :  { %v1214_v38 = vrot.slane %v1210_v37, 4 }
0x1622   :  { %v1216_v39 = vadd.f32 %v1214_v38, %v3940_v61 }
0x1624   :  { %3173 = vtanh.f32 %v1216_v39  ;;  %v3008_v13 = vmul.f32 -1.442695, %v1216_v39 }
0x1626   :  { %3175 = vpow2.f32 %v3008_v13 }
0x162a   :  { %v3174_v40 = vpop.eup %3173 }
0x162b   :  { %1242 = vrot.lane.b32.xlu0 %v3174_v40, %s3573_s9 }
0x162c   :  { %v3176_v41 = vpop.eup %3175 }
0x162d   :  { %v1220_v20 = vadd.f32 1.0, %v3176_v41 }
0x162f   :  { %3177 = vrcp.f32 %v1220_v20  ;;  %v1232_v46 = vand.u32 2147483648, %v1220_v20  ;;  %vm1226_vm15 = vweird.f32 %v1220_v20  ;;  %v1230_v47 = vand.u32 2147483647, %v1220_v20 }
0x1631   :  { %v1233_v49 = vor.u32 1.1754944e-38, %v1232_v46  ;;  %vm1231_vm3 = vcmp.eq.f32.partialorder %v1230_v47, 8.507059e+37 }
0x1635   :  { %v3178_v42 = vpop.eup %3177 }
0x1636   :  { %v1222_v43 = vmul.f32 %v3178_v42, %v1220_v20  ;;  %vm1227_vm14 = vweird.f32 %v3178_v42 }
0x1637   :  { %vm1228_vm2 = vmor %vm1226_vm15, %vm1227_vm14  ;;  %vm1438_vm14 = vcmask 128004   ;;  %vm1433_vm15 = vcmask 257154  }
0x1638   :  { %v1223_v44 = vsub.f32 1.0, %v1222_v43 }
0x163a   :  { %v1224_v45 = vmul.f32 %v3178_v42, %v1223_v44 }
0x163c   :  { %v1225_v32 = vadd.f32 %v3178_v42, %v1224_v45 }
0x163e   :  { %v1229_v48 = vsel %vm1228_vm2, %v3178_v42, %v1225_v32  ;;  %vm1398_vm2 = vcmask 130054  }
0x163f   :  { %v1234_v52 = vsel %vm1231_vm3, %v1233_v49, %v1229_v48  ;;  %vm1443_vm3 = vcmask 259204  }
0x1640   :  { %v1240_v56 = vmul.f32 %v1238_v55, %v1234_v52 }
0x169d   :  { %v1243_v50 = vpop.permute.xlu0 %1242 }
0x169e   :  { %v1245_v53 = vmul.f32 %v1243_v50, %v1234_v52 }
0x16a0   :  { %1247 = vrot.lane.b32.xlu1 %v1245_v53, %s3574_s26 }
0x1712   :  { %v1248_v57 = vpop.permute.xlu1 %1247 }
0x1713   :  { %v1250_v59 = vadd.f32 %v1248_v57, %v1240_v56 }
0x1715   :  { %3179 = vtanh.f32 %v1250_v59  ;;  %v1308_v15 = vrot.slane %v1250_v59, 2 }
0x171b   :  { %v3180_v60 = vpop.eup %3179 }
0x171c   :  { %1253 = vrot.lane.b32.xlu2 %v3180_v60, %s3566_s21 }
0x1776   :  { %v1254_v62 = vpop.permute.xlu2 %1253 }
0x1777   :  { %v3955_v63 = vmul.f32 %v1254_v62, %v1234_v52 }
0x1779   :  { %v1258_v0 = vrot.slane %v3955_v63, 4 }
0x177b   :  { %1259 = vrot.lane.b32.xlu0 %v1258_v0, %s3575_s7 }
0x17ed   :  { %v1260_v1 = vpop.permute.xlu0 %1259 }
0x17ee   :  { %3009 = vmatmul.msk.f32.vlgmr.msra.gmra.mxu1 %vm223_vm0, %v1260_v1 }
0x186b   :  { %v1280_v2 = vpop.f32.mrf.mxu1 }
0x186c   :  { %v1284_v3 = vrot.slane %v1280_v2, 6 }
0x186e   :  { %v1286_v4 = vadd.f32 %v1284_v3, %v3940_v61 }
0x1870   :  { %3181 = vtanh.f32 %v1286_v4  ;;  %v3010_v25 = vmul.f32 -1.442695, %v1286_v4 }
0x1872   :  { %3183 = vpow2.f32 %v3010_v25 }
0x1876   :  { %v3182_v5 = vpop.eup %3181 }
0x1877   :  { %1312 = vrot.lane.b32.xlu1 %v3182_v5, %s3573_s9 }
0x1878   :  { %v3184_v8 = vpop.eup %3183 }
0x1879   :  { %v1290_v9 = vadd.f32 1.0, %v3184_v8 }
0x187b   :  { %3185 = vrcp.f32 %v1290_v9  ;;  %v1302_v21 = vand.u32 2147483648, %v1290_v9  ;;  %vm1296_vm5 = vweird.f32 %v1290_v9  ;;  %v1300_v23 = vand.u32 2147483647, %v1290_v9 }
0x187d   :  { %v1303_v28 = vor.u32 1.1754944e-38, %v1302_v21  ;;  %vm1301_vm8 = vcmp.eq.f32.partialorder %v1300_v23, 8.507059e+37  ;;  %v4019_v21 = vld [vmem:[#allocation9] sm:$0xff] }
0x187e   :  { %v3017_v23 = vld [vmem:[%s4488_s22 + $0x4] sm:$0x3] }
0x1881   :  { %v3186_v54 = vpop.eup %3185 }
0x1882   :  { %v1292_v29 = vmul.f32 %v3186_v54, %v1290_v9  ;;  %vm1297_vm4 = vweird.f32 %v3186_v54  ;;  %v1485_v9 = vld [vmem:[%s4468_s11 + $0x10] sm:$0xff] }
0x1883   :  { %vm1298_vm6 = vmor %vm1296_vm5, %vm1297_vm4  ;;  %vm1423_vm4 = vcmask 255104   ;;  %vm1452_vm5 = vcmask 261254  }
0x1884   :  { %v1293_v14 = vsub.f32 1.0, %v1292_v29  ;;  %v1521_v29 = vld [vmem:[%s4471_s14 + $0x8] sm:$0xff] }
0x1886   :  { %v1294_v16 = vmul.f32 %v3186_v54, %v1293_v14  ;;  %v1483_v14 = vld [vmem:[%s4468_s11] sm:$0xff] }
0x1888   :  { %v1295_v6 = vadd.f32 %v3186_v54, %v1294_v16  ;;  %v1520_v16 = vld [vmem:[%s4471_s14] sm:$0xff] }
0x188a   :  { %v1299_v12 = vsel %vm1298_vm6, %v3186_v54, %v1295_v6  ;;  %v1484_v54 = vld [vmem:[%s4468_s11 + $0x8] sm:$0xff] }
0x188b   :  { %v1304_v31 = vsel %vm1301_vm8, %v1303_v28, %v1299_v12  ;;  %v4017_v6 = vld [vmem:[#allocation9 + $0x8] sm:$0xff]  ;;  %v1556_v12 = vld [vmem:[#allocation3 + $0x4] sm:$0x3] }
0x188c   :  { %v1310_v35 = vmul.f32 %v1308_v15, %v1304_v31  ;;  %1574 = vmatpush.msrb.mxu1 %v4017_v6  ;;  %1641 = vmatpush.msrb.mxu2 %v4017_v6 }
0x188e   :  { %1575 = vmatpush.msrb.mxu1 %v4019_v21  ;;  %1642 = vmatpush.msrb.mxu2 %v4019_v21 }
0x188f   :  { %3018 = vmatmul.msk.f32.vlgmr.msrb.gmra.mxu1 %vm223_vm0, %v3017_v23 }
0x1890   :  { %1711 = vmatpush.msra.mxu1 %v4017_v6 }
0x1892   :  { %1712 = vmatpush.msra.mxu1 %v4019_v21 }
0x1894   :  { %1987 = vmatpush.msrb.mxu1 %v4017_v6 }
0x1896   :  { %1988 = vmatpush.msrb.mxu1 %v4019_v21 }
0x18e9   :  { %v1313_v30 = vpop.permute.xlu1 %1312 }
0x18ea   :  { %v1315_v22 = vmul.f32 %v1313_v30, %v1304_v31 }
0x18ec   :  { %1317 = vrot.lane.b32.xlu2 %v1315_v22, %s3574_s26  ;;  %v4047_v22 = vld [vmem:[%s4470_s13] ss:$0 sm:$0xff] }
0x1946   :  { %v1318_v36 = vpop.permute.xlu2 %1317 }
0x1947   :  { %v1320_v37 = vadd.f32 %v1318_v36, %v1310_v35  ;;  %v1577_v35 = vpop.f32.mrf.mxu1 }
0x1949   :  { %3187 = vtanh.f32 %v1320_v37  ;;  %v1375_v60 = vrot.slane %v1320_v37, 2 }
0x194f   :  { %v3188_v38 = vpop.eup %3187 }
0x1950   :  { %1323 = vrot.lane.b32.xlu0 %v3188_v38, %s3566_s21 }
0x19c2   :  { %v1324_v39 = vpop.permute.xlu0 %1323 }
0x19c3   :  { %v1326_v40 = vmul.f32 %v1324_v39, %v1304_v31 }
0x19c5   :  { %v1328_v13 = vrot.slane %v1326_v40, 2 }
0x19c7   :  { %1329 = vrot.lane.b32.xlu1 %v1328_v13, %s3575_s7 }
0x1a39   :  { %v1330_v41 = vpop.permute.xlu1 %1329 }
0x1a3a   :  { %3011 = vmatmul.msk.f32.vlgmr.msra.gmra.mxu2 %vm223_vm0, %v1330_v41 }
0x1a3b   :  { %1781 = vmatpush.msra.mxu2 %v4017_v6 }
0x1a3d   :  { %1782 = vmatpush.msra.mxu2 %v4019_v21 }
0x1abd   :  { %v1350_v20 = vpop.f32.mrf.mxu2 }
0x1abe   :  { %v1353_v42 = vadd.f32 %v1350_v20, %v3940_v61 }
0x1ac0   :  { %3189 = vtanh.f32 %v1353_v42  ;;  %v3012_v44 = vmul.f32 -1.442695, %v1353_v42 }
0x1ac2   :  { %3191 = vpow2.f32 %v3012_v44 }
0x1ac6   :  { %v3190_v43 = vpop.eup %3189 }
0x1ac7   :  { %1379 = vrot.lane.b32.xlu2 %v3190_v43, %s3573_s9 }
0x1ac8   :  { %v3192_v45 = vpop.eup %3191 }
0x1ac9   :  { %v1357_v32 = vadd.f32 1.0, %v3192_v45 }
0x1acb   :  { %3193 = vrcp.f32 %v1357_v32  ;;  %v1369_v52 = vand.u32 2147483648, %v1357_v32  ;;  %vm1363_vm10 = vweird.f32 %v1357_v32  ;;  %v1367_v61 = vand.u32 2147483647, %v1357_v32 }
0x1acd   :  { %v1370_v55 = vor.u32 1.1754944e-38, %v1369_v52  ;;  %vm1368_vm12 = vcmp.eq.f32.partialorder %v1367_v61, 8.507059e+37 }
0x1acf   :  { %1425 = vrot.lane.b32.xlu2 %v3783_v19, %s3575_s7 }
0x1ad1   :  { %v3194_v46 = vpop.eup %3193 }
0x1ad2   :  { %v1359_v47 = vmul.f32 %v3194_v46, %v1357_v32  ;;  %vm1364_vm9 = vweird.f32 %v3194_v46 }
0x1ad3   :  { %vm1365_vm11 = vmor %vm1363_vm10, %vm1364_vm9 }
0x1ad4   :  { %v1360_v48 = vsub.f32 1.0, %v1359_v47 }
0x1ad6   :  { %v1361_v49 = vmul.f32 %v3194_v46, %v1360_v48 }
0x1ad8   :  { %v1362_v50 = vadd.f32 %v3194_v46, %v1361_v49 }
0x1ada   :  { %v1366_v53 = vsel %vm1365_vm11, %v3194_v46, %v1362_v50 }
0x1adb   :  { %v1371_v19 = vsel %vm1368_vm12, %v1370_v55, %v1366_v53 }
0x1adc   :  { %v1377_v62 = vmul.f32 %v1375_v60, %v1371_v19 }
0x1b21   :  { %v1380_v56 = vpop.permute.xlu2 %1379 }
0x1b22   :  { %v1382_v57 = vmul.f32 %v1380_v56, %v1371_v19 }
0x1b24   :  { %1384 = vrot.lane.b32.xlu0 %v1382_v57, %s3574_s26 }
0x1b29   :  { %v1426_v59 = vpop.permute.xlu2 %1425 }
0x1b2a   :  { %1429 = vst.msk [vmem:[#allocation2] sm:$0xc] %vm1428_vm13, %v1426_v59 }
0x1b2c   :  { %1435 = vrot.lane.b32.xlu0 %v3796_v51, %s3575_s7 }
0x1b34   :  { %1430 = vrot.lane.b32.xlu0 %v1326_v40, %s3573_s9 }
0x1b96   :  { %v1385_v0 = vpop.permute.xlu0 %1384 }
0x1b97   :  { %v3975_v1 = vadd.f32 %v1385_v0, %v1377_v62 }
0x1b99   :  { %3195 = vtanh.f32 %v3975_v1 }
0x1b9e   :  { %v1436_v2 = vpop.permute.xlu0 %1435 }
0x1b9f   :  { %v3196_v3 = vpop.eup %3195  ;;  %1439 = vst.msk [vmem:[#allocation2] sm:$0x30] %vm1438_vm14, %v1436_v2 }
0x1ba0   :  { %1390 = vrot.lane.b32.xlu1 %v3196_v3, %s3566_s21 }
0x1ba6   :  { %v1431_v4 = vpop.permute.xlu0 %1430 }
0x1ba7   :  { %1434 = vst.msk [vmem:[#allocation2] sm:$0xc] %vm1433_vm15, %v1431_v4 }
0x1ba8   :  { %1445 = vrot.lane.b32.xlu1 %v3812_v18, %s3575_s7  ;;  %v1486_v18 = vld [vmem:[%s4468_s11 + $0x18] sm:$0xff] }
0x1ba9   :  { %1509 = vmatpush.msrb.mxu3 %v1486_v18 }
0x1bab   :  { %1510 = vmatpush.msrb.mxu3 %v1485_v9 }
0x1bad   :  { %1511 = vmatpush.msrb.mxu3 %v1484_v54 }
0x1baf   :  { %1512 = vmatpush.msrb.mxu3 %v1483_v14 }
0x1bb0   :  { %1440 = vrot.lane.b32.xlu1 %v3955_v63, %s3573_s9  ;;  %v1523_v63 = vld [vmem:[%s4471_s14 + $0x18] sm:$0xff] }
0x1bb1   :  { %1540 = vmatpush.msra.mxu0 %v1523_v63  ;;  %1851 = vmatpush.msra.mxu3 %v4017_v6 }
0x1bb3   :  { %1852 = vmatpush.msra.mxu3 %v4019_v21 }
0x1bb8   :  { %1602 = vrot.lane.b32.xlu1 %v1556_v12, %s3574_s26 }
0x1c12   :  { %v1391_v51 = vpop.permute.xlu1 %1390 }
0x1c13   :  { %v3985_v5 = vmul.f32 %v1391_v51, %v1371_v19 }
0x1c15   :  { %1420 = vrot.lane.b32.xlu2 %v3985_v5, %s3573_s9 }
0x1c1a   :  { %v1446_v25 = vpop.permute.xlu1 %1445 }
0x1c1b   :  { %1448 = vst.msk [vmem:[#allocation2] sm:$0xc0] %vm1398_vm2, %v1446_v25 }
0x1c1d   :  { %1449 = vrot.lane.b32.xlu2 %v3946_v24, %s3573_s9  ;;  %v1522_v24 = vld [vmem:[%s4471_s14 + $0x10] sm:$0xff] }
0x1c1e   :  { %1541 = vmatpush.msra.mxu0 %v1522_v24 }
0x1c20   :  { %1542 = vmatpush.msra.mxu0 %v1521_v29 }
0x1c22   :  { %v1441_v8 = vpop.permute.xlu1 %1440  ;;  %1543 = vmatpush.msra.mxu0 %v1520_v16 }
0x1c23   :  { %1444 = vst.msk [vmem:[#allocation2] sm:$0x30] %vm1443_vm3, %v1441_v8 }
0x1c24   :  { %1917 = vmatpush.msrb.mxu0 %v4017_v6 }
0x1c26   :  { %1918 = vmatpush.msrb.mxu0 %v4019_v21 }
0x1c2a   :  { %v1603_v52 = vpop.permute.xlu1 %1602 }
0x1c6f   :  { %v1421_v28 = vpop.permute.xlu2 %1420 }
0x1c70   :  { %1424 = vst.msk [vmem:[#allocation2] sm:$0x3] %vm1423_vm4, %v1421_v28 }
0x1c77   :  { %v1450_v30 = vpop.permute.xlu2 %1449 }
0x1c78   :  { %1453 = vst.msk [vmem:[#allocation2] sm:$0xc0] %vm1452_vm5, %v1450_v30 }
0x1c7f   :  { %v1481_v31 = vld [vmem:[#allocation2] sm:$0xff] }
0x1c80   :  { %3013 = vmatmul.msk.f32.vlgmr.msrb.gmra.mxu3 %vm173_vm1, %v1481_v31  ;;  %3015 = vmatmul.msk.f32.vlgmr.msra.gmra.mxu0 %vm173_vm1, %v1481_v31 }
0x1d03   :  { %v1514_v15 = vpop.f32.mrf.mxu3 }
0x1d04   :  { %v4050_v36 = vadd.f32 %v4047_v22, %v1514_v15 }
0x1d06   :  { %v1580_v37 = vadd.f32 %v1577_v35, %v4050_v36 }
0x1d08   :  { %3197 = vtanh.f32 %v1580_v37  ;;  %v3019_v39 = vmul.f32 -1.442695, %v1580_v37 }
0x1d0a   :  { %3199 = vpow2.f32 %v3019_v39 }
0x1d0e   :  { %v3198_v38 = vpop.eup %3197 }
0x1d0f   :  { %1607 = vrot.lane.b32.xlu0 %v3198_v38, %s3573_s9 }
0x1d10   :  { %v3200_v40 = vpop.eup %3199 }
0x1d11   :  { %v1584_v13 = vadd.f32 1.0, %v3200_v40 }
0x1d13   :  { %3201 = vrcp.f32 %v1584_v13  ;;  %v1596_v45 = vand.u32 2147483648, %v1584_v13  ;;  %vm1590_vm8 = vweird.f32 %v1584_v13  ;;  %v1594_v32 = vand.u32 2147483647, %v1584_v13 }
0x1d15   :  { %v1597_v47 = vor.u32 1.1754944e-38, %v1596_v45  ;;  %vm1595_vm10 = vcmp.eq.f32.partialorder %v1594_v32, 8.507059e+37 }
0x1d19   :  { %v3202_v41 = vpop.eup %3201 }
0x1d1a   :  { %v1586_v20 = vmul.f32 %v3202_v41, %v1584_v13  ;;  %vm1591_vm6 = vweird.f32 %v3202_v41 }
0x1d1b   :  { %vm1592_vm9 = vmor %vm1590_vm8, %vm1591_vm6 }
0x1d1c   :  { %v1587_v42 = vsub.f32 1.0, %v1586_v20 }
0x1d1e   :  { %v1588_v43 = vmul.f32 %v3202_v41, %v1587_v42 }
0x1d20   :  { %v1589_v44 = vadd.f32 %v3202_v41, %v1588_v43 }
0x1d22   :  { %v1593_v46 = vsel %vm1592_vm9, %v3202_v41, %v1589_v44 }
0x1d23   :  { %v1598_v48 = vsel %vm1595_vm10, %v1597_v47, %v1593_v46 }
0x1d24   :  { %v1605_v61 = vmul.f32 %v1603_v52, %v1598_v48 }
0x1d81   :  { %v1608_v49 = vpop.permute.xlu0 %1607 }
0x1d82   :  { %v1610_v50 = vmul.f32 %v1608_v49, %v1598_v48 }
0x1d84   :  { %1612 = vrot.lane.b32.xlu2 %v1610_v50, %s3574_s26  ;;  %v793_v50 = vrot.slane %v3927_v34, 2 }
0x1dde   :  { %v1613_v53 = vpop.permute.xlu2 %1612 }
0x1ddf   :  { %v1615_v55 = vadd.f32 %v1613_v53, %v1605_v61  ;;  %v795_v53 = vadd.f32 %v793_v50, %v3837_v26 }
0x1de1   :  { %3203 = vtanh.f32 %v1615_v55  ;;  %v1672_v23 = vrot.slane %v1615_v55, 6  ;;  %v2995_v26 = vmul.f32 -1.442695, %v795_v53 }
0x1de7   :  { %v3204_v56 = vpop.eup %3203 }
0x1de8   :  { %1618 = vrot.lane.b32.xlu0 %v3204_v56, %s3566_s21 }
0x1e5a   :  { %v1619_v19 = vpop.permute.xlu0 %1618 }
0x1e5b   :  { %v4056_v57 = vmul.f32 %v1619_v19, %v1598_v48 }
0x1e5d   :  { %1623 = vrot.lane.b32.xlu1 %v4056_v57, %s3575_s7 }
0x1ecf   :  { %v1624_v59 = vpop.permute.xlu1 %1623 }
0x1ed0   :  { %3020 = vmatmul.msk.f32.vlgmr.msrb.gmra.mxu2 %vm223_vm0, %v1624_v59 }
0x1ed1   :  { %2057 = vmatpush.msrb.mxu2 %v4017_v6 }
0x1ed3   :  { %2058 = vmatpush.msrb.mxu2 %v4019_v21 }
0x1f53   :  { %v1644_v60 = vpop.f32.mrf.mxu2 }
0x1f54   :  { %v1648_v62 = vrot.slane %v1644_v60, 6 }
0x1f56   :  { %v1650_v0 = vadd.f32 %v1648_v62, %v4050_v36 }
0x1f58   :  { %3205 = vtanh.f32 %v1650_v0  ;;  %v3021_v3 = vmul.f32 -1.442695, %v1650_v0 }
0x1f5a   :  { %3207 = vpow2.f32 %v3021_v3 }
0x1f5e   :  { %v3206_v2 = vpop.eup %3205 }
0x1f5f   :  { %1676 = vrot.lane.b32.xlu2 %v3206_v2, %s3573_s9 }
0x1f60   :  { %v3208_v4 = vpop.eup %3207 }
0x1f61   :  { %v1654_v51 = vadd.f32 1.0, %v3208_v4 }
0x1f63   :  { %3209 = vrcp.f32 %v1654_v51  ;;  %v1666_v24 = vand.u32 2147483648, %v1654_v51  ;;  %vm1660_vm12 = vweird.f32 %v1654_v51  ;;  %v1664_v54 = vand.u32 2147483647, %v1654_v51 }
0x1f65   :  { %v1667_v14 = vor.u32 1.1754944e-38, %v1666_v24  ;;  %vm1665_vm8 = vcmp.eq.f32.partialorder %v1664_v54, 8.507059e+37 }
0x1f69   :  { %v3210_v25 = vpop.eup %3209 }
0x1f6a   :  { %v1656_v8 = vmul.f32 %v3210_v25, %v1654_v51  ;;  %vm1661_vm11 = vweird.f32 %v3210_v25 }
0x1f6b   :  { %vm1662_vm6 = vmor %vm1660_vm12, %vm1661_vm11 }
0x1f6c   :  { %v1657_v18 = vsub.f32 1.0, %v1656_v8 }
0x1f6e   :  { %v1658_v63 = vmul.f32 %v3210_v25, %v1657_v18 }
0x1f70   :  { %v1659_v9 = vadd.f32 %v3210_v25, %v1658_v63 }
0x1f72   :  { %v1663_v29 = vsel %vm1662_vm6, %v3210_v25, %v1659_v9 }
0x1f73   :  { %v1668_v6 = vsel %vm1665_vm8, %v1667_v14, %v1663_v29 }
0x1f74   :  { %v1674_v12 = vmul.f32 %v1672_v23, %v1668_v6 }
0x1fb9   :  { %v1677_v16 = vpop.permute.xlu2 %1676 }
0x1fba   :  { %v1679_v21 = vmul.f32 %v1677_v16, %v1668_v6 }
0x1fbc   :  { %1681 = vrot.lane.b32.xlu0 %v1679_v21, %s3574_s26 }
0x202e   :  { %v1682_v28 = vpop.permute.xlu0 %1681 }
0x202f   :  { %v1684_v30 = vadd.f32 %v1682_v28, %v1674_v12 }
0x2031   :  { %3211 = vtanh.f32 %v1684_v30  ;;  %v1742_v60 = vrot.slane %v1684_v30, 6 }
0x2037   :  { %v3212_v31 = vpop.eup %3211 }
0x2038   :  { %1687 = vrot.lane.b32.xlu1 %v3212_v31, %s3566_s21 }
0x20aa   :  { %v1688_v15 = vpop.permute.xlu1 %1687 }
0x20ab   :  { %v1690_v35 = vmul.f32 %v1688_v15, %v1668_v6 }
0x20ad   :  { %v1692_v37 = vrot.slane %v1690_v35, 2  ;;  %2713 = vst [vmem:[#allocation1] sm:$0xff] %v1690_v35  ;;  %v817_v35 = vrot.slane %v3909_v10, 6 }
0x20af   :  { %1693 = vrot.lane.b32.xlu2 %v1692_v37, %s3575_s7 }
0x2109   :  { %v1694_v38 = vpop.permute.xlu2 %1693 }
0x210a   :  { %3022 = vmatmul.msk.f32.vlgmr.msra.gmra.mxu1 %vm223_vm0, %v1694_v38 }
0x2187   :  { %v1714_v39 = vpop.f32.mrf.mxu1 }
0x2188   :  { %v1718_v40 = vrot.slane %v1714_v39, 4 }
0x218a   :  { %v1720_v13 = vadd.f32 %v1718_v40, %v4050_v36 }
0x218c   :  { %3213 = vtanh.f32 %v1720_v13  ;;  %v3023_v20 = vmul.f32 -1.442695, %v1720_v13 }
0x218e   :  { %3215 = vpow2.f32 %v3023_v20 }
0x2192   :  { %v3214_v41 = vpop.eup %3213 }
0x2193   :  { %1746 = vrot.lane.b32.xlu0 %v3214_v41, %s3573_s9 }
0x2194   :  { %v3216_v42 = vpop.eup %3215 }
0x2195   :  { %v1724_v43 = vadd.f32 1.0, %v3216_v42 }
0x2197   :  { %3217 = vrcp.f32 %v1724_v43  ;;  %v1736_v48 = vand.u32 2147483648, %v1724_v43  ;;  %vm1730_vm10 = vweird.f32 %v1724_v43  ;;  %v1734_v49 = vand.u32 2147483647, %v1724_v43 }
0x2198   :  { %3219 = vtanh.f32 %v795_v53 }
0x2199   :  { %v1737_v61 = vor.u32 1.1754944e-38, %v1736_v48  ;;  %vm1735_vm12 = vcmp.eq.f32.partialorder %v1734_v49, 8.507059e+37 }
0x219d   :  { %v3218_v44 = vpop.eup %3217 }
0x219e   :  { %v1726_v45 = vmul.f32 %v3218_v44, %v1724_v43  ;;  %vm1731_vm9 = vweird.f32 %v3218_v44  ;;  %v3220_v59 = vpop.eup %3219 }
0x219f   :  { %vm1732_vm11 = vmor %vm1730_vm10, %vm1731_vm9 }
0x21a0   :  { %v1727_v32 = vsub.f32 1.0, %v1726_v45 }
0x21a2   :  { %v1728_v46 = vmul.f32 %v3218_v44, %v1727_v32 }
0x21a4   :  { %v1729_v47 = vadd.f32 %v3218_v44, %v1728_v46 }
0x21a6   :  { %v1733_v52 = vsel %vm1732_vm11, %v3218_v44, %v1729_v47 }
0x21a7   :  { %v1738_v56 = vsel %vm1735_vm12, %v1737_v61, %v1733_v52 }
0x21a8   :  { %v1744_v62 = vmul.f32 %v1742_v60, %v1738_v56 }
0x2205   :  { %v1747_v55 = vpop.permute.xlu0 %1746 }
0x2206   :  { %v1749_v19 = vmul.f32 %v1747_v55, %v1738_v56 }
0x2208   :  { %1751 = vrot.lane.b32.xlu1 %v1749_v19, %s3574_s26 }
0x2210   :  { %821 = vrot.lane.b32.xlu1 %v3220_v59, %s3573_s9 }
0x227a   :  { %v1752_v0 = vpop.permute.xlu1 %1751 }
0x227b   :  { %v4075_v2 = vadd.f32 %v1752_v0, %v1744_v62 }
0x227d   :  { %3221 = vtanh.f32 %v4075_v2  ;;  %v1812_v55 = vrot.slane %v4075_v2, 6 }
0x227e   :  { %3223 = vpow2.f32 %v2995_v26 }
0x2282   :  { %v822_v21 = vpop.permute.xlu1 %821 }
0x2283   :  { %v3222_v34 = vpop.eup %3221 }
0x2284   :  { %1757 = vrot.lane.b32.xlu2 %v3222_v34, %s3566_s21  ;;  %v3224_v3 = vpop.eup %3223 }
0x2285   :  { %v799_v4 = vadd.f32 1.0, %v3224_v3 }
0x2287   :  { %3225 = vrcp.f32 %v799_v4  ;;  %v811_v29 = vand.u32 2147483648, %v799_v4  ;;  %vm805_vm8 = vweird.f32 %v799_v4  ;;  %v809_v14 = vand.u32 2147483647, %v799_v4 }
0x2289   :  { %v812_v6 = vor.u32 1.1754944e-38, %v811_v29  ;;  %vm810_vm10 = vcmp.eq.f32.partialorder %v809_v14, 8.507059e+37  ;;  %v4150_v14 = vld [vmem:[#allocation12] ss:$0 sm:$0xff] }
0x228d   :  { %v3226_v51 = vpop.eup %3225 }
0x228e   :  { %v801_v25 = vmul.f32 %v3226_v51, %v799_v4  ;;  %vm806_vm6 = vweird.f32 %v3226_v51  ;;  %v4125_v4 = vld [vmem:[#allocation11 + $0x8] sm:$0xff] }
0x228f   :  { %vm807_vm9 = vmor %vm805_vm8, %vm806_vm6  ;;  %2130 = vmatpush.msrb.mxu3 %v4125_v4  ;;  %2202 = vmatpush.msra.mxu0 %v4125_v4 }
0x2290   :  { %v802_v8 = vsub.f32 1.0, %v801_v25  ;;  %2272 = vmatpush.msra.mxu1 %v4125_v4  ;;  %v3034_v25 = vld [vmem:[%s4488_s22 + $0x6] sm:$0x3]  ;;  %s3576_s22 = smov 112  }
0x2292   :  { %v803_v18 = vmul.f32 %v3226_v51, %v802_v8 }
0x2294   :  { %v804_v24 = vadd.f32 %v3226_v51, %v803_v18  ;;  %v4144_v18 = vpop.f32.mrf.mxu0 }
0x2296   :  { %v808_v16 = vsel %vm807_vm9, %v3226_v51, %v804_v24 }
0x2297   :  { %v813_v23 = vsel %vm810_vm10, %v812_v6, %v808_v16 }
0x2298   :  { %v824_v12 = vmul.f32 %v822_v21, %v813_v23  ;;  %v819_v38 = vmul.f32 %v817_v35, %v813_v23 }
0x22de   :  { %v1758_v63 = vpop.permute.xlu2 %1757 }
0x22df   :  { %v4079_v9 = vmul.f32 %v1758_v63, %v1738_v56 }
0x22e1   :  { %v1762_v54 = vrot.slane %v4079_v9, 4 }
0x22e3   :  { %1763 = vrot.lane.b32.xlu0 %v1762_v54, %s3575_s7 }
0x22eb   :  { %826 = vrot.lane.b32.xlu0 %v824_v12, %s3574_s26 }
0x2355   :  { %v1764_v28 = vpop.permute.xlu0 %1763 }
0x2356   :  { %3024 = vmatmul.msk.f32.vlgmr.msra.gmra.mxu2 %vm223_vm0, %v1764_v28  ;;  %v2112_v28 = vld [vmem:[#allocation3 + $0x6] sm:$0x3] }
0x2357   :  { %2342 = vmatpush.msra.mxu2 %v4125_v4 }
0x235d   :  { %v827_v37 = vpop.permute.xlu0 %826 }
0x235e   :  { %v4087_v39 = vadd.f32 %v827_v37, %v819_v38 }
0x23d9   :  { %v1784_v30 = vpop.f32.mrf.mxu2 }
0x23da   :  { %v1788_v31 = vrot.slane %v1784_v30, 2 }
0x23dc   :  { %v1790_v15 = vadd.f32 %v1788_v31, %v4050_v36 }
0x23de   :  { %3227 = vtanh.f32 %v1790_v15  ;;  %v3025_v10 = vmul.f32 -1.442695, %v1790_v15 }
0x23df   :  { %3229 = vtanh.f32 %v4087_v39 }
0x23e0   :  { %3231 = vpow2.f32 %v3025_v10 }
0x23e4   :  { %v3228_v40 = vpop.eup %3227 }
0x23e5   :  { %1816 = vrot.lane.b32.xlu2 %v3228_v40, %s3573_s9  ;;  %v3230_v13 = vpop.eup %3229 }
0x23e6   :  { %v3232_v36 = vpop.eup %3231 }
0x23e7   :  { %v1794_v41 = vadd.f32 1.0, %v3232_v36 }
0x23e9   :  { %3233 = vrcp.f32 %v1794_v41  ;;  %v1806_v32 = vand.u32 2147483648, %v1794_v41  ;;  %vm1800_vm12 = vweird.f32 %v1794_v41  ;;  %v1804_v46 = vand.u32 2147483647, %v1794_v41 }
0x23eb   :  { %vm1805_vm8 = vcmp.eq.f32.partialorder %v1804_v46, 8.507059e+37 }
0x23ed   :  { %832 = vrot.lane.b32.xlu2 %v3230_v13, %s3566_s21 }
0x23ef   :  { %v3234_v20 = vpop.eup %3233 }
0x23f0   :  { %v1796_v42 = vmul.f32 %v3234_v20, %v1794_v41  ;;  %vm1801_vm11 = vweird.f32 %v3234_v20 }
0x23f1   :  { %vm1802_vm6 = vmor %vm1800_vm12, %vm1801_vm11 }
0x23f2   :  { %v1797_v43 = vsub.f32 1.0, %v1796_v42 }
0x23f4   :  { %v1798_v44 = vmul.f32 %v3234_v20, %v1797_v43 }
0x23f5   :  { %1460 = vrot.lane.b32.xlu2 %v3890_v17, %s3575_s7  ;;  %v1807_v17 = vor.u32 1.1754944e-38, %v1806_v32 }
0x23f6   :  { %v1799_v45 = vadd.f32 %v3234_v20, %v1798_v44 }
0x23f8   :  { %v1803_v47 = vsel %vm1802_vm6, %v3234_v20, %v1799_v45 }
0x23fd   :  { %1464 = vrot.lane.b32.xlu2 %v3919_v33, %s3573_s9  ;;  %v1808_v33 = vsel %vm1805_vm8, %v1807_v17, %v1803_v47 }
0x23fe   :  { %v1814_v56 = vmul.f32 %v1812_v55, %v1808_v33 }
0x243f   :  { %v1817_v48 = vpop.permute.xlu2 %1816 }
0x2440   :  { %v1819_v49 = vmul.f32 %v1817_v48, %v1808_v33 }
0x2442   :  { %1821 = vrot.lane.b32.xlu1 %v1819_v49, %s3574_s26 }
0x2447   :  { %v833_v50 = vpop.permute.xlu2 %832 }
0x2448   :  { %v835_v52 = vmul.f32 %v833_v50, %v813_v23 }
0x244a   :  { %1395 = vrot.lane.b32.xlu1 %v835_v52, %s3575_s7 }
0x244f   :  { %v1461_v61 = vpop.permute.xlu2 %1460 }
0x2450   :  { %1463 = vst.msk [vmem:[#allocation2 + $0x8] sm:$0xc] %vm1428_vm13, %v1461_v61 }
0x2452   :  { %1456 = vrot.lane.b32.xlu1 %v3933_v58, %s3573_s9 }
0x2457   :  { %v1465_v53 = vpop.permute.xlu2 %1464 }
0x2458   :  { %1467 = vst.msk [vmem:[#allocation2 + $0x8] sm:$0xc] %vm1433_vm15, %v1465_v53 }
0x245a   :  { %1477 = vrot.lane.b32.xlu1 %v3865_v11, %s3573_s9 }
0x24b4   :  { %v1822_v19 = vpop.permute.xlu1 %1821 }
0x24b5   :  { %v4105_v59 = vadd.f32 %v1822_v19, %v1814_v56 }
0x24b7   :  { %3235 = vtanh.f32 %v4105_v59 }
0x24bc   :  { %v1396_v60 = vpop.permute.xlu1 %1395 }
0x24bd   :  { %v3236_v62 = vpop.eup %3235  ;;  %1399 = vst.msk [vmem:[#allocation15 - $0x6] sm:$0xc0] %vm1398_vm2, %v1396_v60 }
0x24be   :  { %1476 = vst.msk [vmem:[#allocation2 + $0x8] sm:$0xc0] %vm1398_vm2, %v1396_v60  ;;  %1827 = vrot.lane.b32.xlu0 %v3236_v62, %s3566_s21  ;;  %v1879_v62 = vrot.slane %v4105_v59, 6 }
0x24c4   :  { %v1457_v58 = vpop.permute.xlu1 %1456 }
0x24c5   :  { %1459 = vst.msk [vmem:[#allocation2 + $0x8] sm:$0x3] %vm1423_vm4, %v1457_v58 }
0x24c6   :  { %1468 = vrot.lane.b32.xlu0 %v3915_v7, %s3575_s7 }
0x24cc   :  { %v1478_v11 = vpop.permute.xlu1 %1477 }
0x24cd   :  { %1480 = vst.msk [vmem:[#allocation2 + $0x8] sm:$0xc0] %vm1452_vm5, %v1478_v11 }
0x24ce   :  { %1472 = vrot.lane.b32.xlu0 %v3894_v27, %s3573_s9  ;;  %v4127_v27 = vld [vmem:[#allocation11] sm:$0xff] }
0x24cf   :  { %2131 = vmatpush.msrb.mxu3 %v4127_v27  ;;  %2203 = vmatpush.msra.mxu0 %v4127_v27 }
0x24d0   :  { %2273 = vmatpush.msra.mxu1 %v4127_v27  ;;  %2343 = vmatpush.msra.mxu2 %v4127_v27 }
0x2530   :  { %v1828_v0 = vpop.permute.xlu0 %1827 }
0x2531   :  { %v4117_v2 = vmul.f32 %v1828_v0, %v1808_v33 }
0x2533   :  { %v1832_v34 = vrot.slane %v4117_v2, 6 }
0x2535   :  { %1833 = vrot.lane.b32.xlu2 %v1832_v34, %s3575_s7 }
0x2538   :  { %v1469_v26 = vpop.permute.xlu0 %1468 }
0x2539   :  { %1471 = vst.msk [vmem:[#allocation2 + $0x8] sm:$0x30] %vm1438_vm14, %v1469_v26 }
0x2540   :  { %v1473_v3 = vpop.permute.xlu0 %1472 }
0x2541   :  { %1475 = vst.msk [vmem:[#allocation2 + $0x8] sm:$0x30] %vm1443_vm3, %v1473_v3 }
0x2548   :  { %v1482_v7 = vld [vmem:[#allocation2 + $0x8] sm:$0xff] }
0x2549   :  { %3014 = vmatmul.msk.f32.gmra.mxu3 %vm173_vm1, %v1482_v7  ;;  %3016 = vmatmul.msk.f32.gmra.mxu0 %vm173_vm1, %v1482_v7 }
0x258f   :  { %v1834_v51 = vpop.permute.xlu2 %1833 }
0x2590   :  { %3026 = vmatmul.msk.f32.vlgmr.msra.gmra.mxu3 %vm223_vm0, %v1834_v51 }
0x2591   :  { %2408 = vmatpush.msra.mxu3 %v4125_v4 }
0x2593   :  { %2409 = vmatpush.msra.mxu3 %v4127_v27 }
0x2598   :  { %3035 = vmatmul.msk.f32.vlgmr.msrb.gmra.mxu3 %vm223_vm0, %v3034_v25 }
0x25c6   :  { %v1548_v29 = vpop.f32.mrf.mxu0 }
0x25c7   :  { %v4153_v21 = vadd.f32 %v4150_v14, %v1548_v29 }
0x25cc   :  { %v1517_v8 = vpop.f32.mrf.mxu3 }
0x25cd   :  { %v4147_v63 = vadd.f32 %v4047_v22, %v1517_v8  ;;  %v2161_v22 = vrot.slane %v2112_v28, 2 }
0x2613   :  { %v1854_v24 = vpop.f32.mrf.mxu3 }
0x2614   :  { %v1857_v54 = vadd.f32 %v1854_v24, %v4147_v63 }
0x2616   :  { %3237 = vtanh.f32 %v1857_v54  ;;  %v3027_v31 = vmul.f32 -1.442695, %v1857_v54 }
0x261b   :  { %v2133_v16 = vpop.f32.mrf.mxu3 }
0x261c   :  { %v3238_v6 = vpop.eup %3237  ;;  %v2137_v23 = vrot.slane %v2133_v16, 2 }
0x261d   :  { %1883 = vrot.lane.b32.xlu0 %v3238_v6, %s3573_s9 }
0x261e   :  { %v2139_v12 = vadd.f32 %v2137_v23, %v4153_v21 }
0x2620   :  { %3239 = vtanh.f32 %v2139_v12  ;;  %v3036_v35 = vmul.f32 -1.442695, %v2139_v12 }
0x2621   :  { %3241 = vpow2.f32 %v3027_v31 }
0x2622   :  { %3243 = vpow2.f32 %v3036_v35 }
0x2625   :  { %2162 = vrot.lane.b32.xlu0 %v2161_v22, %s3574_s26 }
0x2626   :  { %v3240_v30 = vpop.eup %3239 }
0x2627   :  { %2167 = vrot.lane.b32.xlu1 %v3240_v30, %s3573_s9  ;;  %v3242_v15 = vpop.eup %3241 }
0x2628   :  { %v1861_v37 = vadd.f32 1.0, %v3242_v15  ;;  %v3244_v38 = vpop.eup %3243 }
0x2629   :  { %v2143_v13 = vadd.f32 1.0, %v3244_v38 }
0x262a   :  { %3245 = vrcp.f32 %v1861_v37  ;;  %v1873_v44 = vand.u32 2147483648, %v1861_v37  ;;  %vm1867_vm13 = vweird.f32 %v1861_v37  ;;  %v1871_v45 = vand.u32 2147483647, %v1861_v37 }
0x262b   :  { %3247 = vrcp.f32 %v2143_v13  ;;  %v2155_v52 = vand.u32 2147483648, %v2143_v13  ;;  %vm2149_vm4 = vweird.f32 %v2143_v13  ;;  %v2153_v61 = vand.u32 2147483647, %v2143_v13 }
0x262c   :  { %v1874_v47 = vor.u32 1.1754944e-38, %v1873_v44  ;;  %vm1872_vm15 = vcmp.eq.f32.partialorder %v1871_v45, 8.507059e+37 }
0x262d   :  { %v2156_v55 = vor.u32 1.1754944e-38, %v2155_v52  ;;  %vm2154_vm9 = vcmp.eq.f32.partialorder %v2153_v61, 8.507059e+37 }
0x2630   :  { %v3246_v40 = vpop.eup %3245 }
0x2631   :  { %v1863_v10 = vmul.f32 %v3246_v40, %v1861_v37  ;;  %v3248_v41 = vpop.eup %3247  ;;  %vm1868_vm1 = vweird.f32 %v3246_v40 }
0x2632   :  { %v2145_v42 = vmul.f32 %v3248_v41, %v2143_v13  ;;  %vm1869_vm14 = vmor %vm1867_vm13, %vm1868_vm1  ;;  %vm2150_vm3 = vweird.f32 %v3248_v41 }
0x2633   :  { %v1864_v36 = vsub.f32 1.0, %v1863_v10  ;;  %vm2151_vm5 = vmor %vm2149_vm4, %vm2150_vm3 }
0x2634   :  { %v2146_v32 = vsub.f32 1.0, %v2145_v42 }
0x2635   :  { %v1865_v20 = vmul.f32 %v3246_v40, %v1864_v36 }
0x2636   :  { %v2147_v17 = vmul.f32 %v3248_v41, %v2146_v32 }
0x2637   :  { %v1866_v43 = vadd.f32 %v3246_v40, %v1865_v20 }
0x2638   :  { %v2148_v50 = vadd.f32 %v3248_v41, %v2147_v17 }
0x2639   :  { %v1870_v46 = vsel %vm1869_vm14, %v3246_v40, %v1866_v43 }
0x263a   :  { %v1875_v33 = vsel %vm1872_vm15, %v1874_v47, %v1870_v46  ;;  %v2152_v53 = vsel %vm2151_vm5, %v3248_v41, %v2148_v50 }
0x263b   :  { %v2157_v56 = vsel %vm2154_vm9, %v2156_v55, %v2152_v53  ;;  %v1881_v58 = vmul.f32 %v1879_v62, %v1875_v33 }
0x268f   :  { %v1884_v48 = vpop.permute.xlu0 %1883 }
0x2690   :  { %v1886_v49 = vmul.f32 %v1884_v48, %v1875_v33 }
0x2692   :  { %1888 = vrot.lane.b32.xlu2 %v1886_v49, %s3574_s26 }
0x2697   :  { %v2163_v26 = vpop.permute.xlu0 %2162 }
0x2698   :  { %v2165_v3 = vmul.f32 %v2163_v26, %v2157_v56 }
0x2699   :  { %v2168_v19 = vpop.permute.xlu1 %2167 }
0x269a   :  { %v2170_v60 = vmul.f32 %v2168_v19, %v2157_v56 }
0x269c   :  { %2172 = vrot.lane.b32.xlu1 %v2170_v60, %s3574_s26 }
0x26ec   :  { %v1889_v11 = vpop.permute.xlu2 %1888 }
0x26ed   :  { %v4162_v0 = vadd.f32 %v1889_v11, %v1881_v58 }
0x26ef   :  { %3249 = vtanh.f32 %v4162_v0 }
0x26f5   :  { %v3250_v34 = vpop.eup %3249 }
0x26f6   :  { %1894 = vrot.lane.b32.xlu2 %v3250_v34, %s3566_s21  ;;  %v1948_v34 = vrot.slane %v4162_v0, 6 }
0x270e   :  { %v2173_v7 = vpop.permute.xlu1 %2172 }
0x270f   :  { %v4166_v51 = vadd.f32 %v2173_v7, %v2165_v3 }
0x2711   :  { %3251 = vtanh.f32 %v4166_v51 }
0x2717   :  { %v3252_v25 = vpop.eup %3251 }
0x2718   :  { %2178 = vrot.lane.b32.xlu0 %v3252_v25, %s3566_s21 }
0x2750   :  { %v1895_v59 = vpop.permute.xlu2 %1894 }
0x2751   :  { %v4170_v8 = vmul.f32 %v1895_v59, %v1875_v33  ;;  %v2233_v59 = vrot.slane %v4166_v51, 2 }
0x2753   :  { %1899 = vrot.lane.b32.xlu1 %v4170_v8, %s3575_s7 }
0x278a   :  { %v2179_v24 = vpop.permute.xlu0 %2178 }
0x278b   :  { %v4174_v54 = vmul.f32 %v2179_v24, %v2157_v56 }
0x278d   :  { %v2183_v29 = vrot.slane %v4174_v54, 6 }
0x278f   :  { %2184 = vrot.lane.b32.xlu2 %v2183_v29, %s3575_s7 }
0x27c5   :  { %v1900_v16 = vpop.permute.xlu1 %1899 }
0x27c6   :  { %3028 = vmatmul.msk.f32.vlgmr.msrb.gmra.mxu0 %vm223_vm0, %v1900_v16 }
0x27c7   :  { %2478 = vmatpush.msrb.mxu0 %v4125_v4 }
0x27c9   :  { %2479 = vmatpush.msrb.mxu0 %v4127_v27 }
0x27e9   :  { %v2185_v6 = vpop.permute.xlu2 %2184 }
0x27ea   :  { %3037 = vmatmul.msk.f32.vlgmr.msra.gmra.mxu0 %vm223_vm0, %v2185_v6 }
0x2843   :  { %v1920_v23 = vpop.f32.mrf.mxu0 }
0x2844   :  { %v1924_v12 = vrot.slane %v1920_v23, 6 }
0x2846   :  { %v1926_v28 = vadd.f32 %v1924_v12, %v4147_v63 }
0x2848   :  { %3253 = vtanh.f32 %v1926_v28  ;;  %v3029_v37 = vmul.f32 -1.442695, %v1926_v28 }
0x284e   :  { %v3254_v22 = vpop.eup %3253 }
0x284f   :  { %1952 = vrot.lane.b32.xlu0 %v3254_v22, %s3573_s9 }
0x2867   :  { %v2205_v30 = vpop.f32.mrf.mxu0 }
0x2868   :  { %v2209_v31 = vrot.slane %v2205_v30, 4 }
0x286a   :  { %v2211_v15 = vadd.f32 %v2209_v31, %v4153_v21 }
0x286c   :  { %3255 = vtanh.f32 %v2211_v15  ;;  %v3038_v20 = vmul.f32 -1.442695, %v2211_v15 }
0x286d   :  { %3257 = vpow2.f32 %v3029_v37 }
0x2872   :  { %v3256_v35 = vpop.eup %3255 }
0x2873   :  { %2237 = vrot.lane.b32.xlu1 %v3256_v35, %s3573_s9  ;;  %v3258_v38 = vpop.eup %3257 }
0x2874   :  { %v1930_v40 = vadd.f32 1.0, %v3258_v38 }
0x2876   :  { %3259 = vrcp.f32 %v1930_v40  ;;  %v1942_v43 = vand.u32 2147483648, %v1930_v40  ;;  %vm1936_vm11 = vweird.f32 %v1930_v40  ;;  %v1940_v44 = vand.u32 2147483647, %v1930_v40 }
0x2877   :  { %3261 = vpow2.f32 %v3038_v20 }
0x2878   :  { %v1943_v32 = vor.u32 1.1754944e-38, %v1942_v43  ;;  %vm1941_vm6 = vcmp.eq.f32.partialorder %v1940_v44, 8.507059e+37 }
0x287c   :  { %v3260_v13 = vpop.eup %3259 }
0x287d   :  { %v1932_v10 = vmul.f32 %v3260_v13, %v1930_v40  ;;  %vm1937_vm10 = vweird.f32 %v3260_v13  ;;  %v3262_v17 = vpop.eup %3261 }
0x287e   :  { %vm1938_vm12 = vmor %vm1936_vm11, %vm1937_vm10  ;;  %v2215_v33 = vadd.f32 1.0, %v3262_v17 }
0x287f   :  { %v1933_v36 = vsub.f32 1.0, %v1932_v10 }
0x2880   :  { %3263 = vrcp.f32 %v2215_v33  ;;  %v2227_v55 = vand.u32 2147483648, %v2215_v33  ;;  %vm2221_vm1 = vweird.f32 %v2215_v33  ;;  %v2225_v56 = vand.u32 2147483647, %v2215_v33 }
0x2881   :  { %v1934_v41 = vmul.f32 %v3260_v13, %v1933_v36 }
0x2882   :  { %v2228_v60 = vor.u32 1.1754944e-38, %v2227_v55  ;;  %vm2226_vm14 = vcmp.eq.f32.partialorder %v2225_v56, 8.507059e+37 }
0x2883   :  { %v1935_v42 = vadd.f32 %v3260_v13, %v1934_v41 }
0x2885   :  { %v1939_v45 = vsel %vm1938_vm12, %v3260_v13, %v1935_v42 }
0x2886   :  { %v1944_v47 = vsel %vm1941_vm6, %v1943_v32, %v1939_v45  ;;  %v3264_v49 = vpop.eup %3263 }
0x2887   :  { %v2217_v50 = vmul.f32 %v3264_v49, %v2215_v33  ;;  %vm2222_vm8 = vweird.f32 %v3264_v49  ;;  %v1950_v26 = vmul.f32 %v1948_v34, %v1944_v47 }
0x2888   :  { %vm2223_vm13 = vmor %vm2221_vm1, %vm2222_vm8 }
0x2889   :  { %v2218_v52 = vsub.f32 1.0, %v2217_v50 }
0x288b   :  { %v2219_v61 = vmul.f32 %v3264_v49, %v2218_v52 }
0x288d   :  { %v2220_v53 = vadd.f32 %v3264_v49, %v2219_v61 }
0x288f   :  { %v2224_v19 = vsel %vm2223_vm13, %v3264_v49, %v2220_v53 }
0x2890   :  { %v2229_v58 = vsel %vm2226_vm14, %v2228_v60, %v2224_v19 }
0x2891   :  { %v2235_v24 = vmul.f32 %v2233_v59, %v2229_v58 }
0x28c1   :  { %v1953_v46 = vpop.permute.xlu0 %1952 }
0x28c2   :  { %v1955_v48 = vmul.f32 %v1953_v46, %v1944_v47 }
0x28c4   :  { %1957 = vrot.lane.b32.xlu2 %v1955_v48, %s3574_s26 }
0x28e5   :  { %v2238_v62 = vpop.permute.xlu1 %2237 }
0x28e6   :  { %v2240_v11 = vmul.f32 %v2238_v62, %v2229_v58 }
0x28e8   :  { %2242 = vrot.lane.b32.xlu0 %v2240_v11, %s3574_s26 }
0x291e   :  { %v1958_v3 = vpop.permute.xlu2 %1957 }
0x291f   :  { %v4189_v7 = vadd.f32 %v1958_v3, %v1950_v26 }
0x2921   :  { %3265 = vtanh.f32 %v4189_v7 }
0x2927   :  { %v3266_v25 = vpop.eup %3265 }
0x2928   :  { %1963 = vrot.lane.b32.xlu1 %v3266_v25, %s3566_s21 }
0x295a   :  { %v2243_v29 = vpop.permute.xlu0 %2242 }
0x295b   :  { %v4194_v16 = vadd.f32 %v2243_v29, %v2235_v24  ;;  %v2018_v29 = vrot.slane %v4189_v7, 6 }
0x295d   :  { %3267 = vtanh.f32 %v4194_v16 }
0x2963   :  { %v3268_v6 = vpop.eup %3267 }
0x2964   :  { %2248 = vrot.lane.b32.xlu2 %v3268_v6, %s3566_s21 }
0x299a   :  { %v1964_v0 = vpop.permute.xlu1 %1963 }
0x299b   :  { %v4198_v23 = vmul.f32 %v1964_v0, %v1944_v47 }
0x299d   :  { %v1968_v12 = vrot.slane %v4198_v23, 2 }
0x299f   :  { %1969 = vrot.lane.b32.xlu0 %v1968_v12, %s3575_s7 }
0x29be   :  { %v2249_v28 = vpop.permute.xlu2 %2248 }
0x29bf   :  { %v4202_v22 = vmul.f32 %v2249_v28, %v2229_v58 }
0x29c1   :  { %v2253_v51 = vrot.slane %v4202_v22, 4 }
0x29c3   :  { %2254 = vrot.lane.b32.xlu1 %v2253_v51, %s3575_s7  ;;  %v2303_v51 = vrot.slane %v4194_v16, 2 }
0x2a11   :  { %v1970_v30 = vpop.permute.xlu0 %1969 }
0x2a12   :  { %3030 = vmatmul.msk.f32.vlgmr.msrb.gmra.mxu1 %vm223_vm0, %v1970_v30 }
0x2a13   :  { %2548 = vmatpush.msrb.mxu1 %v4125_v4 }
0x2a15   :  { %2549 = vmatpush.msrb.mxu1 %v4127_v27 }
0x2a35   :  { %v2255_v31 = vpop.permute.xlu1 %2254 }
0x2a36   :  { %3039 = vmatmul.msk.f32.vlgmr.msra.gmra.mxu1 %vm223_vm0, %v2255_v31 }
0x2a8f   :  { %v1990_v15 = vpop.f32.mrf.mxu1 }
0x2a90   :  { %v1994_v35 = vrot.slane %v1990_v15, 4 }
0x2a92   :  { %v1996_v37 = vadd.f32 %v1994_v35, %v4147_v63 }
0x2a94   :  { %3269 = vtanh.f32 %v1996_v37  ;;  %v3031_v41 = vmul.f32 -1.442695, %v1996_v37 }
0x2a9a   :  { %v3270_v38 = vpop.eup %3269 }
0x2a9b   :  { %2022 = vrot.lane.b32.xlu2 %v3270_v38, %s3573_s9 }
0x2ab3   :  { %v2275_v40 = vpop.f32.mrf.mxu1 }
0x2ab4   :  { %v2279_v13 = vrot.slane %v2275_v40, 6 }
0x2ab6   :  { %v2281_v10 = vadd.f32 %v2279_v13, %v4153_v21 }
0x2ab8   :  { %3271 = vtanh.f32 %v2281_v10  ;;  %v3040_v61 = vmul.f32 -1.442695, %v2281_v10 }
0x2ab9   :  { %3273 = vpow2.f32 %v3031_v41 }
0x2abe   :  { %v3272_v36 = vpop.eup %3271 }
0x2abf   :  { %2307 = vrot.lane.b32.xlu0 %v3272_v36, %s3573_s9  ;;  %v3274_v20 = vpop.eup %3273 }
0x2ac0   :  { %v2000_v42 = vadd.f32 1.0, %v3274_v20 }
0x2ac2   :  { %3275 = vrcp.f32 %v2000_v42  ;;  %v2012_v47 = vand.u32 2147483648, %v2000_v42  ;;  %vm2006_vm3 = vweird.f32 %v2000_v42  ;;  %v2010_v17 = vand.u32 2147483647, %v2000_v42 }
0x2ac3   :  { %3277 = vpow2.f32 %v3040_v61 }
0x2ac4   :  { %v2013_v33 = vor.u32 1.1754944e-38, %v2012_v47  ;;  %vm2011_vm5 = vcmp.eq.f32.partialorder %v2010_v17, 8.507059e+37 }
0x2ac8   :  { %v3276_v43 = vpop.eup %3275 }
0x2ac9   :  { %v2002_v44 = vmul.f32 %v3276_v43, %v2000_v42  ;;  %vm2007_vm15 = vweird.f32 %v3276_v43  ;;  %v3278_v53 = vpop.eup %3277 }
0x2aca   :  { %vm2008_vm4 = vmor %vm2006_vm3, %vm2007_vm15  ;;  %v2285_v55 = vadd.f32 1.0, %v3278_v53 }
0x2acb   :  { %v2003_v45 = vsub.f32 1.0, %v2002_v44 }
0x2acc   :  { %3279 = vrcp.f32 %v2285_v55  ;;  %v2297_v11 = vand.u32 2147483648, %v2285_v55  ;;  %vm2291_vm10 = vweird.f32 %v2285_v55  ;;  %v2295_v34 = vand.u32 2147483647, %v2285_v55 }
0x2acd   :  { %v2004_v32 = vmul.f32 %v3276_v43, %v2003_v45 }
0x2ace   :  { %v2298_v3 = vor.u32 1.1754944e-38, %v2297_v11  ;;  %vm2296_vm12 = vcmp.eq.f32.partialorder %v2295_v34, 8.507059e+37 }
0x2acf   :  { %v2005_v46 = vadd.f32 %v3276_v43, %v2004_v32 }
0x2ad1   :  { %v2009_v48 = vsel %vm2008_vm4, %v3276_v43, %v2005_v46 }
0x2ad2   :  { %v2014_v49 = vsel %vm2011_vm5, %v2013_v33, %v2009_v48  ;;  %v3280_v56 = vpop.eup %3279 }
0x2ad3   :  { %v2287_v19 = vmul.f32 %v3280_v56, %v2285_v55  ;;  %vm2292_vm9 = vweird.f32 %v3280_v56  ;;  %v2020_v6 = vmul.f32 %v2018_v29, %v2014_v49 }
0x2ad4   :  { %vm2293_vm11 = vmor %vm2291_vm10, %vm2292_vm9 }
0x2ad5   :  { %v2288_v60 = vsub.f32 1.0, %v2287_v19 }
0x2ad7   :  { %v2289_v62 = vmul.f32 %v3280_v56, %v2288_v60 }
0x2ad9   :  { %v2290_v58 = vadd.f32 %v3280_v56, %v2289_v62 }
0x2adb   :  { %v2294_v26 = vsel %vm2293_vm11, %v3280_v56, %v2290_v58 }
0x2adc   :  { %v2299_v59 = vsel %vm2296_vm12, %v2298_v3, %v2294_v26  ;;  %v4248_v26 = vadd.f32 %v4150_v14, %v4144_v18 }
0x2add   :  { %v2305_v30 = vmul.f32 %v2303_v51, %v2299_v59 }
0x2af5   :  { %v2023_v50 = vpop.permute.xlu2 %2022 }
0x2af6   :  { %v2025_v52 = vmul.f32 %v2023_v50, %v2014_v49 }
0x2af8   :  { %2027 = vrot.lane.b32.xlu1 %v2025_v52, %s3574_s26 }
0x2b31   :  { %v2308_v25 = vpop.permute.xlu0 %2307 }
0x2b32   :  { %v2310_v24 = vmul.f32 %v2308_v25, %v2299_v59 }
0x2b34   :  { %2312 = vrot.lane.b32.xlu2 %v2310_v24, %s3574_s26 }
0x2b6a   :  { %v2028_v0 = vpop.permute.xlu1 %2027 }
0x2b6b   :  { %v4217_v12 = vadd.f32 %v2028_v0, %v2020_v6 }
0x2b6d   :  { %3281 = vtanh.f32 %v4217_v12 }
0x2b73   :  { %v3282_v28 = vpop.eup %3281 }
0x2b74   :  { %2033 = vrot.lane.b32.xlu0 %v3282_v28, %s3566_s21 }
0x2b8e   :  { %v2313_v31 = vpop.permute.xlu2 %2312 }
0x2b8f   :  { %v2315_v15 = vadd.f32 %v2313_v31, %v2305_v30 }
0x2b91   :  { %3283 = vtanh.f32 %v2315_v15  ;;  %v2370_v53 = vrot.slane %v2315_v15, 2 }
0x2b97   :  { %v3284_v35 = vpop.eup %3283 }
0x2b98   :  { %2318 = vrot.lane.b32.xlu1 %v3284_v35, %s3566_s21 }
0x2be6   :  { %v2034_v37 = vpop.permute.xlu0 %2033 }
0x2be7   :  { %v4223_v7 = vmul.f32 %v2034_v37, %v2014_v49 }
0x2be9   :  { %v2038_v38 = vrot.slane %v4223_v7, 4 }
0x2beb   :  { %2039 = vrot.lane.b32.xlu2 %v2038_v38, %s3575_s7 }
0x2c0a   :  { %v2319_v40 = vpop.permute.xlu1 %2318 }
0x2c0b   :  { %v4227_v13 = vmul.f32 %v2319_v40, %v2299_v59 }
0x2c0d   :  { %v2323_v10 = vrot.slane %v4227_v13, 2 }
0x2c0f   :  { %2324 = vrot.lane.b32.xlu0 %v2323_v10, %s3575_s7 }
0x2c45   :  { %v2040_v16 = vpop.permute.xlu2 %2039 }
0x2c46   :  { %3032 = vmatmul.msk.f32.vlgmr.msrb.gmra.mxu2 %vm223_vm0, %v2040_v16 }
0x2c47   :  { %2618 = vmatpush.msrb.mxu2 %v4125_v4 }
0x2c49   :  { %2619 = vmatpush.msrb.mxu2 %v4127_v27 }
0x2c81   :  { %v2325_v36 = vpop.permute.xlu0 %2324 }
0x2c82   :  { %3041 = vmatmul.msk.f32.vlgmr.msra.gmra.mxu2 %vm223_vm0, %v2325_v36 }
0x2cc9   :  { %v4235_v41 = vpop.f32.mrf.mxu2 }
0x2d05   :  { %v2345_v20 = vpop.f32.mrf.mxu2 }
0x2d06   :  { %v2348_v42 = vadd.f32 %v2345_v20, %v4153_v21 }
0x2d08   :  { %3285 = vtanh.f32 %v2348_v42  ;;  %v3042_v44 = vmul.f32 -1.442695, %v2348_v42 }
0x2d0a   :  { %3287 = vpow2.f32 %v3042_v44 }
0x2d0e   :  { %v3286_v43 = vpop.eup %3285 }
0x2d0f   :  { %2374 = vrot.lane.b32.xlu1 %v3286_v43, %s3573_s9 }
0x2d10   :  { %v3288_v45 = vpop.eup %3287 }
0x2d11   :  { %v2352_v32 = vadd.f32 1.0, %v3288_v45 }
0x2d13   :  { %3289 = vrcp.f32 %v2352_v32  ;;  %v2364_v48 = vand.u32 2147483648, %v2352_v32  ;;  %vm2358_vm8 = vweird.f32 %v2352_v32  ;;  %v2362_v33 = vand.u32 2147483647, %v2352_v32 }
0x2d15   :  { %v2365_v49 = vor.u32 1.1754944e-38, %v2364_v48  ;;  %vm2363_vm13 = vcmp.eq.f32.partialorder %v2362_v33, 8.507059e+37 }
0x2d19   :  { %v3290_v4 = vpop.eup %3289 }
0x2d1a   :  { %v2354_v46 = vmul.f32 %v3290_v4, %v2352_v32  ;;  %vm2359_vm6 = vweird.f32 %v3290_v4 }
0x2d1b   :  { %vm2360_vm1 = vmor %vm2358_vm8, %vm2359_vm6 }
0x2d1c   :  { %v2355_v27 = vsub.f32 1.0, %v2354_v46 }
0x2d1e   :  { %v2356_v47 = vmul.f32 %v3290_v4, %v2355_v27 }
0x2d20   :  { %v2357_v17 = vadd.f32 %v3290_v4, %v2356_v47 }
0x2d22   :  { %v2361_v21 = vsel %vm2360_vm1, %v3290_v4, %v2357_v17 }
0x2d23   :  { %v2366_v52 = vsel %vm2363_vm13, %v2365_v49, %v2361_v21 }
0x2d24   :  { %v2372_v55 = vmul.f32 %v2370_v53, %v2366_v52 }
0x2d81   :  { %v2375_v50 = vpop.permute.xlu1 %2374 }
0x2d82   :  { %v2377_v61 = vmul.f32 %v2375_v50, %v2366_v52 }
0x2d84   :  { %2379 = vrot.lane.b32.xlu2 %v2377_v61, %s3574_s26 }
0x2dde   :  { %v2380_v56 = vpop.permute.xlu2 %2379 }
0x2ddf   :  { %v2382_v19 = vadd.f32 %v2380_v56, %v2372_v55 }
0x2de1   :  { %3291 = vtanh.f32 %v2382_v19  ;;  %v2439_v10 = vrot.slane %v2382_v19, 2 }
0x2de7   :  { %v3292_v60 = vpop.eup %3291 }
0x2de8   :  { %2385 = vrot.lane.b32.xlu0 %v3292_v60, %s3566_s21 }
0x2e5a   :  { %v2386_v62 = vpop.permute.xlu0 %2385 }
0x2e5b   :  { %v4241_v58 = vmul.f32 %v2386_v62, %v2366_v52 }
0x2e5d   :  { %2390 = vrot.lane.b32.xlu1 %v4241_v58, %s3575_s7 }
0x2ecf   :  { %v2391_v11 = vpop.permute.xlu1 %2390 }
0x2ed0   :  { %3043 = vmatmul.msk.f32.vlgmr.msra.gmra.mxu3 %vm223_vm0, %v2391_v11 }
0x2f53   :  { %v2411_v34 = vpop.f32.mrf.mxu3 }
0x2f54   :  { %v2415_v3 = vrot.slane %v2411_v34, 2 }
0x2f56   :  { %v2417_v25 = vadd.f32 %v2415_v3, %v4248_v26 }
0x2f58   :  { %3293 = vtanh.f32 %v2417_v25  ;;  %v3044_v24 = vmul.f32 -1.442695, %v2417_v25 }
0x2f5a   :  { %3295 = vpow2.f32 %v3044_v24 }
0x2f5e   :  { %v3294_v59 = vpop.eup %3293 }
0x2f5f   :  { %2443 = vrot.lane.b32.xlu2 %v3294_v59, %s3573_s9 }
0x2f60   :  { %v3296_v29 = vpop.eup %3295 }
0x2f61   :  { %v2421_v6 = vadd.f32 1.0, %v3296_v29 }
0x2f63   :  { %3297 = vrcp.f32 %v2421_v6  ;;  %v2433_v18 = vand.u32 2147483648, %v2421_v6  ;;  %vm2427_vm15 = vweird.f32 %v2421_v6  ;;  %v2431_v14 = vand.u32 2147483647, %v2421_v6 }
0x2f65   :  { %v2434_v35 = vor.u32 1.1754944e-38, %v2433_v18  ;;  %vm2432_vm4 = vcmp.eq.f32.partialorder %v2431_v14, 8.507059e+37 }
0x2f69   :  { %v3298_v0 = vpop.eup %3297 }
0x2f6a   :  { %v2423_v28 = vmul.f32 %v3298_v0, %v2421_v6  ;;  %vm2428_vm14 = vweird.f32 %v3298_v0 }
0x2f6b   :  { %vm2429_vm3 = vmor %vm2427_vm15, %vm2428_vm14 }
0x2f6c   :  { %v2424_v51 = vsub.f32 1.0, %v2423_v28 }
0x2f6e   :  { %v2425_v30 = vmul.f32 %v3298_v0, %v2424_v51 }
0x2f70   :  { %v2426_v31 = vadd.f32 %v3298_v0, %v2425_v30 }
0x2f72   :  { %v2430_v15 = vsel %vm2429_vm3, %v3298_v0, %v2426_v31 }
0x2f73   :  { %v2435_v38 = vsel %vm2432_vm4, %v2434_v35, %v2430_v15  ;;  %vm2698_vm4 = vcmask 122880  }
0x2f74   :  { %v2441_v16 = vmul.f32 %v2439_v10, %v2435_v38 }
0x2fb9   :  { %v2444_v37 = vpop.permute.xlu2 %2443 }
0x2fba   :  { %v2446_v40 = vmul.f32 %v2444_v37, %v2435_v38 }
0x2fbc   :  { %2448 = vrot.lane.b32.xlu0 %v2446_v40, %s3574_s26 }
0x302e   :  { %v2449_v36 = vpop.permute.xlu0 %2448 }
0x302f   :  { %v2451_v20 = vadd.f32 %v2449_v36, %v2441_v16 }
0x3031   :  { %3299 = vtanh.f32 %v2451_v20  ;;  %v2509_v34 = vrot.slane %v2451_v20, 2 }
0x3037   :  { %v3300_v42 = vpop.eup %3299 }
0x3038   :  { %2454 = vrot.lane.b32.xlu1 %v3300_v42, %s3566_s21  ;;  %v2064_v42 = vrot.slane %v4235_v41, 2 }
0x30aa   :  { %v2455_v43 = vpop.permute.xlu1 %2454 }
0x30ab   :  { %v4254_v44 = vmul.f32 %v2455_v43, %v2435_v38 }
0x30ad   :  { %v2459_v45 = vrot.slane %v4254_v44, 6 }
0x30af   :  { %2460 = vrot.lane.b32.xlu2 %v2459_v45, %s3575_s7 }
0x3109   :  { %v2461_v32 = vpop.permute.xlu2 %2460 }
0x310a   :  { %3045 = vmatmul.msk.f32.vlgmr.msrb.gmra.mxu0 %vm223_vm0, %v2461_v32  ;;  %v2066_v32 = vadd.f32 %v2064_v42, %v4147_v63 }
0x3187   :  { %v2481_v4 = vpop.f32.mrf.mxu0 }
0x3188   :  { %v2485_v46 = vrot.slane %v2481_v4, 4 }
0x318a   :  { %v2487_v27 = vadd.f32 %v2485_v46, %v4248_v26 }
0x318c   :  { %3301 = vtanh.f32 %v2487_v27  ;;  %v3046_v17 = vmul.f32 -1.442695, %v2487_v27 }
0x318e   :  { %3303 = vpow2.f32 %v3046_v17 }
0x3192   :  { %v3302_v47 = vpop.eup %3301 }
0x3193   :  { %2513 = vrot.lane.b32.xlu0 %v3302_v47, %s3573_s9 }
0x3194   :  { %v3304_v48 = vpop.eup %3303 }
0x3195   :  { %v2491_v33 = vadd.f32 1.0, %v3304_v48 }
0x3197   :  { %3305 = vrcp.f32 %v2491_v33  ;;  %v2503_v53 = vand.u32 2147483648, %v2491_v33  ;;  %vm2497_vm9 = vweird.f32 %v2491_v33  ;;  %v2501_v55 = vand.u32 2147483647, %v2491_v33 }
0x3199   :  { %v2504_v19 = vor.u32 1.1754944e-38, %v2503_v53  ;;  %vm2502_vm11 = vcmp.eq.f32.partialorder %v2501_v55, 8.507059e+37 }
0x319d   :  { %v3306_v21 = vpop.eup %3305 }
0x319e   :  { %v2493_v49 = vmul.f32 %v3306_v21, %v2491_v33  ;;  %vm2498_vm5 = vweird.f32 %v3306_v21 }
0x319f   :  { %vm2499_vm10 = vmor %vm2497_vm9, %vm2498_vm5 }
0x31a0   :  { %v2494_v50 = vsub.f32 1.0, %v2493_v49 }
0x31a2   :  { %v2495_v52 = vmul.f32 %v3306_v21, %v2494_v50  ;;  %v3033_v50 = vmul.f32 -1.442695, %v2066_v32 }
0x31a4   :  { %v2496_v61 = vadd.f32 %v3306_v21, %v2495_v52 }
0x31a6   :  { %v2500_v56 = vsel %vm2499_vm10, %v3306_v21, %v2496_v61 }
0x31a7   :  { %v2505_v62 = vsel %vm2502_vm11, %v2504_v19, %v2500_v56  ;;  %vm2710_vm11 = vcmask 254080  }
0x31a8   :  { %v2511_v3 = vmul.f32 %v2509_v34, %v2505_v62 }
0x3205   :  { %v2514_v60 = vpop.permute.xlu0 %2513 }
0x3206   :  { %v2516_v11 = vmul.f32 %v2514_v60, %v2505_v62 }
0x3208   :  { %2518 = vrot.lane.b32.xlu1 %v2516_v11, %s3574_s26  ;;  %v4281_v11 = vld [vmem:[#allocation1 + $0x3] ss:$9 sm:$0xff] }
0x327a   :  { %v2519_v25 = vpop.permute.xlu1 %2518 }
0x327b   :  { %v2521_v59 = vadd.f32 %v2519_v25, %v2511_v3 }
0x327d   :  { %3307 = vtanh.f32 %v2521_v59  ;;  %v2579_v41 = vrot.slane %v2521_v59, 2 }
0x3283   :  { %v3308_v24 = vpop.eup %3307 }
0x3284   :  { %2524 = vrot.lane.b32.xlu2 %v3308_v24, %s3566_s21 }
0x32de   :  { %v2525_v29 = vpop.permute.xlu2 %2524 }
0x32df   :  { %v4263_v6 = vmul.f32 %v2525_v29, %v2505_v62  ;;  %v2715_v62 = vld [vmem:[#allocation1 + $0x2] ss:$9 sm:$0xff] }
0x32e1   :  { %v2529_v0 = vrot.slane %v4263_v6, 4 }
0x32e3   :  { %2530 = vrot.lane.b32.xlu0 %v2529_v0, %s3575_s7 }
0x3355   :  { %v2531_v28 = vpop.permute.xlu0 %2530 }
0x3356   :  { %3047 = vmatmul.msk.f32.vlgmr.msrb.gmra.mxu1 %vm223_vm0, %v2531_v28 }
0x33d3   :  { %v2551_v51 = vpop.f32.mrf.mxu1 }
0x33d4   :  { %v2555_v30 = vrot.slane %v2551_v51, 6 }
0x33d6   :  { %v2557_v31 = vadd.f32 %v2555_v30, %v4248_v26 }
0x33d8   :  { %3309 = vtanh.f32 %v2557_v31  ;;  %v3048_v14 = vmul.f32 -1.442695, %v2557_v31 }
0x33da   :  { %3311 = vpow2.f32 %v3048_v14  ;;  %v2689_v14 = vrot.slane %v4056_v57, 1 }
0x33de   :  { %v3310_v18 = vpop.eup %3309 }
0x33df   :  { %2583 = vrot.lane.b32.xlu1 %v3310_v18, %s3573_s9 }
0x33e0   :  { %v3312_v15 = vpop.eup %3311 }
0x33e1   :  { %v2561_v35 = vadd.f32 1.0, %v3312_v15 }
0x33e3   :  { %3313 = vrcp.f32 %v2561_v35  ;;  %v2573_v36 = vand.u32 2147483648, %v2561_v35  ;;  %vm2567_vm6 = vweird.f32 %v2561_v35  ;;  %v2571_v20 = vand.u32 2147483647, %v2561_v35 }
0x33e4   :  { %3315 = vtanh.f32 %v2066_v32  ;;  %v2088_v32 = vrot.slane %v4217_v12, 6 }
0x33e5   :  { %v2574_v45 = vor.u32 1.1754944e-38, %v2573_v36  ;;  %vm2572_vm1 = vcmp.eq.f32.partialorder %v2571_v20, 8.507059e+37 }
0x33e9   :  { %v3314_v37 = vpop.eup %3313 }
0x33ea   :  { %v2563_v38 = vmul.f32 %v3314_v37, %v2561_v35  ;;  %vm2568_vm12 = vweird.f32 %v3314_v37  ;;  %v3316_v47 = vpop.eup %3315 }
0x33eb   :  { %vm2569_vm8 = vmor %vm2567_vm6, %vm2568_vm12 }
0x33ec   :  { %v2564_v40 = vsub.f32 1.0, %v2563_v38 }
0x33ee   :  { %v2565_v10 = vmul.f32 %v3314_v37, %v2564_v40  ;;  %v2718_v40 = vperm.slane %v2715_v62, 0 }
0x33f0   :  { %v2566_v16 = vadd.f32 %v3314_v37, %v2565_v10 }
0x33f2   :  { %v2570_v43 = vsel %vm2569_vm8, %v3314_v37, %v2566_v16  ;;  %v2691_v37 = vperm.slane %v2689_v14, 0 }
0x33f3   :  { %v2575_v46 = vsel %vm2572_vm1, %v2574_v45, %v2570_v43  ;;  %v2804_v45 = vperm.slane %v4170_v8, 0 }
0x33f4   :  { %v2581_v17 = vmul.f32 %v2579_v41, %v2575_v46 }
0x3451   :  { %v2584_v4 = vpop.permute.xlu1 %2583 }
0x3452   :  { %v2586_v27 = vmul.f32 %v2584_v4, %v2575_v46 }
0x3454   :  { %2588 = vrot.lane.b32.xlu2 %v2586_v27, %s3574_s26 }
0x345c   :  { %2092 = vrot.lane.b32.xlu2 %v3316_v47, %s3573_s9 }
0x3464   :  { %1413 = vrot.lane.b32.xlu2 %v3975_v1, %s3576_s22 }
0x34ae   :  { %v2589_v48 = vpop.permute.xlu2 %2588 }
0x34af   :  { %v4276_v33 = vadd.f32 %v2589_v48, %v2581_v17 }
0x34b1   :  { %3317 = vtanh.f32 %v4276_v33 }
0x34b2   :  { %3319 = vpow2.f32 %v3033_v50 }
0x34b6   :  { %v2093_v63 = vpop.permute.xlu2 %2092 }
0x34b7   :  { %v3318_v21 = vpop.eup %3317 }
0x34b8   :  { %2594 = vrot.lane.b32.xlu0 %v3318_v21, %s3566_s21  ;;  %v3320_v52 = vpop.eup %3319 }
0x34b9   :  { %v2070_v61 = vadd.f32 1.0, %v3320_v52  ;;  %v2690_v52 = vperm.slane %v4056_v57, 0 }
0x34bb   :  { %3321 = vrcp.f32 %v2070_v61  ;;  %v2082_v25 = vand.u32 2147483648, %v2070_v61  ;;  %vm2076_vm14 = vweird.f32 %v2070_v61  ;;  %v2080_v59 = vand.u32 2147483647, %v2070_v61 }
0x34bd   :  { %v2083_v29 = vor.u32 1.1754944e-38, %v2082_v25  ;;  %vm2081_vm3 = vcmp.eq.f32.partialorder %v2080_v59, 8.507059e+37 }
0x34be   :  { %v1414_v49 = vpop.permute.xlu2 %1413 }
0x34bf   :  { %1417 = vst.msk [vmem:[#allocation17 + $0x2] sm:$0x3] %vm1410_vm7, %v1414_v49 }
0x34c1   :  { %v3322_v1 = vpop.eup %3321 }
0x34c2   :  { %v2072_v53 = vmul.f32 %v3322_v1, %v2070_v61  ;;  %vm2077_vm13 = vweird.f32 %v3322_v1 }
0x34c3   :  { %vm2078_vm15 = vmor %vm2076_vm14, %vm2077_vm13 }
0x34c4   :  { %v2073_v55 = vsub.f32 1.0, %v2072_v53 }
0x34c6   :  { %v2074_v56 = vmul.f32 %v3322_v1, %v2073_v55  ;;  %v2815_v55 = vperm.slane %v4241_v58, 0 }
0x34c8   :  { %v2075_v34 = vadd.f32 %v3322_v1, %v2074_v56 }
0x34ca   :  { %v2079_v24 = vsel %vm2078_vm15, %v3322_v1, %v2075_v34 }
0x34cb   :  { %v4284_v0 = vsel %vm2081_vm3, %v2083_v29, %v2079_v24 }
0x34cc   :  { %v2095_v30 = vmul.f32 %v2093_v63, %v4284_v0  ;;  %v2090_v4 = vmul.f32 %v2088_v32, %v4284_v0 }
0x352a   :  { %v2595_v19 = vpop.permute.xlu0 %2594 }
0x352b   :  { %v2597_v60 = vmul.f32 %v2595_v19, %v2575_v46 }
0x352d   :  { %v2599_v3 = vrot.slane %v2597_v60, 2  ;;  %2728 = vst [vmem:[#allocation1] sm:$0xff] %v2597_v60 }
0x352f   :  { %2600 = vrot.lane.b32.xlu1 %v2599_v3, %s3575_s7 }
0x3534   :  { %v4286_v28 = vld [vmem:[#allocation1 + $0x2] ss:$9 sm:$0xff] }
0x3535   :  { %v2732_v51 = vld [vmem:[#allocation1 + $0x3] ss:$9 sm:$0xff]  ;;  %v2733_v61 = vperm.slane %v4286_v28, 0 }
0x3536   :  { %2743 = vst [vmem:[#allocation1] sm:$0xff] %v4079_v9  ;;  %v2734_v10 = vperm.slane %v2732_v51, 0 }
0x3537   :  { %2097 = vrot.lane.b32.xlu1 %v2095_v30, %s3574_s26 }
0x353d   :  { %v4291_v31 = vld [vmem:[#allocation1 + $0x4] ss:$9 sm:$0xff] }
0x353e   :  { %v4293_v18 = vld [vmem:[#allocation1 + $0x5] ss:$9 sm:$0xff] }
0x353f   :  { %2758 = vst [vmem:[#allocation1] sm:$0xff] %v4263_v6  ;;  %1406 = vrot.lane.b32.xlu1 %v3985_v5, %s3575_s7 }
0x3546   :  { %v4299_v15 = vld [vmem:[#allocation1 + $0x5] ss:$9 sm:$0xff] }
0x3547   :  { %v2760_v35 = vld [vmem:[#allocation1 + $0x4] ss:$9 sm:$0xff]  ;;  %2694 = vrot.lane.b32.xlu1 %v2691_v37, %s3575_s7 }
0x3548   :  { %2773 = vst [vmem:[#allocation1] sm:$0xff] %v4117_v2  ;;  %v2763_v36 = vperm.slane %v2760_v35, 0 }
0x354f   :  { %v2777_v9 = vld [vmem:[#allocation1 + $0x7] ss:$9 sm:$0xff]  ;;  %2720 = vrot.lane.b32.xlu1 %v2718_v40, %s3575_s7 }
0x3550   :  { %v2775_v38 = vld [vmem:[#allocation1 + $0x6] ss:$9 sm:$0xff]  ;;  %v2779_v42 = vperm.slane %v2777_v9, 0 }
0x3551   :  { %2788 = vst [vmem:[#allocation1] sm:$0xff] %v4254_v44  ;;  %v2778_v1 = vperm.slane %v2775_v38, 0 }
0x3557   :  { %2737 = vrot.lane.b32.xlu1 %v2734_v10, %s3573_s9 }
0x3558   :  { %v4305_v6 = vld [vmem:[#allocation1 + $0x6] ss:$9 sm:$0xff] }
0x3559   :  { %v2792_v5 = vld [vmem:[#allocation1 + $0x7] ss:$9 sm:$0xff]  ;;  %v2793_v32 = vperm.slane %v4305_v6, 0  ;;  %v2646_v6 = vrot.slane %v4276_v33, 2 }
0x355a   :  { %2825 = vst [vmem:[#allocation1] sm:$0xff] %v4198_v23 }
0x355f   :  { %2765 = vrot.lane.b32.xlu1 %v2763_v36, %s3573_s9 }
0x3561   :  { %v4309_v16 = vld [vmem:[#allocation1 + $0x2] ss:$9 sm:$0xff] }
0x3562   :  { %v4311_v2 = vld [vmem:[#allocation1 + $0x3] ss:$9 sm:$0xff] }
0x3563   :  { %2840 = vst [vmem:[#allocation1] sm:$0xff] %v4227_v13 }
0x3567   :  { %2782 = vrot.lane.b32.xlu1 %v2779_v42, %s3575_s7 }
0x356a   :  { %v4315_v44 = vld [vmem:[#allocation1 + $0x2] ss:$9 sm:$0xff] }
0x356b   :  { %v4317_v20 = vld [vmem:[#allocation1 + $0x3] ss:$9 sm:$0xff] }
0x356c   :  { %2855 = vst [vmem:[#allocation1] sm:$0xff] %v4223_v7 }
0x356f   :  { %2806 = vrot.lane.b32.xlu1 %v2804_v45, %s3575_s7  ;;  %v2846_v45 = vperm.slane %v4317_v20, 0 }
0x3573   :  { %v4321_v23 = vld [vmem:[#allocation1 + $0x5] ss:$9 sm:$0xff] }
0x3574   :  { %v2857_v43 = vld [vmem:[#allocation1 + $0x4] ss:$9 sm:$0xff] }
0x3575   :  { %2870 = vst [vmem:[#allocation1] sm:$0xff] %v4202_v22  ;;  %v2860_v57 = vperm.slane %v2857_v43, 0  ;;  %v2748_v43 = vperm.slane %v4291_v31, 0  ;;  %v2803_v31 = vrot.slane %v4170_v8, 1 }
0x357c   :  { %v4361_v9 = vld [vmem:[#allocation1 + $0x4] ss:$9 sm:$0xff] }
0x357d   :  { %v4363_v38 = vld [vmem:[#allocation1 + $0x5] ss:$9 sm:$0xff] }
0x35a1   :  { %v2601_v13 = vpop.permute.xlu1 %2600 }
0x35a2   :  { %3049 = vmatmul.msk.f32.vlgmr.msrb.gmra.mxu2 %vm223_vm0, %v2601_v13  ;;  %v2764_v13 = vperm.slane %v4299_v15, 0 }
0x35a9   :  { %v2098_v46 = vpop.permute.xlu1 %2097 }
0x35aa   :  { %v2100_v7 = vadd.f32 %v2098_v46, %v2090_v4  ;;  %v2805_v4 = vperm.slane %v2803_v31, 0 }
0x35b1   :  { %v1407_v27 = vpop.permute.xlu1 %1406 }
0x35b2   :  { %1411 = vst.msk [vmem:[#allocation15 + $0x2] sm:$0x3] %vm1410_vm7, %v1407_v27 }
0x35b9   :  { %v2695_v47 = vpop.permute.xlu1 %2694 }
0x35ba   :  { %2700 = vst.msk [vmem:[#allocation14 + $0x8] sm:$0x1] %vm2698_vm4, %v2695_v47 }
0x35c1   :  { %v2721_v41 = vpop.permute.xlu1 %2720 }
0x35c2   :  { %2726 = vst.msk [vmem:[#allocation14 + $0x1] sm:$0x1] %vm2698_vm4, %v2721_v41 }
0x35c9   :  { %v4332_v22 = vpop.permute.xlu1 %2737 }
0x35d1   :  { %v4334_v17 = vpop.permute.xlu1 %2765 }
0x35d9   :  { %v2783_v48 = vpop.permute.xlu1 %2782 }
0x35da   :  { %2787 = vst.msk [vmem:[#allocation14 + $0xb] sm:$0x1] %vm2698_vm4, %v2783_v48  ;;  %v2831_v48 = vperm.slane %v4311_v2, 0  ;;  %v2845_v2 = vperm.slane %v4315_v44, 0  ;;  %v2875_v44 = vperm.slane %v4361_v9, 0 }
0x35e1   :  { %v2807_v12 = vpop.permute.xlu1 %2806 }
0x35e2   :  { %2812 = vst.msk [vmem:[#allocation14 + $0x4] sm:$0x1] %vm2698_vm4, %v2807_v12 }
0x3625   :  { %v2621_v63 = vpop.f32.mrf.mxu2 }
0x3626   :  { %v2624_v21 = vadd.f32 %v2621_v63, %v4248_v26  ;;  %v2749_v26 = vperm.slane %v4293_v18, 0  ;;  %v2830_v63 = vperm.slane %v4309_v16, 0  ;;  %v2814_v16 = vrot.slane %v4241_v58, 1 }
0x3628   :  { %3323 = vtanh.f32 %v2624_v21  ;;  %v3050_v53 = vmul.f32 -1.442695, %v2624_v21 }
0x3629   :  { %3325 = vtanh.f32 %v2100_v7 }
0x362a   :  { %3327 = vpow2.f32 %v3050_v53 }
0x362e   :  { %v3324_v49 = vpop.eup %3323 }
0x362f   :  { %2650 = vrot.lane.b32.xlu0 %v3324_v49, %s3573_s9  ;;  %v3326_v50 = vpop.eup %3325  ;;  %v2861_v49 = vperm.slane %v4321_v23, 0 }
0x3630   :  { %v3328_v56 = vpop.eup %3327 }
0x3631   :  { %v2628_v19 = vadd.f32 1.0, %v3328_v56 }
0x3633   :  { %3329 = vrcp.f32 %v2628_v19  ;;  %v2640_v59 = vand.u32 2147483648, %v2628_v19  ;;  %vm2634_vm5 = vweird.f32 %v2628_v19  ;;  %v2638_v24 = vand.u32 2147483647, %v2628_v19 }
0x3635   :  { %v2641_v28 = vor.u32 1.1754944e-38, %v2640_v59  ;;  %vm2639_vm10 = vcmp.eq.f32.partialorder %v2638_v24, 8.507059e+37  ;;  %v2876_v59 = vperm.slane %v4363_v38, 0 }
0x3637   :  { %1401 = vrot.lane.b32.xlu0 %v4087_v39, %s3576_s22  ;;  %v2794_v39 = vperm.slane %v2792_v5, 0  ;;  %v2719_v5 = vperm.slane %v4281_v11, 0 }
0x3639   :  { %v3330_v60 = vpop.eup %3329 }
0x363a   :  { %v2630_v62 = vmul.f32 %v3330_v60, %v2628_v19  ;;  %vm2635_vm0 = vweird.f32 %v3330_v60 }
0x363b   :  { %vm2636_vm9 = vmor %vm2634_vm5, %vm2635_vm0 }
0x363c   :  { %v2631_v34 = vsub.f32 1.0, %v2630_v62 }
0x363e   :  { %v2632_v3 = vmul.f32 %v3330_v60, %v2631_v34 }
0x363f   :  { %2103 = vrot.lane.b32.xlu0 %v3326_v50, %s3566_s21  ;;  %v2816_v50 = vperm.slane %v2814_v16, 0 }
0x3640   :  { %v2633_v25 = vadd.f32 %v3330_v60, %v2632_v3 }
0x3642   :  { %v2637_v29 = vsel %vm2636_vm9, %v3330_v60, %v2633_v25 }
0x3643   :  { %v4355_v30 = vsel %vm2639_vm10, %v2641_v28, %v2637_v29 }
0x3644   :  { %v2648_v27 = vmul.f32 %v2646_v6, %v4355_v30 }
0x3647   :  { %2672 = vrot.lane.b32.xlu0 %v2100_v7, %s3576_s22 }
0x364f   :  { %2692 = vrot.lane.b32.xlu0 %v2690_v52, %s3575_s7 }
0x3657   :  { %2735 = vrot.lane.b32.xlu0 %v2733_v61, %s3573_s9 }
0x365f   :  { %2752 = vrot.lane.b32.xlu0 %v2749_v26, %s3575_s7 }
0x3667   :  { %2780 = vrot.lane.b32.xlu0 %v2778_v1, %s3575_s7 }
0x366f   :  { %2797 = vrot.lane.b32.xlu0 %v2794_v39, %s3573_s9 }
0x3677   :  { %2817 = vrot.lane.b32.xlu0 %v2815_v55, %s3573_s9 }
0x367f   :  { %2862 = vrot.lane.b32.xlu0 %v2860_v57, %s3575_s7 }
0x36a1   :  { %v2651_v51 = vpop.permute.xlu0 %2650 }
0x36a2   :  { %v2653_v18 = vmul.f32 %v2651_v51, %v4355_v30 }
0x36a4   :  { %2655 = vrot.lane.b32.xlu2 %v2653_v18, %s3574_s26  ;;  %s3577_s26 = smov [#allocation15]  }
0x36a9   :  { %v1402_v14 = vpop.permute.xlu0 %1401 }
0x36aa   :  { %1404 = vst.msk [vmem:[#allocation17 - $0x6] sm:$0xc0] %vm1398_vm2, %v1402_v14 }
0x36b1   :  { %v2104_v35 = vpop.permute.xlu0 %2103 }
0x36b2   :  { %v2106_v37 = vmul.f32 %v2104_v35, %v4284_v0 }
0x36b4   :  { %2885 = vst [vmem:[#allocation1] sm:$0xff] %v2106_v37  ;;  %2666 = vrot.lane.b32.xlu2 %v2106_v37, %s3575_s7 }
0x36b9   :  { %v2673_v40 = vpop.permute.xlu0 %2672 }
0x36ba   :  { %2676 = vst.msk [vmem:[#allocation17 - $0x2] sm:$0xc0] %vm1398_vm2, %v2673_v40 }
0x36bb   :  { %v2889_v10 = vld [vmem:[#allocation1 + $0x7] ss:$9 sm:$0xff] }
0x36bc   :  { %v2887_v36 = vld [vmem:[#allocation1 + $0x6] ss:$9 sm:$0xff]  ;;  %2722 = vrot.lane.b32.xlu2 %v2719_v5, %s3575_s7  ;;  %v2891_v42 = vperm.slane %v2889_v10, 0 }
0x36bd   :  { %2900 = vst [vmem:[#allocation1] sm:$0xff] %v4174_v54  ;;  %v2890_v33 = vperm.slane %v2887_v36, 0 }
0x36be   :  { %2894 = vrot.lane.b32.xlu0 %v2891_v42, %s3575_s7 }
0x36c1   :  { %v2693_v0 = vpop.permute.xlu0 %2692 }
0x36c2   :  { %2699 = vst.msk [vmem:[#allocation14] sm:$0x1] %vm2698_vm4, %v2693_v0 }
0x36c4   :  { %2750 = vrot.lane.b32.xlu2 %v2748_v43, %s3575_s7  ;;  %v2904_v60 = vld [vmem:[#allocation1 + $0x7] ss:$9 sm:$0xff] }
0x36c5   :  { %v2906_v3 = vperm.slane %v2904_v60, 0  ;;  %v2902_v25 = vld [vmem:[#allocation1 + $0x6] ss:$9 sm:$0xff] }
0x36c6   :  { %2849 = vrot.lane.b32.xlu0 %v2846_v45, %s3573_s9  ;;  %v2905_v24 = vperm.slane %v2902_v25, 0 }
0x36c9   :  { %v2736_v11 = vpop.permute.xlu0 %2735 }
0x36ca   :  { %2741 = vst.msk [vmem:[#allocation14 + $0x1] sm:$0x1] %vm2710_vm11, %v2736_v11 }
0x36cc   :  { %2767 = vrot.lane.b32.xlu2 %v2764_v13, %s3573_s9 }
0x36d1   :  { %v2753_v54 = vpop.permute.xlu0 %2752 }
0x36d2   :  { %2757 = vst.msk [vmem:[#allocation14 + $0xa] sm:$0x1] %vm2698_vm4, %v2753_v54 }
0x36d4   :  { %2795 = vrot.lane.b32.xlu2 %v2793_v32, %s3573_s9 }
0x36d9   :  { %v2781_v20 = vpop.permute.xlu0 %2780 }
0x36da   :  { %2786 = vst.msk [vmem:[#allocation14 + $0x3] sm:$0x1] %vm2698_vm4, %v2781_v20 }
0x36dc   :  { %2808 = vrot.lane.b32.xlu2 %v2805_v4, %s3575_s7 }
0x36e1   :  { %v2798_v46 = vpop.permute.xlu0 %2797 }
0x36e2   :  { %2802 = vst.msk [vmem:[#allocation14 + $0xb] sm:$0x1] %vm2710_vm11, %v2798_v46 }
0x36e9   :  { %v2818_v15 = vpop.permute.xlu0 %2817 }
0x36ea   :  { %2823 = vst.msk [vmem:[#allocation14 + $0x4] sm:$0x1] %vm2710_vm11, %v2818_v15 }
0x36f1   :  { %v2863_v7 = vpop.permute.xlu0 %2862 }
0x36f2   :  { %2868 = vst.msk [vmem:[#allocation14 + $0x6] sm:$0x1] %vm2698_vm4, %v2863_v7 }
0x36fe   :  { %v2656_v8 = vpop.permute.xlu2 %2655 }
0x36ff   :  { %v2658_v47 = vadd.f32 %v2656_v8, %v2648_v27 }
0x3701   :  { %3331 = vtanh.f32 %v2658_v47  ;;  %2684 = vrot.lane.b32.xlu2 %v2658_v47, %s3576_s22 }
0x3707   :  { %v3332_v41 = vpop.eup %3331 }
0x3708   :  { %2661 = vrot.lane.b32.xlu1 %v3332_v41, %s3566_s21 }
0x3709   :  { %2834 = vrot.lane.b32.xlu2 %v2831_v48, %s3575_s7 }
0x370e   :  { %v2667_v12 = vpop.permute.xlu2 %2666 }
0x370f   :  { %2670 = vst.msk [vmem:[#allocation15 - $0x2] sm:$0xc0] %vm1398_vm2, %v2667_v12 }
0x3710   :  { %2832 = vrot.lane.b32.xlu1 %v2830_v63, %s3575_s7 }
0x3711   :  { %2892 = vrot.lane.b32.xlu2 %v2890_v33, %s3575_s7 }
0x3716   :  { %v2723_v21 = vpop.permute.xlu2 %2722 }
0x3717   :  { %2727 = vst.msk [vmem:[#allocation14 + $0x9] sm:$0x1] %vm2698_vm4, %v2723_v21 }
0x3718   :  { %2742 = vst.msk [vmem:[#allocation14 + $0x9] sm:$0x1] %vm2710_vm11, %v4332_v22  ;;  %2864 = vrot.lane.b32.xlu1 %v2861_v49, %s3575_s7 }
0x3719   :  { %2847 = vrot.lane.b32.xlu2 %v2845_v2, %s3573_s9 }
0x371e   :  { %v2751_v52 = vpop.permute.xlu2 %2750 }
0x371f   :  { %2756 = vst.msk [vmem:[#allocation14 + $0x2] sm:$0x1] %vm2698_vm4, %v2751_v52 }
0x3720   :  { %2771 = vst.msk [vmem:[#allocation14 + $0x2] sm:$0x1] %vm2710_vm11, %v4334_v17  ;;  %2819 = vrot.lane.b32.xlu1 %v2816_v50, %s3573_s9 }
0x3726   :  { %v2768_v23 = vpop.permute.xlu2 %2767 }
0x3727   :  { %2772 = vst.msk [vmem:[#allocation14 + $0xa] sm:$0x1] %vm2710_vm11, %v2768_v23 }
0x3728   :  { %2877 = vrot.lane.b32.xlu1 %v2875_v44, %s3573_s9 }
0x372e   :  { %v2796_v22 = vpop.permute.xlu2 %2795 }
0x372f   :  { %2801 = vst.msk [vmem:[#allocation14 + $0x3] sm:$0x1] %vm2710_vm11, %v2796_v22 }
0x3730   :  { %v2895_v58 = vpop.permute.xlu0 %2894 }
0x3731   :  { %2899 = vst.msk [vmem:[#allocation14 + $0xf] sm:$0x1] %vm2698_vm4, %v2895_v58 }
0x3736   :  { %v2809_v61 = vpop.permute.xlu2 %2808 }
0x3737   :  { %2813 = vst.msk [vmem:[#allocation14 + $0xc] sm:$0x1] %vm2698_vm4, %v2809_v61 }
0x3738   :  { %v2850_v1 = vpop.permute.xlu0 %2849 }
0x375b   :  { %v2685_v26 = vpop.permute.xlu2 %2684 }
0x375c   :  { %2688 = vst.msk [vmem:[#allocation17 + $0x6] sm:$0x3] %vm1410_vm7, %v2685_v26 }
0x3763   :  { %v2835_v17 = vpop.permute.xlu2 %2834 }
0x3764   :  { %2839 = vst.msk [vmem:[#allocation14 + $0xd] sm:$0x1] %vm2698_vm4, %v2835_v17 }
0x3765   :  { %2854 = vst.msk [vmem:[#allocation14 + $0xd] sm:$0x1] %vm2710_vm11, %v2850_v1 }
0x376b   :  { %v2893_v39 = vpop.permute.xlu2 %2892 }
0x376c   :  { %2898 = vst.msk [vmem:[#allocation14 + $0x7] sm:$0x1] %vm2698_vm4, %v2893_v39 }
0x3773   :  { %v2848_v34 = vpop.permute.xlu2 %2847 }
0x377a   :  { %v2662_v53 = vpop.permute.xlu1 %2661 }
0x377b   :  { %v2664_v55 = vmul.f32 %v2662_v53, %v4355_v30 }
0x377d   :  { %v2701_v57 = vrot.slane %v2664_v55, 1  ;;  %v2702_v56 = vperm.slane %v2664_v55, 0  ;;  %2678 = vrot.lane.b32.xlu1 %v2664_v55, %s3575_s7  ;;  %s2932_s7 = sshll.u32 %s3577_s26, 4  ;;  %s2933_s7 = int_to_ptr.vmem [resolvable:$true] %s2932_s7 }
0x377f   :  { %v2703_v19 = vperm.slane %v2701_v57, 0  ;;  %2704 = vrot.lane.b32.xlu2 %v2702_v56, %s3573_s9 }
0x3781   :  { %2706 = vrot.lane.b32.xlu0 %v2703_v19, %s3573_s9 }
0x3782   :  { %v2833_v62 = vpop.permute.xlu1 %2832 }
0x3783   :  { %2838 = vst.msk [vmem:[#allocation14 + $0x5] sm:$0x1] %vm2698_vm4, %v2833_v62 }
0x3784   :  { %2853 = vst.msk [vmem:[#allocation14 + $0x5] sm:$0x1] %vm2710_vm11, %v2848_v34 }
0x3785   :  { %2909 = vrot.lane.b32.xlu1 %v2906_v3, %s3573_s9 }
0x3787   :  { %2879 = vrot.lane.b32.xlu2 %v2876_v59, %s3573_s9 }
0x3789   :  { %2907 = vrot.lane.b32.xlu0 %v2905_v24, %s3573_s9  ;;  %s2934_s9 = sshll.u32 %s4475_s18, 4  ;;  %s3579_s18 = smov [#allocation14]   ;;  %s2935_s9 = int_to_ptr.hbm [resolvable:$true] %s2934_s9 }
0x378a   :  { %v2865_v29 = vpop.permute.xlu1 %2864  ;;  %s2919_s19 = sshll.u32 %s3579_s18, 4  ;;  %s2920_s19 = int_to_ptr.vmem [resolvable:$true] %s2919_s19 }
0x378b   :  { %2869 = vst.msk [vmem:[#allocation14 + $0xe] sm:$0x1] %vm2698_vm4, %v2865_v29 }
0x3792   :  { %v2820_v28 = vpop.permute.xlu1 %2819 }
0x3793   :  { %2824 = vst.msk [vmem:[#allocation14 + $0xc] sm:$0x1] %vm2710_vm11, %v2820_v28 }
0x379a   :  { %v2878_v51 = vpop.permute.xlu1 %2877 }
0x379b   :  { %2883 = vst.msk [vmem:[#allocation14 + $0x6] sm:$0x1] %vm2710_vm11, %v2878_v51 }
0x37d9   :  { %v2705_v30 = vpop.permute.xlu2 %2704 }
0x37da   :  { %2711 = vst.msk [vmem:[#allocation14] sm:$0x1] %vm2710_vm11, %v2705_v30 }
0x37e1   :  { %v2880_v18 = vpop.permute.xlu2 %2879 }
0x37e2   :  { %2884 = vst.msk [vmem:[#allocation14 + $0xe] sm:$0x1] %vm2710_vm11, %v2880_v18 }
0x37ef   :  { %v2679_v14 = vpop.permute.xlu1 %2678 }
0x37f0   :  { %2682 = vst.msk [vmem:[#allocation15 + $0x6] sm:$0x3] %vm1410_vm7, %v2679_v14 }
0x37f1   :  { %2940 = dma.vmem_to_hbm [thread:$0]  %s2933_s7, 128, %s2935_s9, [#allocation16], %s3566_s21, %s3566_s21, %s3567_s1  }
0x37f2   :  { %2953 = dma.vmem_to_hbm [thread:$0]  %s2946_s2, 128, %s2948_s5, [#allocation16], %s3566_s21, %s3566_s21, %s3567_s1  }
0x37f3   :  { %v2707_v35 = vpop.permute.xlu0 %2706 }
0x37f4   :  { %2712 = vst.msk [vmem:[#allocation14 + $0x8] sm:$0x1] %vm2710_vm11, %v2707_v35 }
0x37f7   :  { %v2910_v37 = vpop.permute.xlu1 %2909 }
0x37f8   :  { %2914 = vst.msk [vmem:[#allocation14 + $0xf] sm:$0x1] %vm2710_vm11, %v2910_v37 }
0x37fb   :  { %v2908_v9 = vpop.permute.xlu0 %2907 }
0x37fc   :  { %2913 = vst.msk [vmem:[#allocation14 + $0x7] sm:$0x1] %vm2710_vm11, %v2908_v9 }
0x37fd   :  { %2927 = dma.vmem_to_hbm [thread:$0]  %s2920_s19, 256, %s2922_s0, [#allocation5], %s3562_s24, %s3562_s24, %s3563_s25  }
0x37fe   :  { %3557 = dma.done.wait [#allocation5], 256  }
0x37ff   :  { %3558 = vsyncadd [#allocation5], 4294967040 }
0x3800   :  { %3559 = dma.done.wait [#allocation16], 256  }
0x3801   :  { %3560 = vsyncadd [#allocation16], 4294967040 }
0x3802   :  { %2966 = vsyncpa [#allocation4], 1 }
0x3803   :  { %2967 = vsyncpa [#allocation7], 1 }
0x3804   :  { %2968 = vsyncpa [#allocation10], 1 }
0x3805   :  { %2969 = vsyncpa [#allocation13], 1 }
0x3806   :  { %2970 = vsyncpa [#allocation5], 1 }
0x3807   :  { %2971 = vsyncpa [#allocation16], 1 }

</bundles_post_ra>
